<compile_context>
chip_gen: v7x
topology: tpu7x:2x2x1
jax: 0.10.0
libtpu: 0.0.40
codegen_flags: <defaults>
</compile_context>

<pallas_src>
import math
import numpy as np

import jax
import jax.numpy as jnp
from jax.experimental import pallas as pl
from jax.experimental.pallas import tpu as pltpu

# ---- Hyper-parameters (TransformerClassifier defaults, small feature dim) -------------
FEATURE_DIM = 16
D_MODEL = 64
NHEAD = 8
HEAD_DIM = D_MODEL // NHEAD
NUM_LAYERS = 3
DIM_FF = 256
NUM_CLASSES = 4
LN_EPS = 1e-5
MAX_LEN = 64          # positional-encoding table length (>= SEQ_LEN)

SEQ_LEN = 8
BATCH = 2

NEG_INF = -1e30


def _layer_norm(x, w, b):
    """PyTorch-style LayerNorm over the last axis (biased variance)."""
    mu = jnp.mean(x, axis=-1, keepdims=True)
    xc = x - mu
    var = jnp.mean(xc * xc, axis=-1, keepdims=True)
    return xc * jax.lax.rsqrt(var + LN_EPS) * w + b


# ----------------------------- Pallas kernel -------------------------------------------
def _transformer_kernel(x_ref, bias_ref, pe_ref, w_in_ref,
                        in_wt_ref, in_b_ref, out_wt_ref, out_b_ref,
                        ln1w_ref, ln1b_ref, w1_ref, b1_ref, w2_ref, b2_ref,
                        ln2w_ref, ln2b_ref, gather_ref, wcls_ref, bcls_ref,
                        out_ref):
    D, H, Hd = D_MODEL, NHEAD, HEAD_DIM

    # ---- input projection; positional encoding + input bias pre-folded on host ----
    x = jnp.dot(x_ref[...], w_in_ref[...],
                preferred_element_type=jnp.float32) + pe_ref[...]          # (N, D)

    # combined additive attention bias (cross-batch block mask + key padding), hoisted
    bias = bias_ref[...]                                                   # (N, N)

    # ---- transformer encoder layers (post-norm, ReLU FFN, no dropout) ----
    for l in range(NUM_LAYERS):
        wqkv = in_wt_ref[l]      # (D, 3D)   Q columns pre-scaled by 1/sqrt(Hd)
        bqkv = in_b_ref[l]       # (1, 3D)
        wo = out_wt_ref[l]       # (D, D)
        bo = out_b_ref[l]        # (1, D)
        ln1w = ln1w_ref[l]
        ln1b = ln1b_ref[l]
        w1 = w1_ref[l]           # (D, FF)
        b1 = b1_ref[l]           # (1, FF)
        w2 = w2_ref[l]           # (FF, D)
        b2 = b2_ref[l]           # (1, D)
        ln2w = ln2w_ref[l]
        ln2b = ln2b_ref[l]

        qkv = jnp.dot(x, wqkv, preferred_element_type=jnp.float32) + bqkv  # (N, 3D)

        attn = bo                # start accumulation from the out-proj bias (broadcasts)
        for h in range(H):
            lo = h * Hd
            qh = qkv[:, lo:lo + Hd]                       # (N, Hd), already scaled
            kh = qkv[:, D + lo:D + lo + Hd]               # (N, Hd)
            vh = qkv[:, 2 * D + lo:2 * D + lo + Hd]       # (N, Hd)

            # scores = qh @ kh^T over the fused (batch*seq) rows, masked per batch
            sc = jax.lax.dot_general(qh, kh, (((1,), (1,)), ((), ())),
                                     preferred_element_type=jnp.float32)  # (N, N)
            sc = sc + bias
            sc = sc - jnp.max(sc, axis=-1, keepdims=True)
            p = jnp.exp(sc)
            p = p / jnp.sum(p, axis=-1, keepdims=True)

            ctx = jnp.dot(p, vh, preferred_element_type=jnp.float32)      # (N, Hd)
            # fold the out_proj head-slice in directly (avoids lane-concat)
            attn = attn + jnp.dot(ctx, wo[lo:lo + Hd, :],
                                  preferred_element_type=jnp.float32)     # (N, D)

        y = _layer_norm(x + attn, ln1w, ln1b)
        h1 = jnp.maximum(jnp.dot(y, w1, preferred_element_type=jnp.float32) + b1, 0.0)
        ff = jnp.dot(h1, w2, preferred_element_type=jnp.float32) + b2
        x = _layer_norm(y + ff, ln2w, ln2b)

    # ---- pooling == 'last' (one-hot gather matrix built on host) + classifier ----
    feat = jnp.dot(gather_ref[...], x, preferred_element_type=jnp.float32)   # (B, D)
    out_ref[...] = jnp.dot(feat, wcls_ref[...],
                           preferred_element_type=jnp.float32) + bcls_ref[...]


# ----------------------------- host-side wrapper ---------------------------------------
@jax.jit
def transformer_classifier_forward(src, pad_mask, params):
    S, B, F = src.shape
    N = B * S
    f32 = jnp.float32

    # (S, B, F) -> fused (B*S, F) slab
    x2d = jnp.transpose(src.astype(f32), (1, 0, 2)).reshape(N, F)

    # additive attention bias: 0 where (same batch AND key not padded), -1e30 elsewhere
    batch_ids = jnp.repeat(jnp.arange(B), S)                                # (N,)
    same_batch = batch_ids[:, None] == batch_ids[None, :]
    keypad = pad_mask.reshape(N)
    allowed = jnp.logical_and(same_batch, jnp.logical_not(keypad)[None, :])
    attn_bias = jnp.where(allowed, 0.0, NEG_INF).astype(f32)                # (N, N)

    # positional encoding + input-proj bias, tiled over the fused batch axis
    pe_b = jnp.tile(params["pe"][:S] + params["b_in"], (B, 1))              # (N, D)

    # fold 1/sqrt(head_dim) into the Q columns of the packed QKV projection (weights+bias)
    col_scale = jnp.concatenate([
        jnp.full((D_MODEL,), 1.0 / math.sqrt(HEAD_DIM), f32),
        jnp.ones((2 * D_MODEL,), f32)])
    in_wt = params["in_wt"] * col_scale
    in_b = params["in_b"] * col_scale

    # 'last' pooling: integer-derived one-hot gather matrix over the fused rows
    lengths = jnp.sum(1 - pad_mask.astype(jnp.int32), axis=1)               # (B,)
    last = (lengths - 1) % S                                                # wraps like x[-1]
    rows = jnp.arange(B) * S + last
    gmat = (jnp.arange(N)[None, :] == rows[:, None]).astype(f32)            # (B, N)

    inputs = (
        x2d, attn_bias, pe_b, params["w_in_t"],
        in_wt, in_b, params["out_wt"], params["out_b"],
        params["ln1_w"], params["ln1_b"],
        params["w1_t"], params["b1"], params["w2_t"], params["b2"],
        params["ln2_w"], params["ln2_b"],
        gmat, params["w_cls_t"], params["b_cls"],
    )
    return pl.pallas_call(
        _transformer_kernel,
        out_shape=jax.ShapeDtypeStruct((B, NUM_CLASSES), jnp.float32),
        in_specs=[pl.BlockSpec(memory_space=pltpu.MemorySpace.VMEM)] * len(inputs),
        out_specs=pl.BlockSpec(memory_space=pltpu.MemorySpace.VMEM),
        compiler_params=pltpu.CompilerParams(vmem_limit_bytes=32 * 1024 * 1024),
    )(*inputs)


# ----------------------------- deterministic parameter init ----------------------------
def init_params(key):
    ks = jax.random.split(key, 12)
    f32 = jnp.float32

    def rnd(k, shape, s=0.05):
        return (s * jax.random.normal(k, shape)).astype(f32)

    # sinusoidal positional encoding table (same formula as PositionalEncoding)
    pos = jnp.arange(MAX_LEN, dtype=f32)[:, None]
    div = jnp.exp(jnp.arange(0, D_MODEL, 2, dtype=f32) * (-math.log(10000.0) / D_MODEL))
    pe = jnp.zeros((MAX_LEN, D_MODEL), f32)
    pe = pe.at[:, 0::2].set(jnp.sin(pos * div)).at[:, 1::2].set(jnp.cos(pos * div))

    L = NUM_LAYERS
    params = {
        "pe": pe,
        # input projection (weights pre-transposed to (in, out))
        "w_in_t": rnd(ks[0], (FEATURE_DIM, D_MODEL)),
        "b_in": rnd(ks[1], (1, D_MODEL)),
        # per-layer attention params, stacked on a leading layer axis
        "in_wt": rnd(ks[2], (L, D_MODEL, 3 * D_MODEL)),
        "in_b": rnd(ks[3], (L, 1, 3 * D_MODEL)),
        "out_wt": rnd(ks[4], (L, D_MODEL, D_MODEL)),
        "out_b": rnd(ks[5], (L, 1, D_MODEL)),
        "ln1_w": jnp.ones((L, 1, D_MODEL), f32),
        "ln1_b": jnp.zeros((L, 1, D_MODEL), f32),
        # feed-forward
        "w1_t": rnd(ks[6], (L, D_MODEL, DIM_FF)),
        "b1": rnd(ks[7], (L, 1, DIM_FF)),
        "w2_t": rnd(ks[8], (L, DIM_FF, D_MODEL)),
        "b2": rnd(ks[9], (L, 1, D_MODEL)),
        "ln2_w": jnp.ones((L, 1, D_MODEL), f32),
        "ln2_b": jnp.zeros((L, 1, D_MODEL), f32),
        # classifier head
        "w_cls_t": rnd(ks[10], (D_MODEL, NUM_CLASSES)),
        "b_cls": rnd(ks[11], (1, NUM_CLASSES)),
    }
    return params


# ----------------------------- pure-JAX reference (for verification) -------------------
def reference_forward(src, pad_mask, params):
    S, B, F = src.shape
    x = src @ params["w_in_t"] + params["b_in"]                    # (S, B, D)
    x = x + params["pe"][:S][:, None, :]
    maskf = pad_mask.astype(jnp.float32)
    for l in range(NUM_LAYERS):
        qkv = x @ params["in_wt"][l] + params["in_b"][l]           # (S, B, 3D)
        q, k, v = jnp.split(qkv, 3, axis=-1)
        q = q.reshape(S, B, NHEAD, HEAD_DIM).transpose(1, 2, 0, 3)  # (B, H, S, Hd)
        k = k.reshape(S, B, NHEAD, HEAD_DIM).transpose(1, 2, 0, 3)
        v = v.reshape(S, B, NHEAD, HEAD_DIM).transpose(1, 2, 0, 3)
        sc = (q / math.sqrt(HEAD_DIM)) @ jnp.swapaxes(k, -1, -2)    # (B, H, S, S)
        sc = sc + (maskf * NEG_INF)[:, None, None, :]
        p = jax.nn.softmax(sc, axis=-1)
        ctx = (p @ v).transpose(2, 0, 1, 3).reshape(S, B, D_MODEL)
        attn = ctx @ params["out_wt"][l] + params["out_b"][l]
        x = _layer_norm(x + attn, params["ln1_w"][l], params["ln1_b"][l])
        h1 = jax.nn.relu(x @ params["w1_t"][l] + params["b1"][l])
        ff = h1 @ params["w2_t"][l] + params["b2"][l]
        x = _layer_norm(x + ff, params["ln2_w"][l], params["ln2_b"][l])
    lengths = jnp.sum(1 - pad_mask.astype(jnp.int32), axis=1) - 1   # (B,)
    feat = x[lengths, jnp.arange(B), :]                             # (B, D)
    return feat @ params["w_cls_t"] + params["b_cls"]


# ----------------------------- main -----------------------------------------------------
if __name__ == "__main__":
    key = jax.random.PRNGKey(0)
    k_src, k_par = jax.random.split(key)

    params = init_params(k_par)

    # src: (seq_len, batch, feature_dim); key-padding mask: (batch, seq_len), True = pad
    src = jax.random.normal(k_src, (SEQ_LEN, BATCH, FEATURE_DIM), dtype=jnp.float32)
    lengths = jnp.array([SEQ_LEN, 5], dtype=jnp.int32)                       # per-batch valid length
    pad_mask = jnp.arange(SEQ_LEN)[None, :] >= lengths[:, None]              # (B, S) bool

    logits = transformer_classifier_forward(src, pad_mask, params)
    logits = jax.block_until_ready(logits)

    ref = reference_forward(src, pad_mask, params)
    np.testing.assert_allclose(np.asarray(logits), np.asarray(ref), atol=2e-3, rtol=2e-3)

    print("KERNEL_OK")
</pallas_src>

<mosaic_0001>
module attributes {stable_mosaic.version = 11 : i64} {
  func.func @_transformer_kernel(%arg0: memref<16x16xf32, #tpu.memory_space<vmem>>, %arg1: memref<16x16xf32, #tpu.memory_space<vmem>>, %arg2: memref<16x64xf32, #tpu.memory_space<vmem>>, %arg3: memref<16x64xf32, #tpu.memory_space<vmem>>, %arg4: memref<3x64x192xf32, #tpu.memory_space<vmem>>, %arg5: memref<3x1x192xf32, #tpu.memory_space<vmem>>, %arg6: memref<3x64x64xf32, #tpu.memory_space<vmem>>, %arg7: memref<3x1x64xf32, #tpu.memory_space<vmem>>, %arg8: memref<3x1x64xf32, #tpu.memory_space<vmem>>, %arg9: memref<3x1x64xf32, #tpu.memory_space<vmem>>, %arg10: memref<3x64x256xf32, #tpu.memory_space<vmem>>, %arg11: memref<3x1x256xf32, #tpu.memory_space<vmem>>, %arg12: memref<3x256x64xf32, #tpu.memory_space<vmem>>, %arg13: memref<3x1x64xf32, #tpu.memory_space<vmem>>, %arg14: memref<3x1x64xf32, #tpu.memory_space<vmem>>, %arg15: memref<3x1x64xf32, #tpu.memory_space<vmem>>, %arg16: memref<2x16xf32, #tpu.memory_space<vmem>>, %arg17: memref<64x4xf32, #tpu.memory_space<vmem>>, %arg18: memref<1x4xf32, #tpu.memory_space<vmem>>, %arg19: memref<2x4xf32, #tpu.memory_space<vmem>>) attributes {dimension_semantics = [], scalar_prefetch = 0 : i64, scratch_operands = 0 : i64, tpu.core_type = #tpu.core_type<tc>} {
    %c0 = arith.constant 0 : index
    %c0_0 = arith.constant 0 : index
    %0 = vector.load %arg0[%c0, %c0_0] : memref<16x16xf32, #tpu.memory_space<vmem>>, vector<16x16xf32>
    %c0_1 = arith.constant 0 : index
    %c0_2 = arith.constant 0 : index
    %1 = vector.load %arg3[%c0_1, %c0_2] : memref<16x64xf32, #tpu.memory_space<vmem>>, vector<16x64xf32>
    %cst = arith.constant dense<0.000000e+00> : vector<16x64xf32>
    %2 = tpu.matmul %0, %1, %cst {dimension_numbers = #tpu.dot_dimension_numbers<[1], [0], [0], [1], [0, 0, 1, 1], [], []>} : vector<16x16xf32>, vector<16x64xf32>, vector<16x64xf32> -> vector<16x64xf32>
    %c0_3 = arith.constant 0 : index
    %c0_4 = arith.constant 0 : index
    %3 = vector.load %arg2[%c0_3, %c0_4] : memref<16x64xf32, #tpu.memory_space<vmem>>, vector<16x64xf32>
    %4 = arith.addf %2, %3 : vector<16x64xf32>
    %c0_5 = arith.constant 0 : index
    %c0_6 = arith.constant 0 : index
    %5 = vector.load %arg1[%c0_5, %c0_6] : memref<16x16xf32, #tpu.memory_space<vmem>>, vector<16x16xf32>
    %c0_7 = arith.constant 0 : index
    %c0_8 = arith.constant 0 : index
    %c0_9 = arith.constant 0 : index
    %6 = vector.load %arg4[%c0_7, %c0_8, %c0_9] : memref<3x64x192xf32, #tpu.memory_space<vmem>>, vector<1x64x192xf32>
    %7 = vector.shape_cast %6 : vector<1x64x192xf32> to vector<64x192xf32>
    %c0_10 = arith.constant 0 : index
    %c0_11 = arith.constant 0 : index
    %c0_12 = arith.constant 0 : index
    %8 = vector.load %arg5[%c0_10, %c0_11, %c0_12] : memref<3x1x192xf32, #tpu.memory_space<vmem>>, vector<1x1x192xf32>
    %9 = vector.shape_cast %8 : vector<1x1x192xf32> to vector<1x192xf32>
    %c0_13 = arith.constant 0 : index
    %c0_14 = arith.constant 0 : index
    %c0_15 = arith.constant 0 : index
    %10 = vector.load %arg6[%c0_13, %c0_14, %c0_15] : memref<3x64x64xf32, #tpu.memory_space<vmem>>, vector<1x64x64xf32>
    %11 = vector.shape_cast %10 : vector<1x64x64xf32> to vector<64x64xf32>
    %c0_16 = arith.constant 0 : index
    %c0_17 = arith.constant 0 : index
    %c0_18 = arith.constant 0 : index
    %12 = vector.load %arg7[%c0_16, %c0_17, %c0_18] : memref<3x1x64xf32, #tpu.memory_space<vmem>>, vector<1x1x64xf32>
    %13 = vector.shape_cast %12 : vector<1x1x64xf32> to vector<1x64xf32>
    %c0_19 = arith.constant 0 : index
    %c0_20 = arith.constant 0 : index
    %c0_21 = arith.constant 0 : index
    %14 = vector.load %arg8[%c0_19, %c0_20, %c0_21] : memref<3x1x64xf32, #tpu.memory_space<vmem>>, vector<1x1x64xf32>
    %15 = vector.shape_cast %14 : vector<1x1x64xf32> to vector<1x64xf32>
    %c0_22 = arith.constant 0 : index
    %c0_23 = arith.constant 0 : index
    %c0_24 = arith.constant 0 : index
    %16 = vector.load %arg9[%c0_22, %c0_23, %c0_24] : memref<3x1x64xf32, #tpu.memory_space<vmem>>, vector<1x1x64xf32>
    %17 = vector.shape_cast %16 : vector<1x1x64xf32> to vector<1x64xf32>
    %c0_25 = arith.constant 0 : index
    %c0_26 = arith.constant 0 : index
    %c0_27 = arith.constant 0 : index
    %18 = vector.load %arg10[%c0_25, %c0_26, %c0_27] : memref<3x64x256xf32, #tpu.memory_space<vmem>>, vector<1x64x256xf32>
    %19 = vector.shape_cast %18 : vector<1x64x256xf32> to vector<64x256xf32>
    %c0_28 = arith.constant 0 : index
    %c0_29 = arith.constant 0 : index
    %c0_30 = arith.constant 0 : index
    %20 = vector.load %arg11[%c0_28, %c0_29, %c0_30] : memref<3x1x256xf32, #tpu.memory_space<vmem>>, vector<1x1x256xf32>
    %21 = vector.shape_cast %20 : vector<1x1x256xf32> to vector<1x256xf32>
    %c0_31 = arith.constant 0 : index
    %c0_32 = arith.constant 0 : index
    %c0_33 = arith.constant 0 : index
    %22 = vector.load %arg12[%c0_31, %c0_32, %c0_33] : memref<3x256x64xf32, #tpu.memory_space<vmem>>, vector<1x256x64xf32>
    %23 = vector.shape_cast %22 : vector<1x256x64xf32> to vector<256x64xf32>
    %c0_34 = arith.constant 0 : index
    %c0_35 = arith.constant 0 : index
    %c0_36 = arith.constant 0 : index
    %24 = vector.load %arg13[%c0_34, %c0_35, %c0_36] : memref<3x1x64xf32, #tpu.memory_space<vmem>>, vector<1x1x64xf32>
    %25 = vector.shape_cast %24 : vector<1x1x64xf32> to vector<1x64xf32>
    %c0_37 = arith.constant 0 : index
    %c0_38 = arith.constant 0 : index
    %c0_39 = arith.constant 0 : index
    %26 = vector.load %arg14[%c0_37, %c0_38, %c0_39] : memref<3x1x64xf32, #tpu.memory_space<vmem>>, vector<1x1x64xf32>
    %27 = vector.shape_cast %26 : vector<1x1x64xf32> to vector<1x64xf32>
    %c0_40 = arith.constant 0 : index
    %c0_41 = arith.constant 0 : index
    %c0_42 = arith.constant 0 : index
    %28 = vector.load %arg15[%c0_40, %c0_41, %c0_42] : memref<3x1x64xf32, #tpu.memory_space<vmem>>, vector<1x1x64xf32>
    %29 = vector.shape_cast %28 : vector<1x1x64xf32> to vector<1x64xf32>
    %cst_43 = arith.constant dense<0.000000e+00> : vector<16x192xf32>
    %30 = tpu.matmul %4, %7, %cst_43 {dimension_numbers = #tpu.dot_dimension_numbers<[1], [0], [0], [1], [0, 0, 1, 1], [], []>} : vector<16x64xf32>, vector<64x192xf32>, vector<16x192xf32> -> vector<16x192xf32>
    %31 = vector.broadcast %9 : vector<1x192xf32> to vector<16x192xf32>
    %32 = arith.addf %30, %31 : vector<16x192xf32>
    %33 = vector.extract_strided_slice %32 {offsets = [0, 0], sizes = [16, 8], strides = [1, 1]} : vector<16x192xf32> to vector<16x8xf32>
    %34 = vector.extract_strided_slice %32 {offsets = [0, 64], sizes = [16, 8], strides = [1, 1]} : vector<16x192xf32> to vector<16x8xf32>
    %35 = vector.extract_strided_slice %32 {offsets = [0, 128], sizes = [16, 8], strides = [1, 1]} : vector<16x192xf32> to vector<16x8xf32>
    %cst_44 = arith.constant dense<0.000000e+00> : vector<16x16xf32>
    %36 = tpu.matmul %33, %34, %cst_44 {dimension_numbers = #tpu.dot_dimension_numbers<[1], [1], [0], [0], [0, 0, 1, 0], [], []>} : vector<16x8xf32>, vector<16x8xf32>, vector<16x16xf32> -> vector<16x16xf32>
    %37 = arith.addf %36, %5 : vector<16x16xf32>
    %cst_45 = arith.constant dense<0xFF800000> : vector<16xf32>
    %38 = vector.multi_reduction <maximumf>, %37, %cst_45 [1] : vector<16x16xf32> to vector<16xf32>
    %39 = vector.shape_cast %38 : vector<16xf32> to vector<16x1xf32>
    %40 = vector.broadcast %39 : vector<16x1xf32> to vector<16x16xf32>
    %41 = arith.subf %37, %40 : vector<16x16xf32>
    %42 = math.exp %41 : vector<16x16xf32>
    %cst_46 = arith.constant dense<0.000000e+00> : vector<16xf32>
    %43 = vector.multi_reduction <add>, %42, %cst_46 [1] : vector<16x16xf32> to vector<16xf32>
    %44 = vector.shape_cast %43 : vector<16xf32> to vector<16x1xf32>
    %45 = vector.broadcast %44 : vector<16x1xf32> to vector<16x16xf32>
    %46 = arith.divf %42, %45 : vector<16x16xf32>
    %cst_47 = arith.constant dense<0.000000e+00> : vector<16x8xf32>
    %47 = tpu.matmul %46, %35, %cst_47 {dimension_numbers = #tpu.dot_dimension_numbers<[1], [0], [0], [1], [0, 0, 1, 1], [], []>} : vector<16x16xf32>, vector<16x8xf32>, vector<16x8xf32> -> vector<16x8xf32>
    %48 = vector.extract_strided_slice %11 {offsets = [0, 0], sizes = [8, 64], strides = [1, 1]} : vector<64x64xf32> to vector<8x64xf32>
    %cst_48 = arith.constant dense<0.000000e+00> : vector<16x64xf32>
    %49 = tpu.matmul %47, %48, %cst_48 {dimension_numbers = #tpu.dot_dimension_numbers<[1], [0], [0], [1], [0, 0, 1, 1], [], []>} : vector<16x8xf32>, vector<8x64xf32>, vector<16x64xf32> -> vector<16x64xf32>
    %50 = vector.broadcast %13 : vector<1x64xf32> to vector<16x64xf32>
    %51 = arith.addf %50, %49 : vector<16x64xf32>
    %52 = vector.extract_strided_slice %32 {offsets = [0, 8], sizes = [16, 8], strides = [1, 1]} : vector<16x192xf32> to vector<16x8xf32>
    %53 = vector.extract_strided_slice %32 {offsets = [0, 72], sizes = [16, 8], strides = [1, 1]} : vector<16x192xf32> to vector<16x8xf32>
    %54 = vector.extract_strided_slice %32 {offsets = [0, 136], sizes = [16, 8], strides = [1, 1]} : vector<16x192xf32> to vector<16x8xf32>
    %cst_49 = arith.constant dense<0.000000e+00> : vector<16x16xf32>
    %55 = tpu.matmul %52, %53, %cst_49 {dimension_numbers = #tpu.dot_dimension_numbers<[1], [1], [0], [0], [0, 0, 1, 0], [], []>} : vector<16x8xf32>, vector<16x8xf32>, vector<16x16xf32> -> vector<16x16xf32>
    %56 = arith.addf %55, %5 : vector<16x16xf32>
    %cst_50 = arith.constant dense<0xFF800000> : vector<16xf32>
    %57 = vector.multi_reduction <maximumf>, %56, %cst_50 [1] : vector<16x16xf32> to vector<16xf32>
    %58 = vector.shape_cast %57 : vector<16xf32> to vector<16x1xf32>
    %59 = vector.broadcast %58 : vector<16x1xf32> to vector<16x16xf32>
    %60 = arith.subf %56, %59 : vector<16x16xf32>
    %61 = math.exp %60 : vector<16x16xf32>
    %cst_51 = arith.constant dense<0.000000e+00> : vector<16xf32>
    %62 = vector.multi_reduction <add>, %61, %cst_51 [1] : vector<16x16xf32> to vector<16xf32>
    %63 = vector.shape_cast %62 : vector<16xf32> to vector<16x1xf32>
    %64 = vector.broadcast %63 : vector<16x1xf32> to vector<16x16xf32>
    %65 = arith.divf %61, %64 : vector<16x16xf32>
    %cst_52 = arith.constant dense<0.000000e+00> : vector<16x8xf32>
    %66 = tpu.matmul %65, %54, %cst_52 {dimension_numbers = #tpu.dot_dimension_numbers<[1], [0], [0], [1], [0, 0, 1, 1], [], []>} : vector<16x16xf32>, vector<16x8xf32>, vector<16x8xf32> -> vector<16x8xf32>
    %67 = vector.extract_strided_slice %11 {offsets = [8, 0], sizes = [8, 64], strides = [1, 1]} : vector<64x64xf32> to vector<8x64xf32>
    %cst_53 = arith.constant dense<0.000000e+00> : vector<16x64xf32>
    %68 = tpu.matmul %66, %67, %cst_53 {dimension_numbers = #tpu.dot_dimension_numbers<[1], [0], [0], [1], [0, 0, 1, 1], [], []>} : vector<16x8xf32>, vector<8x64xf32>, vector<16x64xf32> -> vector<16x64xf32>
    %69 = arith.addf %51, %68 : vector<16x64xf32>
    %70 = vector.extract_strided_slice %32 {offsets = [0, 16], sizes = [16, 8], strides = [1, 1]} : vector<16x192xf32> to vector<16x8xf32>
    %71 = vector.extract_strided_slice %32 {offsets = [0, 80], sizes = [16, 8], strides = [1, 1]} : vector<16x192xf32> to vector<16x8xf32>
    %72 = vector.extract_strided_slice %32 {offsets = [0, 144], sizes = [16, 8], strides = [1, 1]} : vector<16x192xf32> to vector<16x8xf32>
    %cst_54 = arith.constant dense<0.000000e+00> : vector<16x16xf32>
    %73 = tpu.matmul %70, %71, %cst_54 {dimension_numbers = #tpu.dot_dimension_numbers<[1], [1], [0], [0], [0, 0, 1, 0], [], []>} : vector<16x8xf32>, vector<16x8xf32>, vector<16x16xf32> -> vector<16x16xf32>
    %74 = arith.addf %73, %5 : vector<16x16xf32>
    %cst_55 = arith.constant dense<0xFF800000> : vector<16xf32>
    %75 = vector.multi_reduction <maximumf>, %74, %cst_55 [1] : vector<16x16xf32> to vector<16xf32>
    %76 = vector.shape_cast %75 : vector<16xf32> to vector<16x1xf32>
    %77 = vector.broadcast %76 : vector<16x1xf32> to vector<16x16xf32>
    %78 = arith.subf %74, %77 : vector<16x16xf32>
    %79 = math.exp %78 : vector<16x16xf32>
    %cst_56 = arith.constant dense<0.000000e+00> : vector<16xf32>
    %80 = vector.multi_reduction <add>, %79, %cst_56 [1] : vector<16x16xf32> to vector<16xf32>
    %81 = vector.shape_cast %80 : vector<16xf32> to vector<16x1xf32>
    %82 = vector.broadcast %81 : vector<16x1xf32> to vector<16x16xf32>
    %83 = arith.divf %79, %82 : vector<16x16xf32>
    %cst_57 = arith.constant dense<0.000000e+00> : vector<16x8xf32>
    %84 = tpu.matmul %83, %72, %cst_57 {dimension_numbers = #tpu.dot_dimension_numbers<[1], [0], [0], [1], [0, 0, 1, 1], [], []>} : vector<16x16xf32>, vector<16x8xf32>, vector<16x8xf32> -> vector<16x8xf32>
    %85 = vector.extract_strided_slice %11 {offsets = [16, 0], sizes = [8, 64], strides = [1, 1]} : vector<64x64xf32> to vector<8x64xf32>
    %cst_58 = arith.constant dense<0.000000e+00> : vector<16x64xf32>
    %86 = tpu.matmul %84, %85, %cst_58 {dimension_numbers = #tpu.dot_dimension_numbers<[1], [0], [0], [1], [0, 0, 1, 1], [], []>} : vector<16x8xf32>, vector<8x64xf32>, vector<16x64xf32> -> vector<16x64xf32>
    %87 = arith.addf %69, %86 : vector<16x64xf32>
    %88 = vector.extract_strided_slice %32 {offsets = [0, 24], sizes = [16, 8], strides = [1, 1]} : vector<16x192xf32> to vector<16x8xf32>
    %89 = vector.extract_strided_slice %32 {offsets = [0, 88], sizes = [16, 8], strides = [1, 1]} : vector<16x192xf32> to vector<16x8xf32>
    %90 = vector.extract_strided_slice %32 {offsets = [0, 152], sizes = [16, 8], strides = [1, 1]} : vector<16x192xf32> to vector<16x8xf32>
    %cst_59 = arith.constant dense<0.000000e+00> : vector<16x16xf32>
    %91 = tpu.matmul %88, %89, %cst_59 {dimension_numbers = #tpu.dot_dimension_numbers<[1], [1], [0], [0], [0, 0, 1, 0], [], []>} : vector<16x8xf32>, vector<16x8xf32>, vector<16x16xf32> -> vector<16x16xf32>
    %92 = arith.addf %91, %5 : vector<16x16xf32>
    %cst_60 = arith.constant dense<0xFF800000> : vector<16xf32>
    %93 = vector.multi_reduction <maximumf>, %92, %cst_60 [1] : vector<16x16xf32> to vector<16xf32>
    %94 = vector.shape_cast %93 : vector<16xf32> to vector<16x1xf32>
    %95 = vector.broadcast %94 : vector<16x1xf32> to vector<16x16xf32>
    %96 = arith.subf %92, %95 : vector<16x16xf32>
    %97 = math.exp %96 : vector<16x16xf32>
    %cst_61 = arith.constant dense<0.000000e+00> : vector<16xf32>
    %98 = vector.multi_reduction <add>, %97, %cst_61 [1] : vector<16x16xf32> to vector<16xf32>
    %99 = vector.shape_cast %98 : vector<16xf32> to vector<16x1xf32>
    %100 = vector.broadcast %99 : vector<16x1xf32> to vector<16x16xf32>
    %101 = arith.divf %97, %100 : vector<16x16xf32>
    %cst_62 = arith.constant dense<0.000000e+00> : vector<16x8xf32>
    %102 = tpu.matmul %101, %90, %cst_62 {dimension_numbers = #tpu.dot_dimension_numbers<[1], [0], [0], [1], [0, 0, 1, 1], [], []>} : vector<16x16xf32>, vector<16x8xf32>, vector<16x8xf32> -> vector<16x8xf32>
    %103 = vector.extract_strided_slice %11 {offsets = [24, 0], sizes = [8, 64], strides = [1, 1]} : vector<64x64xf32> to vector<8x64xf32>
    %cst_63 = arith.constant dense<0.000000e+00> : vector<16x64xf32>
    %104 = tpu.matmul %102, %103, %cst_63 {dimension_numbers = #tpu.dot_dimension_numbers<[1], [0], [0], [1], [0, 0, 1, 1], [], []>} : vector<16x8xf32>, vector<8x64xf32>, vector<16x64xf32> -> vector<16x64xf32>
    %105 = arith.addf %87, %104 : vector<16x64xf32>
    %106 = vector.extract_strided_slice %32 {offsets = [0, 32], sizes = [16, 8], strides = [1, 1]} : vector<16x192xf32> to vector<16x8xf32>
    %107 = vector.extract_strided_slice %32 {offsets = [0, 96], sizes = [16, 8], strides = [1, 1]} : vector<16x192xf32> to vector<16x8xf32>
    %108 = vector.extract_strided_slice %32 {offsets = [0, 160], sizes = [16, 8], strides = [1, 1]} : vector<16x192xf32> to vector<16x8xf32>
    %cst_64 = arith.constant dense<0.000000e+00> : vector<16x16xf32>
    %109 = tpu.matmul %106, %107, %cst_64 {dimension_numbers = #tpu.dot_dimension_numbers<[1], [1], [0], [0], [0, 0, 1, 0], [], []>} : vector<16x8xf32>, vector<16x8xf32>, vector<16x16xf32> -> vector<16x16xf32>
    %110 = arith.addf %109, %5 : vector<16x16xf32>
    %cst_65 = arith.constant dense<0xFF800000> : vector<16xf32>
    %111 = vector.multi_reduction <maximumf>, %110, %cst_65 [1] : vector<16x16xf32> to vector<16xf32>
    %112 = vector.shape_cast %111 : vector<16xf32> to vector<16x1xf32>
    %113 = vector.broadcast %112 : vector<16x1xf32> to vector<16x16xf32>
    %114 = arith.subf %110, %113 : vector<16x16xf32>
    %115 = math.exp %114 : vector<16x16xf32>
    %cst_66 = arith.constant dense<0.000000e+00> : vector<16xf32>
    %116 = vector.multi_reduction <add>, %115, %cst_66 [1] : vector<16x16xf32> to vector<16xf32>
    %117 = vector.shape_cast %116 : vector<16xf32> to vector<16x1xf32>
    %118 = vector.broadcast %117 : vector<16x1xf32> to vector<16x16xf32>
    %119 = arith.divf %115, %118 : vector<16x16xf32>
    %cst_67 = arith.constant dense<0.000000e+00> : vector<16x8xf32>
    %120 = tpu.matmul %119, %108, %cst_67 {dimension_numbers = #tpu.dot_dimension_numbers<[1], [0], [0], [1], [0, 0, 1, 1], [], []>} : vector<16x16xf32>, vector<16x8xf32>, vector<16x8xf32> -> vector<16x8xf32>
    %121 = vector.extract_strided_slice %11 {offsets = [32, 0], sizes = [8, 64], strides = [1, 1]} : vector<64x64xf32> to vector<8x64xf32>
    %cst_68 = arith.constant dense<0.000000e+00> : vector<16x64xf32>
    %122 = tpu.matmul %120, %121, %cst_68 {dimension_numbers = #tpu.dot_dimension_numbers<[1], [0], [0], [1], [0, 0, 1, 1], [], []>} : vector<16x8xf32>, vector<8x64xf32>, vector<16x64xf32> -> vector<16x64xf32>
    %123 = arith.addf %105, %122 : vector<16x64xf32>
    %124 = vector.extract_strided_slice %32 {offsets = [0, 40], sizes = [16, 8], strides = [1, 1]} : vector<16x192xf32> to vector<16x8xf32>
    %125 = vector.extract_strided_slice %32 {offsets = [0, 104], sizes = [16, 8], strides = [1, 1]} : vector<16x192xf32> to vector<16x8xf32>
    %126 = vector.extract_strided_slice %32 {offsets = [0, 168], sizes = [16, 8], strides = [1, 1]} : vector<16x192xf32> to vector<16x8xf32>
    %cst_69 = arith.constant dense<0.000000e+00> : vector<16x16xf32>
    %127 = tpu.matmul %124, %125, %cst_69 {dimension_numbers = #tpu.dot_dimension_numbers<[1], [1], [0], [0], [0, 0, 1, 0], [], []>} : vector<16x8xf32>, vector<16x8xf32>, vector<16x16xf32> -> vector<16x16xf32>
    %128 = arith.addf %127, %5 : vector<16x16xf32>
    %cst_70 = arith.constant dense<0xFF800000> : vector<16xf32>
    %129 = vector.multi_reduction <maximumf>, %128, %cst_70 [1] : vector<16x16xf32> to vector<16xf32>
    %130 = vector.shape_cast %129 : vector<16xf32> to vector<16x1xf32>
    %131 = vector.broadcast %130 : vector<16x1xf32> to vector<16x16xf32>
    %132 = arith.subf %128, %131 : vector<16x16xf32>
    %133 = math.exp %132 : vector<16x16xf32>
    %cst_71 = arith.constant dense<0.000000e+00> : vector<16xf32>
    %134 = vector.multi_reduction <add>, %133, %cst_71 [1] : vector<16x16xf32> to vector<16xf32>
    %135 = vector.shape_cast %134 : vector<16xf32> to vector<16x1xf32>
    %136 = vector.broadcast %135 : vector<16x1xf32> to vector<16x16xf32>
    %137 = arith.divf %133, %136 : vector<16x16xf32>
    %cst_72 = arith.constant dense<0.000000e+00> : vector<16x8xf32>
    %138 = tpu.matmul %137, %126, %cst_72 {dimension_numbers = #tpu.dot_dimension_numbers<[1], [0], [0], [1], [0, 0, 1, 1], [], []>} : vector<16x16xf32>, vector<16x8xf32>, vector<16x8xf32> -> vector<16x8xf32>
    %139 = vector.extract_strided_slice %11 {offsets = [40, 0], sizes = [8, 64], strides = [1, 1]} : vector<64x64xf32> to vector<8x64xf32>
    %cst_73 = arith.constant dense<0.000000e+00> : vector<16x64xf32>
    %140 = tpu.matmul %138, %139, %cst_73 {dimension_numbers = #tpu.dot_dimension_numbers<[1], [0], [0], [1], [0, 0, 1, 1], [], []>} : vector<16x8xf32>, vector<8x64xf32>, vector<16x64xf32> -> vector<16x64xf32>
    %141 = arith.addf %123, %140 : vector<16x64xf32>
    %142 = vector.extract_strided_slice %32 {offsets = [0, 48], sizes = [16, 8], strides = [1, 1]} : vector<16x192xf32> to vector<16x8xf32>
    %143 = vector.extract_strided_slice %32 {offsets = [0, 112], sizes = [16, 8], strides = [1, 1]} : vector<16x192xf32> to vector<16x8xf32>
    %144 = vector.extract_strided_slice %32 {offsets = [0, 176], sizes = [16, 8], strides = [1, 1]} : vector<16x192xf32> to vector<16x8xf32>
    %cst_74 = arith.constant dense<0.000000e+00> : vector<16x16xf32>
    %145 = tpu.matmul %142, %143, %cst_74 {dimension_numbers = #tpu.dot_dimension_numbers<[1], [1], [0], [0], [0, 0, 1, 0], [], []>} : vector<16x8xf32>, vector<16x8xf32>, vector<16x16xf32> -> vector<16x16xf32>
    %146 = arith.addf %145, %5 : vector<16x16xf32>
    %cst_75 = arith.constant dense<0xFF800000> : vector<16xf32>
    %147 = vector.multi_reduction <maximumf>, %146, %cst_75 [1] : vector<16x16xf32> to vector<16xf32>
    %148 = vector.shape_cast %147 : vector<16xf32> to vector<16x1xf32>
    %149 = vector.broadcast %148 : vector<16x1xf32> to vector<16x16xf32>
    %150 = arith.subf %146, %149 : vector<16x16xf32>
    %151 = math.exp %150 : vector<16x16xf32>
    %cst_76 = arith.constant dense<0.000000e+00> : vector<16xf32>
    %152 = vector.multi_reduction <add>, %151, %cst_76 [1] : vector<16x16xf32> to vector<16xf32>
    %153 = vector.shape_cast %152 : vector<16xf32> to vector<16x1xf32>
    %154 = vector.broadcast %153 : vector<16x1xf32> to vector<16x16xf32>
    %155 = arith.divf %151, %154 : vector<16x16xf32>
    %cst_77 = arith.constant dense<0.000000e+00> : vector<16x8xf32>
    %156 = tpu.matmul %155, %144, %cst_77 {dimension_numbers = #tpu.dot_dimension_numbers<[1], [0], [0], [1], [0, 0, 1, 1], [], []>} : vector<16x16xf32>, vector<16x8xf32>, vector<16x8xf32> -> vector<16x8xf32>
    %157 = vector.extract_strided_slice %11 {offsets = [48, 0], sizes = [8, 64], strides = [1, 1]} : vector<64x64xf32> to vector<8x64xf32>
    %cst_78 = arith.constant dense<0.000000e+00> : vector<16x64xf32>
    %158 = tpu.matmul %156, %157, %cst_78 {dimension_numbers = #tpu.dot_dimension_numbers<[1], [0], [0], [1], [0, 0, 1, 1], [], []>} : vector<16x8xf32>, vector<8x64xf32>, vector<16x64xf32> -> vector<16x64xf32>
    %159 = arith.addf %141, %158 : vector<16x64xf32>
    %160 = vector.extract_strided_slice %32 {offsets = [0, 56], sizes = [16, 8], strides = [1, 1]} : vector<16x192xf32> to vector<16x8xf32>
    %161 = vector.extract_strided_slice %32 {offsets = [0, 120], sizes = [16, 8], strides = [1, 1]} : vector<16x192xf32> to vector<16x8xf32>
    %162 = vector.extract_strided_slice %32 {offsets = [0, 184], sizes = [16, 8], strides = [1, 1]} : vector<16x192xf32> to vector<16x8xf32>
    %cst_79 = arith.constant dense<0.000000e+00> : vector<16x16xf32>
    %163 = tpu.matmul %160, %161, %cst_79 {dimension_numbers = #tpu.dot_dimension_numbers<[1], [1], [0], [0], [0, 0, 1, 0], [], []>} : vector<16x8xf32>, vector<16x8xf32>, vector<16x16xf32> -> vector<16x16xf32>
    %164 = arith.addf %163, %5 : vector<16x16xf32>
    %cst_80 = arith.constant dense<0xFF800000> : vector<16xf32>
    %165 = vector.multi_reduction <maximumf>, %164, %cst_80 [1] : vector<16x16xf32> to vector<16xf32>
    %166 = vector.shape_cast %165 : vector<16xf32> to vector<16x1xf32>
    %167 = vector.broadcast %166 : vector<16x1xf32> to vector<16x16xf32>
    %168 = arith.subf %164, %167 : vector<16x16xf32>
    %169 = math.exp %168 : vector<16x16xf32>
    %cst_81 = arith.constant dense<0.000000e+00> : vector<16xf32>
    %170 = vector.multi_reduction <add>, %169, %cst_81 [1] : vector<16x16xf32> to vector<16xf32>
    %171 = vector.shape_cast %170 : vector<16xf32> to vector<16x1xf32>
    %172 = vector.broadcast %171 : vector<16x1xf32> to vector<16x16xf32>
    %173 = arith.divf %169, %172 : vector<16x16xf32>
    %cst_82 = arith.constant dense<0.000000e+00> : vector<16x8xf32>
    %174 = tpu.matmul %173, %162, %cst_82 {dimension_numbers = #tpu.dot_dimension_numbers<[1], [0], [0], [1], [0, 0, 1, 1], [], []>} : vector<16x16xf32>, vector<16x8xf32>, vector<16x8xf32> -> vector<16x8xf32>
    %175 = vector.extract_strided_slice %11 {offsets = [56, 0], sizes = [8, 64], strides = [1, 1]} : vector<64x64xf32> to vector<8x64xf32>
    %cst_83 = arith.constant dense<0.000000e+00> : vector<16x64xf32>
    %176 = tpu.matmul %174, %175, %cst_83 {dimension_numbers = #tpu.dot_dimension_numbers<[1], [0], [0], [1], [0, 0, 1, 1], [], []>} : vector<16x8xf32>, vector<8x64xf32>, vector<16x64xf32> -> vector<16x64xf32>
    %177 = arith.addf %159, %176 : vector<16x64xf32>
    %178 = arith.addf %4, %177 : vector<16x64xf32>
    %cst_84 = arith.constant dense<0.000000e+00> : vector<16xf32>
    %179 = vector.multi_reduction <add>, %178, %cst_84 [1] : vector<16x64xf32> to vector<16xf32>
    %180 = vector.shape_cast %179 : vector<16xf32> to vector<16x1xf32>
    %cst_85 = arith.constant 6.400000e+01 : f32
    %181 = vector.broadcast %cst_85 : f32 to vector<16x1xf32>
    %182 = arith.divf %180, %181 : vector<16x1xf32>
    %183 = vector.broadcast %182 : vector<16x1xf32> to vector<16x64xf32>
    %184 = arith.subf %178, %183 : vector<16x64xf32>
    %185 = arith.mulf %184, %184 : vector<16x64xf32>
    %cst_86 = arith.constant dense<0.000000e+00> : vector<16xf32>
    %186 = vector.multi_reduction <add>, %185, %cst_86 [1] : vector<16x64xf32> to vector<16xf32>
    %187 = vector.shape_cast %186 : vector<16xf32> to vector<16x1xf32>
    %cst_87 = arith.constant 6.400000e+01 : f32
    %188 = vector.broadcast %cst_87 : f32 to vector<16x1xf32>
    %189 = arith.divf %187, %188 : vector<16x1xf32>
    %cst_88 = arith.constant 9.99999974E-6 : f32
    %190 = vector.broadcast %cst_88 : f32 to vector<16x1xf32>
    %191 = arith.addf %189, %190 : vector<16x1xf32>
    %192 = math.rsqrt %191 : vector<16x1xf32>
    %193 = vector.broadcast %192 : vector<16x1xf32> to vector<16x64xf32>
    %194 = arith.mulf %184, %193 : vector<16x64xf32>
    %195 = vector.broadcast %15 : vector<1x64xf32> to vector<16x64xf32>
    %196 = arith.mulf %194, %195 : vector<16x64xf32>
    %197 = vector.broadcast %17 : vector<1x64xf32> to vector<16x64xf32>
    %198 = arith.addf %196, %197 : vector<16x64xf32>
    %cst_89 = arith.constant dense<0.000000e+00> : vector<16x256xf32>
    %199 = tpu.matmul %198, %19, %cst_89 {dimension_numbers = #tpu.dot_dimension_numbers<[1], [0], [0], [1], [0, 0, 1, 1], [], []>} : vector<16x64xf32>, vector<64x256xf32>, vector<16x256xf32> -> vector<16x256xf32>
    %200 = vector.broadcast %21 : vector<1x256xf32> to vector<16x256xf32>
    %201 = arith.addf %199, %200 : vector<16x256xf32>
    %cst_90 = arith.constant 0.000000e+00 : f32
    %202 = vector.broadcast %cst_90 : f32 to vector<16x256xf32>
    %203 = arith.maximumf %201, %202 : vector<16x256xf32>
    %cst_91 = arith.constant dense<0.000000e+00> : vector<16x64xf32>
    %204 = tpu.matmul %203, %23, %cst_91 {dimension_numbers = #tpu.dot_dimension_numbers<[1], [0], [0], [1], [0, 0, 1, 1], [], []>} : vector<16x256xf32>, vector<256x64xf32>, vector<16x64xf32> -> vector<16x64xf32>
    %205 = vector.broadcast %25 : vector<1x64xf32> to vector<16x64xf32>
    %206 = arith.addf %204, %205 : vector<16x64xf32>
    %207 = arith.addf %198, %206 : vector<16x64xf32>
    %cst_92 = arith.constant dense<0.000000e+00> : vector<16xf32>
    %208 = vector.multi_reduction <add>, %207, %cst_92 [1] : vector<16x64xf32> to vector<16xf32>
    %209 = vector.shape_cast %208 : vector<16xf32> to vector<16x1xf32>
    %cst_93 = arith.constant 6.400000e+01 : f32
    %210 = vector.broadcast %cst_93 : f32 to vector<16x1xf32>
    %211 = arith.divf %209, %210 : vector<16x1xf32>
    %212 = vector.broadcast %211 : vector<16x1xf32> to vector<16x64xf32>
    %213 = arith.subf %207, %212 : vector<16x64xf32>
    %214 = arith.mulf %213, %213 : vector<16x64xf32>
    %cst_94 = arith.constant dense<0.000000e+00> : vector<16xf32>
    %215 = vector.multi_reduction <add>, %214, %cst_94 [1] : vector<16x64xf32> to vector<16xf32>
    %216 = vector.shape_cast %215 : vector<16xf32> to vector<16x1xf32>
    %cst_95 = arith.constant 6.400000e+01 : f32
    %217 = vector.broadcast %cst_95 : f32 to vector<16x1xf32>
    %218 = arith.divf %216, %217 : vector<16x1xf32>
    %cst_96 = arith.constant 9.99999974E-6 : f32
    %219 = vector.broadcast %cst_96 : f32 to vector<16x1xf32>
    %220 = arith.addf %218, %219 : vector<16x1xf32>
    %221 = math.rsqrt %220 : vector<16x1xf32>
    %222 = vector.broadcast %221 : vector<16x1xf32> to vector<16x64xf32>
    %223 = arith.mulf %213, %222 : vector<16x64xf32>
    %224 = vector.broadcast %27 : vector<1x64xf32> to vector<16x64xf32>
    %225 = arith.mulf %223, %224 : vector<16x64xf32>
    %226 = vector.broadcast %29 : vector<1x64xf32> to vector<16x64xf32>
    %227 = arith.addf %225, %226 : vector<16x64xf32>
    %c1 = arith.constant 1 : index
    %c0_97 = arith.constant 0 : index
    %c0_98 = arith.constant 0 : index
    %228 = vector.load %arg4[%c1, %c0_97, %c0_98] : memref<3x64x192xf32, #tpu.memory_space<vmem>>, vector<1x64x192xf32>
    %229 = vector.shape_cast %228 : vector<1x64x192xf32> to vector<64x192xf32>
    %c1_99 = arith.constant 1 : index
    %c0_100 = arith.constant 0 : index
    %c0_101 = arith.constant 0 : index
    %230 = vector.load %arg5[%c1_99, %c0_100, %c0_101] : memref<3x1x192xf32, #tpu.memory_space<vmem>>, vector<1x1x192xf32>
    %231 = vector.shape_cast %230 : vector<1x1x192xf32> to vector<1x192xf32>
    %c1_102 = arith.constant 1 : index
    %c0_103 = arith.constant 0 : index
    %c0_104 = arith.constant 0 : index
    %232 = vector.load %arg6[%c1_102, %c0_103, %c0_104] : memref<3x64x64xf32, #tpu.memory_space<vmem>>, vector<1x64x64xf32>
    %233 = vector.shape_cast %232 : vector<1x64x64xf32> to vector<64x64xf32>
    %c1_105 = arith.constant 1 : index
    %c0_106 = arith.constant 0 : index
    %c0_107 = arith.constant 0 : index
    %234 = vector.load %arg7[%c1_105, %c0_106, %c0_107] : memref<3x1x64xf32, #tpu.memory_space<vmem>>, vector<1x1x64xf32>
    %235 = vector.shape_cast %234 : vector<1x1x64xf32> to vector<1x64xf32>
    %c1_108 = arith.constant 1 : index
    %c0_109 = arith.constant 0 : index
    %c0_110 = arith.constant 0 : index
    %236 = vector.load %arg8[%c1_108, %c0_109, %c0_110] : memref<3x1x64xf32, #tpu.memory_space<vmem>>, vector<1x1x64xf32>
    %237 = vector.shape_cast %236 : vector<1x1x64xf32> to vector<1x64xf32>
    %c1_111 = arith.constant 1 : index
    %c0_112 = arith.constant 0 : index
    %c0_113 = arith.constant 0 : index
    %238 = vector.load %arg9[%c1_111, %c0_112, %c0_113] : memref<3x1x64xf32, #tpu.memory_space<vmem>>, vector<1x1x64xf32>
    %239 = vector.shape_cast %238 : vector<1x1x64xf32> to vector<1x64xf32>
    %c1_114 = arith.constant 1 : index
    %c0_115 = arith.constant 0 : index
    %c0_116 = arith.constant 0 : index
    %240 = vector.load %arg10[%c1_114, %c0_115, %c0_116] : memref<3x64x256xf32, #tpu.memory_space<vmem>>, vector<1x64x256xf32>
    %241 = vector.shape_cast %240 : vector<1x64x256xf32> to vector<64x256xf32>
    %c1_117 = arith.constant 1 : index
    %c0_118 = arith.constant 0 : index
    %c0_119 = arith.constant 0 : index
    %242 = vector.load %arg11[%c1_117, %c0_118, %c0_119] : memref<3x1x256xf32, #tpu.memory_space<vmem>>, vector<1x1x256xf32>
    %243 = vector.shape_cast %242 : vector<1x1x256xf32> to vector<1x256xf32>
    %c1_120 = arith.constant 1 : index
    %c0_121 = arith.constant 0 : index
    %c0_122 = arith.constant 0 : index
    %244 = vector.load %arg12[%c1_120, %c0_121, %c0_122] : memref<3x256x64xf32, #tpu.memory_space<vmem>>, vector<1x256x64xf32>
    %245 = vector.shape_cast %244 : vector<1x256x64xf32> to vector<256x64xf32>
    %c1_123 = arith.constant 1 : index
    %c0_124 = arith.constant 0 : index
    %c0_125 = arith.constant 0 : index
    %246 = vector.load %arg13[%c1_123, %c0_124, %c0_125] : memref<3x1x64xf32, #tpu.memory_space<vmem>>, vector<1x1x64xf32>
    %247 = vector.shape_cast %246 : vector<1x1x64xf32> to vector<1x64xf32>
    %c1_126 = arith.constant 1 : index
    %c0_127 = arith.constant 0 : index
    %c0_128 = arith.constant 0 : index
    %248 = vector.load %arg14[%c1_126, %c0_127, %c0_128] : memref<3x1x64xf32, #tpu.memory_space<vmem>>, vector<1x1x64xf32>
    %249 = vector.shape_cast %248 : vector<1x1x64xf32> to vector<1x64xf32>
    %c1_129 = arith.constant 1 : index
    %c0_130 = arith.constant 0 : index
    %c0_131 = arith.constant 0 : index
    %250 = vector.load %arg15[%c1_129, %c0_130, %c0_131] : memref<3x1x64xf32, #tpu.memory_space<vmem>>, vector<1x1x64xf32>
    %251 = vector.shape_cast %250 : vector<1x1x64xf32> to vector<1x64xf32>
    %cst_132 = arith.constant dense<0.000000e+00> : vector<16x192xf32>
    %252 = tpu.matmul %227, %229, %cst_132 {dimension_numbers = #tpu.dot_dimension_numbers<[1], [0], [0], [1], [0, 0, 1, 1], [], []>} : vector<16x64xf32>, vector<64x192xf32>, vector<16x192xf32> -> vector<16x192xf32>
    %253 = vector.broadcast %231 : vector<1x192xf32> to vector<16x192xf32>
    %254 = arith.addf %252, %253 : vector<16x192xf32>
    %255 = vector.extract_strided_slice %254 {offsets = [0, 0], sizes = [16, 8], strides = [1, 1]} : vector<16x192xf32> to vector<16x8xf32>
    %256 = vector.extract_strided_slice %254 {offsets = [0, 64], sizes = [16, 8], strides = [1, 1]} : vector<16x192xf32> to vector<16x8xf32>
    %257 = vector.extract_strided_slice %254 {offsets = [0, 128], sizes = [16, 8], strides = [1, 1]} : vector<16x192xf32> to vector<16x8xf32>
    %cst_133 = arith.constant dense<0.000000e+00> : vector<16x16xf32>
    %258 = tpu.matmul %255, %256, %cst_133 {dimension_numbers = #tpu.dot_dimension_numbers<[1], [1], [0], [0], [0, 0, 1, 0], [], []>} : vector<16x8xf32>, vector<16x8xf32>, vector<16x16xf32> -> vector<16x16xf32>
    %259 = arith.addf %258, %5 : vector<16x16xf32>
    %cst_134 = arith.constant dense<0xFF800000> : vector<16xf32>
    %260 = vector.multi_reduction <maximumf>, %259, %cst_134 [1] : vector<16x16xf32> to vector<16xf32>
    %261 = vector.shape_cast %260 : vector<16xf32> to vector<16x1xf32>
    %262 = vector.broadcast %261 : vector<16x1xf32> to vector<16x16xf32>
    %263 = arith.subf %259, %262 : vector<16x16xf32>
    %264 = math.exp %263 : vector<16x16xf32>
    %cst_135 = arith.constant dense<0.000000e+00> : vector<16xf32>
    %265 = vector.multi_reduction <add>, %264, %cst_135 [1] : vector<16x16xf32> to vector<16xf32>
    %266 = vector.shape_cast %265 : vector<16xf32> to vector<16x1xf32>
    %267 = vector.broadcast %266 : vector<16x1xf32> to vector<16x16xf32>
    %268 = arith.divf %264, %267 : vector<16x16xf32>
    %cst_136 = arith.constant dense<0.000000e+00> : vector<16x8xf32>
    %269 = tpu.matmul %268, %257, %cst_136 {dimension_numbers = #tpu.dot_dimension_numbers<[1], [0], [0], [1], [0, 0, 1, 1], [], []>} : vector<16x16xf32>, vector<16x8xf32>, vector<16x8xf32> -> vector<16x8xf32>
    %270 = vector.extract_strided_slice %233 {offsets = [0, 0], sizes = [8, 64], strides = [1, 1]} : vector<64x64xf32> to vector<8x64xf32>
    %cst_137 = arith.constant dense<0.000000e+00> : vector<16x64xf32>
    %271 = tpu.matmul %269, %270, %cst_137 {dimension_numbers = #tpu.dot_dimension_numbers<[1], [0], [0], [1], [0, 0, 1, 1], [], []>} : vector<16x8xf32>, vector<8x64xf32>, vector<16x64xf32> -> vector<16x64xf32>
    %272 = vector.broadcast %235 : vector<1x64xf32> to vector<16x64xf32>
    %273 = arith.addf %272, %271 : vector<16x64xf32>
    %274 = vector.extract_strided_slice %254 {offsets = [0, 8], sizes = [16, 8], strides = [1, 1]} : vector<16x192xf32> to vector<16x8xf32>
    %275 = vector.extract_strided_slice %254 {offsets = [0, 72], sizes = [16, 8], strides = [1, 1]} : vector<16x192xf32> to vector<16x8xf32>
    %276 = vector.extract_strided_slice %254 {offsets = [0, 136], sizes = [16, 8], strides = [1, 1]} : vector<16x192xf32> to vector<16x8xf32>
    %cst_138 = arith.constant dense<0.000000e+00> : vector<16x16xf32>
    %277 = tpu.matmul %274, %275, %cst_138 {dimension_numbers = #tpu.dot_dimension_numbers<[1], [1], [0], [0], [0, 0, 1, 0], [], []>} : vector<16x8xf32>, vector<16x8xf32>, vector<16x16xf32> -> vector<16x16xf32>
    %278 = arith.addf %277, %5 : vector<16x16xf32>
    %cst_139 = arith.constant dense<0xFF800000> : vector<16xf32>
    %279 = vector.multi_reduction <maximumf>, %278, %cst_139 [1] : vector<16x16xf32> to vector<16xf32>
    %280 = vector.shape_cast %279 : vector<16xf32> to vector<16x1xf32>
    %281 = vector.broadcast %280 : vector<16x1xf32> to vector<16x16xf32>
    %282 = arith.subf %278, %281 : vector<16x16xf32>
    %283 = math.exp %282 : vector<16x16xf32>
    %cst_140 = arith.constant dense<0.000000e+00> : vector<16xf32>
    %284 = vector.multi_reduction <add>, %283, %cst_140 [1] : vector<16x16xf32> to vector<16xf32>
    %285 = vector.shape_cast %284 : vector<16xf32> to vector<16x1xf32>
    %286 = vector.broadcast %285 : vector<16x1xf32> to vector<16x16xf32>
    %287 = arith.divf %283, %286 : vector<16x16xf32>
    %cst_141 = arith.constant dense<0.000000e+00> : vector<16x8xf32>
    %288 = tpu.matmul %287, %276, %cst_141 {dimension_numbers = #tpu.dot_dimension_numbers<[1], [0], [0], [1], [0, 0, 1, 1], [], []>} : vector<16x16xf32>, vector<16x8xf32>, vector<16x8xf32> -> vector<16x8xf32>
    %289 = vector.extract_strided_slice %233 {offsets = [8, 0], sizes = [8, 64], strides = [1, 1]} : vector<64x64xf32> to vector<8x64xf32>
    %cst_142 = arith.constant dense<0.000000e+00> : vector<16x64xf32>
    %290 = tpu.matmul %288, %289, %cst_142 {dimension_numbers = #tpu.dot_dimension_numbers<[1], [0], [0], [1], [0, 0, 1, 1], [], []>} : vector<16x8xf32>, vector<8x64xf32>, vector<16x64xf32> -> vector<16x64xf32>
    %291 = arith.addf %273, %290 : vector<16x64xf32>
    %292 = vector.extract_strided_slice %254 {offsets = [0, 16], sizes = [16, 8], strides = [1, 1]} : vector<16x192xf32> to vector<16x8xf32>
    %293 = vector.extract_strided_slice %254 {offsets = [0, 80], sizes = [16, 8], strides = [1, 1]} : vector<16x192xf32> to vector<16x8xf32>
    %294 = vector.extract_strided_slice %254 {offsets = [0, 144], sizes = [16, 8], strides = [1, 1]} : vector<16x192xf32> to vector<16x8xf32>
    %cst_143 = arith.constant dense<0.000000e+00> : vector<16x16xf32>
    %295 = tpu.matmul %292, %293, %cst_143 {dimension_numbers = #tpu.dot_dimension_numbers<[1], [1], [0], [0], [0, 0, 1, 0], [], []>} : vector<16x8xf32>, vector<16x8xf32>, vector<16x16xf32> -> vector<16x16xf32>
    %296 = arith.addf %295, %5 : vector<16x16xf32>
    %cst_144 = arith.constant dense<0xFF800000> : vector<16xf32>
    %297 = vector.multi_reduction <maximumf>, %296, %cst_144 [1] : vector<16x16xf32> to vector<16xf32>
    %298 = vector.shape_cast %297 : vector<16xf32> to vector<16x1xf32>
    %299 = vector.broadcast %298 : vector<16x1xf32> to vector<16x16xf32>
    %300 = arith.subf %296, %299 : vector<16x16xf32>
    %301 = math.exp %300 : vector<16x16xf32>
    %cst_145 = arith.constant dense<0.000000e+00> : vector<16xf32>
    %302 = vector.multi_reduction <add>, %301, %cst_145 [1] : vector<16x16xf32> to vector<16xf32>
    %303 = vector.shape_cast %302 : vector<16xf32> to vector<16x1xf32>
    %304 = vector.broadcast %303 : vector<16x1xf32> to vector<16x16xf32>
    %305 = arith.divf %301, %304 : vector<16x16xf32>
    %cst_146 = arith.constant dense<0.000000e+00> : vector<16x8xf32>
    %306 = tpu.matmul %305, %294, %cst_146 {dimension_numbers = #tpu.dot_dimension_numbers<[1], [0], [0], [1], [0, 0, 1, 1], [], []>} : vector<16x16xf32>, vector<16x8xf32>, vector<16x8xf32> -> vector<16x8xf32>
    %307 = vector.extract_strided_slice %233 {offsets = [16, 0], sizes = [8, 64], strides = [1, 1]} : vector<64x64xf32> to vector<8x64xf32>
    %cst_147 = arith.constant dense<0.000000e+00> : vector<16x64xf32>
    %308 = tpu.matmul %306, %307, %cst_147 {dimension_numbers = #tpu.dot_dimension_numbers<[1], [0], [0], [1], [0, 0, 1, 1], [], []>} : vector<16x8xf32>, vector<8x64xf32>, vector<16x64xf32> -> vector<16x64xf32>
    %309 = arith.addf %291, %308 : vector<16x64xf32>
    %310 = vector.extract_strided_slice %254 {offsets = [0, 24], sizes = [16, 8], strides = [1, 1]} : vector<16x192xf32> to vector<16x8xf32>
    %311 = vector.extract_strided_slice %254 {offsets = [0, 88], sizes = [16, 8], strides = [1, 1]} : vector<16x192xf32> to vector<16x8xf32>
    %312 = vector.extract_strided_slice %254 {offsets = [0, 152], sizes = [16, 8], strides = [1, 1]} : vector<16x192xf32> to vector<16x8xf32>
    %cst_148 = arith.constant dense<0.000000e+00> : vector<16x16xf32>
    %313 = tpu.matmul %310, %311, %cst_148 {dimension_numbers = #tpu.dot_dimension_numbers<[1], [1], [0], [0], [0, 0, 1, 0], [], []>} : vector<16x8xf32>, vector<16x8xf32>, vector<16x16xf32> -> vector<16x16xf32>
    %314 = arith.addf %313, %5 : vector<16x16xf32>
    %cst_149 = arith.constant dense<0xFF800000> : vector<16xf32>
    %315 = vector.multi_reduction <maximumf>, %314, %cst_149 [1] : vector<16x16xf32> to vector<16xf32>
    %316 = vector.shape_cast %315 : vector<16xf32> to vector<16x1xf32>
    %317 = vector.broadcast %316 : vector<16x1xf32> to vector<16x16xf32>
    %318 = arith.subf %314, %317 : vector<16x16xf32>
    %319 = math.exp %318 : vector<16x16xf32>
    %cst_150 = arith.constant dense<0.000000e+00> : vector<16xf32>
    %320 = vector.multi_reduction <add>, %319, %cst_150 [1] : vector<16x16xf32> to vector<16xf32>
    %321 = vector.shape_cast %320 : vector<16xf32> to vector<16x1xf32>
    %322 = vector.broadcast %321 : vector<16x1xf32> to vector<16x16xf32>
    %323 = arith.divf %319, %322 : vector<16x16xf32>
    %cst_151 = arith.constant dense<0.000000e+00> : vector<16x8xf32>
    %324 = tpu.matmul %323, %312, %cst_151 {dimension_numbers = #tpu.dot_dimension_numbers<[1], [0], [0], [1], [0, 0, 1, 1], [], []>} : vector<16x16xf32>, vector<16x8xf32>, vector<16x8xf32> -> vector<16x8xf32>
    %325 = vector.extract_strided_slice %233 {offsets = [24, 0], sizes = [8, 64], strides = [1, 1]} : vector<64x64xf32> to vector<8x64xf32>
    %cst_152 = arith.constant dense<0.000000e+00> : vector<16x64xf32>
    %326 = tpu.matmul %324, %325, %cst_152 {dimension_numbers = #tpu.dot_dimension_numbers<[1], [0], [0], [1], [0, 0, 1, 1], [], []>} : vector<16x8xf32>, vector<8x64xf32>, vector<16x64xf32> -> vector<16x64xf32>
    %327 = arith.addf %309, %326 : vector<16x64xf32>
    %328 = vector.extract_strided_slice %254 {offsets = [0, 32], sizes = [16, 8], strides = [1, 1]} : vector<16x192xf32> to vector<16x8xf32>
    %329 = vector.extract_strided_slice %254 {offsets = [0, 96], sizes = [16, 8], strides = [1, 1]} : vector<16x192xf32> to vector<16x8xf32>
    %330 = vector.extract_strided_slice %254 {offsets = [0, 160], sizes = [16, 8], strides = [1, 1]} : vector<16x192xf32> to vector<16x8xf32>
    %cst_153 = arith.constant dense<0.000000e+00> : vector<16x16xf32>
    %331 = tpu.matmul %328, %329, %cst_153 {dimension_numbers = #tpu.dot_dimension_numbers<[1], [1], [0], [0], [0, 0, 1, 0], [], []>} : vector<16x8xf32>, vector<16x8xf32>, vector<16x16xf32> -> vector<16x16xf32>
    %332 = arith.addf %331, %5 : vector<16x16xf32>
    %cst_154 = arith.constant dense<0xFF800000> : vector<16xf32>
    %333 = vector.multi_reduction <maximumf>, %332, %cst_154 [1] : vector<16x16xf32> to vector<16xf32>
    %334 = vector.shape_cast %333 : vector<16xf32> to vector<16x1xf32>
    %335 = vector.broadcast %334 : vector<16x1xf32> to vector<16x16xf32>
    %336 = arith.subf %332, %335 : vector<16x16xf32>
    %337 = math.exp %336 : vector<16x16xf32>
    %cst_155 = arith.constant dense<0.000000e+00> : vector<16xf32>
    %338 = vector.multi_reduction <add>, %337, %cst_155 [1] : vector<16x16xf32> to vector<16xf32>
    %339 = vector.shape_cast %338 : vector<16xf32> to vector<16x1xf32>
    %340 = vector.broadcast %339 : vector<16x1xf32> to vector<16x16xf32>
    %341 = arith.divf %337, %340 : vector<16x16xf32>
    %cst_156 = arith.constant dense<0.000000e+00> : vector<16x8xf32>
    %342 = tpu.matmul %341, %330, %cst_156 {dimension_numbers = #tpu.dot_dimension_numbers<[1], [0], [0], [1], [0, 0, 1, 1], [], []>} : vector<16x16xf32>, vector<16x8xf32>, vector<16x8xf32> -> vector<16x8xf32>
    %343 = vector.extract_strided_slice %233 {offsets = [32, 0], sizes = [8, 64], strides = [1, 1]} : vector<64x64xf32> to vector<8x64xf32>
    %cst_157 = arith.constant dense<0.000000e+00> : vector<16x64xf32>
    %344 = tpu.matmul %342, %343, %cst_157 {dimension_numbers = #tpu.dot_dimension_numbers<[1], [0], [0], [1], [0, 0, 1, 1], [], []>} : vector<16x8xf32>, vector<8x64xf32>, vector<16x64xf32> -> vector<16x64xf32>
    %345 = arith.addf %327, %344 : vector<16x64xf32>
    %346 = vector.extract_strided_slice %254 {offsets = [0, 40], sizes = [16, 8], strides = [1, 1]} : vector<16x192xf32> to vector<16x8xf32>
    %347 = vector.extract_strided_slice %254 {offsets = [0, 104], sizes = [16, 8], strides = [1, 1]} : vector<16x192xf32> to vector<16x8xf32>
    %348 = vector.extract_strided_slice %254 {offsets = [0, 168], sizes = [16, 8], strides = [1, 1]} : vector<16x192xf32> to vector<16x8xf32>
    %cst_158 = arith.constant dense<0.000000e+00> : vector<16x16xf32>
    %349 = tpu.matmul %346, %347, %cst_158 {dimension_numbers = #tpu.dot_dimension_numbers<[1], [1], [0], [0], [0, 0, 1, 0], [], []>} : vector<16x8xf32>, vector<16x8xf32>, vector<16x16xf32> -> vector<16x16xf32>
    %350 = arith.addf %349, %5 : vector<16x16xf32>
    %cst_159 = arith.constant dense<0xFF800000> : vector<16xf32>
    %351 = vector.multi_reduction <maximumf>, %350, %cst_159 [1] : vector<16x16xf32> to vector<16xf32>
    %352 = vector.shape_cast %351 : vector<16xf32> to vector<16x1xf32>
    %353 = vector.broadcast %352 : vector<16x1xf32> to vector<16x16xf32>
    %354 = arith.subf %350, %353 : vector<16x16xf32>
    %355 = math.exp %354 : vector<16x16xf32>
    %cst_160 = arith.constant dense<0.000000e+00> : vector<16xf32>
    %356 = vector.multi_reduction <add>, %355, %cst_160 [1] : vector<16x16xf32> to vector<16xf32>
    %357 = vector.shape_cast %356 : vector<16xf32> to vector<16x1xf32>
    %358 = vector.broadcast %357 : vector<16x1xf32> to vector<16x16xf32>
    %359 = arith.divf %355, %358 : vector<16x16xf32>
    %cst_161 = arith.constant dense<0.000000e+00> : vector<16x8xf32>
    %360 = tpu.matmul %359, %348, %cst_161 {dimension_numbers = #tpu.dot_dimension_numbers<[1], [0], [0], [1], [0, 0, 1, 1], [], []>} : vector<16x16xf32>, vector<16x8xf32>, vector<16x8xf32> -> vector<16x8xf32>
    %361 = vector.extract_strided_slice %233 {offsets = [40, 0], sizes = [8, 64], strides = [1, 1]} : vector<64x64xf32> to vector<8x64xf32>
    %cst_162 = arith.constant dense<0.000000e+00> : vector<16x64xf32>
    %362 = tpu.matmul %360, %361, %cst_162 {dimension_numbers = #tpu.dot_dimension_numbers<[1], [0], [0], [1], [0, 0, 1, 1], [], []>} : vector<16x8xf32>, vector<8x64xf32>, vector<16x64xf32> -> vector<16x64xf32>
    %363 = arith.addf %345, %362 : vector<16x64xf32>
    %364 = vector.extract_strided_slice %254 {offsets = [0, 48], sizes = [16, 8], strides = [1, 1]} : vector<16x192xf32> to vector<16x8xf32>
    %365 = vector.extract_strided_slice %254 {offsets = [0, 112], sizes = [16, 8], strides = [1, 1]} : vector<16x192xf32> to vector<16x8xf32>
    %366 = vector.extract_strided_slice %254 {offsets = [0, 176], sizes = [16, 8], strides = [1, 1]} : vector<16x192xf32> to vector<16x8xf32>
    %cst_163 = arith.constant dense<0.000000e+00> : vector<16x16xf32>
    %367 = tpu.matmul %364, %365, %cst_163 {dimension_numbers = #tpu.dot_dimension_numbers<[1], [1], [0], [0], [0, 0, 1, 0], [], []>} : vector<16x8xf32>, vector<16x8xf32>, vector<16x16xf32> -> vector<16x16xf32>
    %368 = arith.addf %367, %5 : vector<16x16xf32>
    %cst_164 = arith.constant dense<0xFF800000> : vector<16xf32>
    %369 = vector.multi_reduction <maximumf>, %368, %cst_164 [1] : vector<16x16xf32> to vector<16xf32>
    %370 = vector.shape_cast %369 : vector<16xf32> to vector<16x1xf32>
    %371 = vector.broadcast %370 : vector<16x1xf32> to vector<16x16xf32>
    %372 = arith.subf %368, %371 : vector<16x16xf32>
    %373 = math.exp %372 : vector<16x16xf32>
    %cst_165 = arith.constant dense<0.000000e+00> : vector<16xf32>
    %374 = vector.multi_reduction <add>, %373, %cst_165 [1] : vector<16x16xf32> to vector<16xf32>
    %375 = vector.shape_cast %374 : vector<16xf32> to vector<16x1xf32>
    %376 = vector.broadcast %375 : vector<16x1xf32> to vector<16x16xf32>
    %377 = arith.divf %373, %376 : vector<16x16xf32>
    %cst_166 = arith.constant dense<0.000000e+00> : vector<16x8xf32>
    %378 = tpu.matmul %377, %366, %cst_166 {dimension_numbers = #tpu.dot_dimension_numbers<[1], [0], [0], [1], [0, 0, 1, 1], [], []>} : vector<16x16xf32>, vector<16x8xf32>, vector<16x8xf32> -> vector<16x8xf32>
    %379 = vector.extract_strided_slice %233 {offsets = [48, 0], sizes = [8, 64], strides = [1, 1]} : vector<64x64xf32> to vector<8x64xf32>
    %cst_167 = arith.constant dense<0.000000e+00> : vector<16x64xf32>
    %380 = tpu.matmul %378, %379, %cst_167 {dimension_numbers = #tpu.dot_dimension_numbers<[1], [0], [0], [1], [0, 0, 1, 1], [], []>} : vector<16x8xf32>, vector<8x64xf32>, vector<16x64xf32> -> vector<16x64xf32>
    %381 = arith.addf %363, %380 : vector<16x64xf32>
    %382 = vector.extract_strided_slice %254 {offsets = [0, 56], sizes = [16, 8], strides = [1, 1]} : vector<16x192xf32> to vector<16x8xf32>
    %383 = vector.extract_strided_slice %254 {offsets = [0, 120], sizes = [16, 8], strides = [1, 1]} : vector<16x192xf32> to vector<16x8xf32>
    %384 = vector.extract_strided_slice %254 {offsets = [0, 184], sizes = [16, 8], strides = [1, 1]} : vector<16x192xf32> to vector<16x8xf32>
    %cst_168 = arith.constant dense<0.000000e+00> : vector<16x16xf32>
    %385 = tpu.matmul %382, %383, %cst_168 {dimension_numbers = #tpu.dot_dimension_numbers<[1], [1], [0], [0], [0, 0, 1, 0], [], []>} : vector<16x8xf32>, vector<16x8xf32>, vector<16x16xf32> -> vector<16x16xf32>
    %386 = arith.addf %385, %5 : vector<16x16xf32>
    %cst_169 = arith.constant dense<0xFF800000> : vector<16xf32>
    %387 = vector.multi_reduction <maximumf>, %386, %cst_169 [1] : vector<16x16xf32> to vector<16xf32>
    %388 = vector.shape_cast %387 : vector<16xf32> to vector<16x1xf32>
    %389 = vector.broadcast %388 : vector<16x1xf32> to vector<16x16xf32>
    %390 = arith.subf %386, %389 : vector<16x16xf32>
    %391 = math.exp %390 : vector<16x16xf32>
    %cst_170 = arith.constant dense<0.000000e+00> : vector<16xf32>
    %392 = vector.multi_reduction <add>, %391, %cst_170 [1] : vector<16x16xf32> to vector<16xf32>
    %393 = vector.shape_cast %392 : vector<16xf32> to vector<16x1xf32>
    %394 = vector.broadcast %393 : vector<16x1xf32> to vector<16x16xf32>
    %395 = arith.divf %391, %394 : vector<16x16xf32>
    %cst_171 = arith.constant dense<0.000000e+00> : vector<16x8xf32>
    %396 = tpu.matmul %395, %384, %cst_171 {dimension_numbers = #tpu.dot_dimension_numbers<[1], [0], [0], [1], [0, 0, 1, 1], [], []>} : vector<16x16xf32>, vector<16x8xf32>, vector<16x8xf32> -> vector<16x8xf32>
    %397 = vector.extract_strided_slice %233 {offsets = [56, 0], sizes = [8, 64], strides = [1, 1]} : vector<64x64xf32> to vector<8x64xf32>
    %cst_172 = arith.constant dense<0.000000e+00> : vector<16x64xf32>
    %398 = tpu.matmul %396, %397, %cst_172 {dimension_numbers = #tpu.dot_dimension_numbers<[1], [0], [0], [1], [0, 0, 1, 1], [], []>} : vector<16x8xf32>, vector<8x64xf32>, vector<16x64xf32> -> vector<16x64xf32>
    %399 = arith.addf %381, %398 : vector<16x64xf32>
    %400 = arith.addf %227, %399 : vector<16x64xf32>
    %cst_173 = arith.constant dense<0.000000e+00> : vector<16xf32>
    %401 = vector.multi_reduction <add>, %400, %cst_173 [1] : vector<16x64xf32> to vector<16xf32>
    %402 = vector.shape_cast %401 : vector<16xf32> to vector<16x1xf32>
    %cst_174 = arith.constant 6.400000e+01 : f32
    %403 = vector.broadcast %cst_174 : f32 to vector<16x1xf32>
    %404 = arith.divf %402, %403 : vector<16x1xf32>
    %405 = vector.broadcast %404 : vector<16x1xf32> to vector<16x64xf32>
    %406 = arith.subf %400, %405 : vector<16x64xf32>
    %407 = arith.mulf %406, %406 : vector<16x64xf32>
    %cst_175 = arith.constant dense<0.000000e+00> : vector<16xf32>
    %408 = vector.multi_reduction <add>, %407, %cst_175 [1] : vector<16x64xf32> to vector<16xf32>
    %409 = vector.shape_cast %408 : vector<16xf32> to vector<16x1xf32>
    %cst_176 = arith.constant 6.400000e+01 : f32
    %410 = vector.broadcast %cst_176 : f32 to vector<16x1xf32>
    %411 = arith.divf %409, %410 : vector<16x1xf32>
    %cst_177 = arith.constant 9.99999974E-6 : f32
    %412 = vector.broadcast %cst_177 : f32 to vector<16x1xf32>
    %413 = arith.addf %411, %412 : vector<16x1xf32>
    %414 = math.rsqrt %413 : vector<16x1xf32>
    %415 = vector.broadcast %414 : vector<16x1xf32> to vector<16x64xf32>
    %416 = arith.mulf %406, %415 : vector<16x64xf32>
    %417 = vector.broadcast %237 : vector<1x64xf32> to vector<16x64xf32>
    %418 = arith.mulf %416, %417 : vector<16x64xf32>
    %419 = vector.broadcast %239 : vector<1x64xf32> to vector<16x64xf32>
    %420 = arith.addf %418, %419 : vector<16x64xf32>
    %cst_178 = arith.constant dense<0.000000e+00> : vector<16x256xf32>
    %421 = tpu.matmul %420, %241, %cst_178 {dimension_numbers = #tpu.dot_dimension_numbers<[1], [0], [0], [1], [0, 0, 1, 1], [], []>} : vector<16x64xf32>, vector<64x256xf32>, vector<16x256xf32> -> vector<16x256xf32>
    %422 = vector.broadcast %243 : vector<1x256xf32> to vector<16x256xf32>
    %423 = arith.addf %421, %422 : vector<16x256xf32>
    %cst_179 = arith.constant 0.000000e+00 : f32
    %424 = vector.broadcast %cst_179 : f32 to vector<16x256xf32>
    %425 = arith.maximumf %423, %424 : vector<16x256xf32>
    %cst_180 = arith.constant dense<0.000000e+00> : vector<16x64xf32>
    %426 = tpu.matmul %425, %245, %cst_180 {dimension_numbers = #tpu.dot_dimension_numbers<[1], [0], [0], [1], [0, 0, 1, 1], [], []>} : vector<16x256xf32>, vector<256x64xf32>, vector<16x64xf32> -> vector<16x64xf32>
    %427 = vector.broadcast %247 : vector<1x64xf32> to vector<16x64xf32>
    %428 = arith.addf %426, %427 : vector<16x64xf32>
    %429 = arith.addf %420, %428 : vector<16x64xf32>
    %cst_181 = arith.constant dense<0.000000e+00> : vector<16xf32>
    %430 = vector.multi_reduction <add>, %429, %cst_181 [1] : vector<16x64xf32> to vector<16xf32>
    %431 = vector.shape_cast %430 : vector<16xf32> to vector<16x1xf32>
    %cst_182 = arith.constant 6.400000e+01 : f32
    %432 = vector.broadcast %cst_182 : f32 to vector<16x1xf32>
    %433 = arith.divf %431, %432 : vector<16x1xf32>
    %434 = vector.broadcast %433 : vector<16x1xf32> to vector<16x64xf32>
    %435 = arith.subf %429, %434 : vector<16x64xf32>
    %436 = arith.mulf %435, %435 : vector<16x64xf32>
    %cst_183 = arith.constant dense<0.000000e+00> : vector<16xf32>
    %437 = vector.multi_reduction <add>, %436, %cst_183 [1] : vector<16x64xf32> to vector<16xf32>
    %438 = vector.shape_cast %437 : vector<16xf32> to vector<16x1xf32>
    %cst_184 = arith.constant 6.400000e+01 : f32
    %439 = vector.broadcast %cst_184 : f32 to vector<16x1xf32>
    %440 = arith.divf %438, %439 : vector<16x1xf32>
    %cst_185 = arith.constant 9.99999974E-6 : f32
    %441 = vector.broadcast %cst_185 : f32 to vector<16x1xf32>
    %442 = arith.addf %440, %441 : vector<16x1xf32>
    %443 = math.rsqrt %442 : vector<16x1xf32>
    %444 = vector.broadcast %443 : vector<16x1xf32> to vector<16x64xf32>
    %445 = arith.mulf %435, %444 : vector<16x64xf32>
    %446 = vector.broadcast %249 : vector<1x64xf32> to vector<16x64xf32>
    %447 = arith.mulf %445, %446 : vector<16x64xf32>
    %448 = vector.broadcast %251 : vector<1x64xf32> to vector<16x64xf32>
    %449 = arith.addf %447, %448 : vector<16x64xf32>
    %c2 = arith.constant 2 : index
    %c0_186 = arith.constant 0 : index
    %c0_187 = arith.constant 0 : index
    %450 = vector.load %arg4[%c2, %c0_186, %c0_187] : memref<3x64x192xf32, #tpu.memory_space<vmem>>, vector<1x64x192xf32>
    %451 = vector.shape_cast %450 : vector<1x64x192xf32> to vector<64x192xf32>
    %c2_188 = arith.constant 2 : index
    %c0_189 = arith.constant 0 : index
    %c0_190 = arith.constant 0 : index
    %452 = vector.load %arg5[%c2_188, %c0_189, %c0_190] : memref<3x1x192xf32, #tpu.memory_space<vmem>>, vector<1x1x192xf32>
    %453 = vector.shape_cast %452 : vector<1x1x192xf32> to vector<1x192xf32>
    %c2_191 = arith.constant 2 : index
    %c0_192 = arith.constant 0 : index
    %c0_193 = arith.constant 0 : index
    %454 = vector.load %arg6[%c2_191, %c0_192, %c0_193] : memref<3x64x64xf32, #tpu.memory_space<vmem>>, vector<1x64x64xf32>
    %455 = vector.shape_cast %454 : vector<1x64x64xf32> to vector<64x64xf32>
    %c2_194 = arith.constant 2 : index
    %c0_195 = arith.constant 0 : index
    %c0_196 = arith.constant 0 : index
    %456 = vector.load %arg7[%c2_194, %c0_195, %c0_196] : memref<3x1x64xf32, #tpu.memory_space<vmem>>, vector<1x1x64xf32>
    %457 = vector.shape_cast %456 : vector<1x1x64xf32> to vector<1x64xf32>
    %c2_197 = arith.constant 2 : index
    %c0_198 = arith.constant 0 : index
    %c0_199 = arith.constant 0 : index
    %458 = vector.load %arg8[%c2_197, %c0_198, %c0_199] : memref<3x1x64xf32, #tpu.memory_space<vmem>>, vector<1x1x64xf32>
    %459 = vector.shape_cast %458 : vector<1x1x64xf32> to vector<1x64xf32>
    %c2_200 = arith.constant 2 : index
    %c0_201 = arith.constant 0 : index
    %c0_202 = arith.constant 0 : index
    %460 = vector.load %arg9[%c2_200, %c0_201, %c0_202] : memref<3x1x64xf32, #tpu.memory_space<vmem>>, vector<1x1x64xf32>
    %461 = vector.shape_cast %460 : vector<1x1x64xf32> to vector<1x64xf32>
    %c2_203 = arith.constant 2 : index
    %c0_204 = arith.constant 0 : index
    %c0_205 = arith.constant 0 : index
    %462 = vector.load %arg10[%c2_203, %c0_204, %c0_205] : memref<3x64x256xf32, #tpu.memory_space<vmem>>, vector<1x64x256xf32>
    %463 = vector.shape_cast %462 : vector<1x64x256xf32> to vector<64x256xf32>
    %c2_206 = arith.constant 2 : index
    %c0_207 = arith.constant 0 : index
    %c0_208 = arith.constant 0 : index
    %464 = vector.load %arg11[%c2_206, %c0_207, %c0_208] : memref<3x1x256xf32, #tpu.memory_space<vmem>>, vector<1x1x256xf32>
    %465 = vector.shape_cast %464 : vector<1x1x256xf32> to vector<1x256xf32>
    %c2_209 = arith.constant 2 : index
    %c0_210 = arith.constant 0 : index
    %c0_211 = arith.constant 0 : index
    %466 = vector.load %arg12[%c2_209, %c0_210, %c0_211] : memref<3x256x64xf32, #tpu.memory_space<vmem>>, vector<1x256x64xf32>
    %467 = vector.shape_cast %466 : vector<1x256x64xf32> to vector<256x64xf32>
    %c2_212 = arith.constant 2 : index
    %c0_213 = arith.constant 0 : index
    %c0_214 = arith.constant 0 : index
    %468 = vector.load %arg13[%c2_212, %c0_213, %c0_214] : memref<3x1x64xf32, #tpu.memory_space<vmem>>, vector<1x1x64xf32>
    %469 = vector.shape_cast %468 : vector<1x1x64xf32> to vector<1x64xf32>
    %c2_215 = arith.constant 2 : index
    %c0_216 = arith.constant 0 : index
    %c0_217 = arith.constant 0 : index
    %470 = vector.load %arg14[%c2_215, %c0_216, %c0_217] : memref<3x1x64xf32, #tpu.memory_space<vmem>>, vector<1x1x64xf32>
    %471 = vector.shape_cast %470 : vector<1x1x64xf32> to vector<1x64xf32>
    %c2_218 = arith.constant 2 : index
    %c0_219 = arith.constant 0 : index
    %c0_220 = arith.constant 0 : index
    %472 = vector.load %arg15[%c2_218, %c0_219, %c0_220] : memref<3x1x64xf32, #tpu.memory_space<vmem>>, vector<1x1x64xf32>
    %473 = vector.shape_cast %472 : vector<1x1x64xf32> to vector<1x64xf32>
    %cst_221 = arith.constant dense<0.000000e+00> : vector<16x192xf32>
    %474 = tpu.matmul %449, %451, %cst_221 {dimension_numbers = #tpu.dot_dimension_numbers<[1], [0], [0], [1], [0, 0, 1, 1], [], []>} : vector<16x64xf32>, vector<64x192xf32>, vector<16x192xf32> -> vector<16x192xf32>
    %475 = vector.broadcast %453 : vector<1x192xf32> to vector<16x192xf32>
    %476 = arith.addf %474, %475 : vector<16x192xf32>
    %477 = vector.extract_strided_slice %476 {offsets = [0, 0], sizes = [16, 8], strides = [1, 1]} : vector<16x192xf32> to vector<16x8xf32>
    %478 = vector.extract_strided_slice %476 {offsets = [0, 64], sizes = [16, 8], strides = [1, 1]} : vector<16x192xf32> to vector<16x8xf32>
    %479 = vector.extract_strided_slice %476 {offsets = [0, 128], sizes = [16, 8], strides = [1, 1]} : vector<16x192xf32> to vector<16x8xf32>
    %cst_222 = arith.constant dense<0.000000e+00> : vector<16x16xf32>
    %480 = tpu.matmul %477, %478, %cst_222 {dimension_numbers = #tpu.dot_dimension_numbers<[1], [1], [0], [0], [0, 0, 1, 0], [], []>} : vector<16x8xf32>, vector<16x8xf32>, vector<16x16xf32> -> vector<16x16xf32>
    %481 = arith.addf %480, %5 : vector<16x16xf32>
    %cst_223 = arith.constant dense<0xFF800000> : vector<16xf32>
    %482 = vector.multi_reduction <maximumf>, %481, %cst_223 [1] : vector<16x16xf32> to vector<16xf32>
    %483 = vector.shape_cast %482 : vector<16xf32> to vector<16x1xf32>
    %484 = vector.broadcast %483 : vector<16x1xf32> to vector<16x16xf32>
    %485 = arith.subf %481, %484 : vector<16x16xf32>
    %486 = math.exp %485 : vector<16x16xf32>
    %cst_224 = arith.constant dense<0.000000e+00> : vector<16xf32>
    %487 = vector.multi_reduction <add>, %486, %cst_224 [1] : vector<16x16xf32> to vector<16xf32>
    %488 = vector.shape_cast %487 : vector<16xf32> to vector<16x1xf32>
    %489 = vector.broadcast %488 : vector<16x1xf32> to vector<16x16xf32>
    %490 = arith.divf %486, %489 : vector<16x16xf32>
    %cst_225 = arith.constant dense<0.000000e+00> : vector<16x8xf32>
    %491 = tpu.matmul %490, %479, %cst_225 {dimension_numbers = #tpu.dot_dimension_numbers<[1], [0], [0], [1], [0, 0, 1, 1], [], []>} : vector<16x16xf32>, vector<16x8xf32>, vector<16x8xf32> -> vector<16x8xf32>
    %492 = vector.extract_strided_slice %455 {offsets = [0, 0], sizes = [8, 64], strides = [1, 1]} : vector<64x64xf32> to vector<8x64xf32>
    %cst_226 = arith.constant dense<0.000000e+00> : vector<16x64xf32>
    %493 = tpu.matmul %491, %492, %cst_226 {dimension_numbers = #tpu.dot_dimension_numbers<[1], [0], [0], [1], [0, 0, 1, 1], [], []>} : vector<16x8xf32>, vector<8x64xf32>, vector<16x64xf32> -> vector<16x64xf32>
    %494 = vector.broadcast %457 : vector<1x64xf32> to vector<16x64xf32>
    %495 = arith.addf %494, %493 : vector<16x64xf32>
    %496 = vector.extract_strided_slice %476 {offsets = [0, 8], sizes = [16, 8], strides = [1, 1]} : vector<16x192xf32> to vector<16x8xf32>
    %497 = vector.extract_strided_slice %476 {offsets = [0, 72], sizes = [16, 8], strides = [1, 1]} : vector<16x192xf32> to vector<16x8xf32>
    %498 = vector.extract_strided_slice %476 {offsets = [0, 136], sizes = [16, 8], strides = [1, 1]} : vector<16x192xf32> to vector<16x8xf32>
    %cst_227 = arith.constant dense<0.000000e+00> : vector<16x16xf32>
    %499 = tpu.matmul %496, %497, %cst_227 {dimension_numbers = #tpu.dot_dimension_numbers<[1], [1], [0], [0], [0, 0, 1, 0], [], []>} : vector<16x8xf32>, vector<16x8xf32>, vector<16x16xf32> -> vector<16x16xf32>
    %500 = arith.addf %499, %5 : vector<16x16xf32>
    %cst_228 = arith.constant dense<0xFF800000> : vector<16xf32>
    %501 = vector.multi_reduction <maximumf>, %500, %cst_228 [1] : vector<16x16xf32> to vector<16xf32>
    %502 = vector.shape_cast %501 : vector<16xf32> to vector<16x1xf32>
    %503 = vector.broadcast %502 : vector<16x1xf32> to vector<16x16xf32>
    %504 = arith.subf %500, %503 : vector<16x16xf32>
    %505 = math.exp %504 : vector<16x16xf32>
    %cst_229 = arith.constant dense<0.000000e+00> : vector<16xf32>
    %506 = vector.multi_reduction <add>, %505, %cst_229 [1] : vector<16x16xf32> to vector<16xf32>
    %507 = vector.shape_cast %506 : vector<16xf32> to vector<16x1xf32>
    %508 = vector.broadcast %507 : vector<16x1xf32> to vector<16x16xf32>
    %509 = arith.divf %505, %508 : vector<16x16xf32>
    %cst_230 = arith.constant dense<0.000000e+00> : vector<16x8xf32>
    %510 = tpu.matmul %509, %498, %cst_230 {dimension_numbers = #tpu.dot_dimension_numbers<[1], [0], [0], [1], [0, 0, 1, 1], [], []>} : vector<16x16xf32>, vector<16x8xf32>, vector<16x8xf32> -> vector<16x8xf32>
    %511 = vector.extract_strided_slice %455 {offsets = [8, 0], sizes = [8, 64], strides = [1, 1]} : vector<64x64xf32> to vector<8x64xf32>
    %cst_231 = arith.constant dense<0.000000e+00> : vector<16x64xf32>
    %512 = tpu.matmul %510, %511, %cst_231 {dimension_numbers = #tpu.dot_dimension_numbers<[1], [0], [0], [1], [0, 0, 1, 1], [], []>} : vector<16x8xf32>, vector<8x64xf32>, vector<16x64xf32> -> vector<16x64xf32>
    %513 = arith.addf %495, %512 : vector<16x64xf32>
    %514 = vector.extract_strided_slice %476 {offsets = [0, 16], sizes = [16, 8], strides = [1, 1]} : vector<16x192xf32> to vector<16x8xf32>
    %515 = vector.extract_strided_slice %476 {offsets = [0, 80], sizes = [16, 8], strides = [1, 1]} : vector<16x192xf32> to vector<16x8xf32>
    %516 = vector.extract_strided_slice %476 {offsets = [0, 144], sizes = [16, 8], strides = [1, 1]} : vector<16x192xf32> to vector<16x8xf32>
    %cst_232 = arith.constant dense<0.000000e+00> : vector<16x16xf32>
    %517 = tpu.matmul %514, %515, %cst_232 {dimension_numbers = #tpu.dot_dimension_numbers<[1], [1], [0], [0], [0, 0, 1, 0], [], []>} : vector<16x8xf32>, vector<16x8xf32>, vector<16x16xf32> -> vector<16x16xf32>
    %518 = arith.addf %517, %5 : vector<16x16xf32>
    %cst_233 = arith.constant dense<0xFF800000> : vector<16xf32>
    %519 = vector.multi_reduction <maximumf>, %518, %cst_233 [1] : vector<16x16xf32> to vector<16xf32>
    %520 = vector.shape_cast %519 : vector<16xf32> to vector<16x1xf32>
    %521 = vector.broadcast %520 : vector<16x1xf32> to vector<16x16xf32>
    %522 = arith.subf %518, %521 : vector<16x16xf32>
    %523 = math.exp %522 : vector<16x16xf32>
    %cst_234 = arith.constant dense<0.000000e+00> : vector<16xf32>
    %524 = vector.multi_reduction <add>, %523, %cst_234 [1] : vector<16x16xf32> to vector<16xf32>
    %525 = vector.shape_cast %524 : vector<16xf32> to vector<16x1xf32>
    %526 = vector.broadcast %525 : vector<16x1xf32> to vector<16x16xf32>
    %527 = arith.divf %523, %526 : vector<16x16xf32>
    %cst_235 = arith.constant dense<0.000000e+00> : vector<16x8xf32>
    %528 = tpu.matmul %527, %516, %cst_235 {dimension_numbers = #tpu.dot_dimension_numbers<[1], [0], [0], [1], [0, 0, 1, 1], [], []>} : vector<16x16xf32>, vector<16x8xf32>, vector<16x8xf32> -> vector<16x8xf32>
    %529 = vector.extract_strided_slice %455 {offsets = [16, 0], sizes = [8, 64], strides = [1, 1]} : vector<64x64xf32> to vector<8x64xf32>
    %cst_236 = arith.constant dense<0.000000e+00> : vector<16x64xf32>
    %530 = tpu.matmul %528, %529, %cst_236 {dimension_numbers = #tpu.dot_dimension_numbers<[1], [0], [0], [1], [0, 0, 1, 1], [], []>} : vector<16x8xf32>, vector<8x64xf32>, vector<16x64xf32> -> vector<16x64xf32>
    %531 = arith.addf %513, %530 : vector<16x64xf32>
    %532 = vector.extract_strided_slice %476 {offsets = [0, 24], sizes = [16, 8], strides = [1, 1]} : vector<16x192xf32> to vector<16x8xf32>
    %533 = vector.extract_strided_slice %476 {offsets = [0, 88], sizes = [16, 8], strides = [1, 1]} : vector<16x192xf32> to vector<16x8xf32>
    %534 = vector.extract_strided_slice %476 {offsets = [0, 152], sizes = [16, 8], strides = [1, 1]} : vector<16x192xf32> to vector<16x8xf32>
    %cst_237 = arith.constant dense<0.000000e+00> : vector<16x16xf32>
    %535 = tpu.matmul %532, %533, %cst_237 {dimension_numbers = #tpu.dot_dimension_numbers<[1], [1], [0], [0], [0, 0, 1, 0], [], []>} : vector<16x8xf32>, vector<16x8xf32>, vector<16x16xf32> -> vector<16x16xf32>
    %536 = arith.addf %535, %5 : vector<16x16xf32>
    %cst_238 = arith.constant dense<0xFF800000> : vector<16xf32>
    %537 = vector.multi_reduction <maximumf>, %536, %cst_238 [1] : vector<16x16xf32> to vector<16xf32>
    %538 = vector.shape_cast %537 : vector<16xf32> to vector<16x1xf32>
    %539 = vector.broadcast %538 : vector<16x1xf32> to vector<16x16xf32>
    %540 = arith.subf %536, %539 : vector<16x16xf32>
    %541 = math.exp %540 : vector<16x16xf32>
    %cst_239 = arith.constant dense<0.000000e+00> : vector<16xf32>
    %542 = vector.multi_reduction <add>, %541, %cst_239 [1] : vector<16x16xf32> to vector<16xf32>
    %543 = vector.shape_cast %542 : vector<16xf32> to vector<16x1xf32>
    %544 = vector.broadcast %543 : vector<16x1xf32> to vector<16x16xf32>
    %545 = arith.divf %541, %544 : vector<16x16xf32>
    %cst_240 = arith.constant dense<0.000000e+00> : vector<16x8xf32>
    %546 = tpu.matmul %545, %534, %cst_240 {dimension_numbers = #tpu.dot_dimension_numbers<[1], [0], [0], [1], [0, 0, 1, 1], [], []>} : vector<16x16xf32>, vector<16x8xf32>, vector<16x8xf32> -> vector<16x8xf32>
    %547 = vector.extract_strided_slice %455 {offsets = [24, 0], sizes = [8, 64], strides = [1, 1]} : vector<64x64xf32> to vector<8x64xf32>
    %cst_241 = arith.constant dense<0.000000e+00> : vector<16x64xf32>
    %548 = tpu.matmul %546, %547, %cst_241 {dimension_numbers = #tpu.dot_dimension_numbers<[1], [0], [0], [1], [0, 0, 1, 1], [], []>} : vector<16x8xf32>, vector<8x64xf32>, vector<16x64xf32> -> vector<16x64xf32>
    %549 = arith.addf %531, %548 : vector<16x64xf32>
    %550 = vector.extract_strided_slice %476 {offsets = [0, 32], sizes = [16, 8], strides = [1, 1]} : vector<16x192xf32> to vector<16x8xf32>
    %551 = vector.extract_strided_slice %476 {offsets = [0, 96], sizes = [16, 8], strides = [1, 1]} : vector<16x192xf32> to vector<16x8xf32>
    %552 = vector.extract_strided_slice %476 {offsets = [0, 160], sizes = [16, 8], strides = [1, 1]} : vector<16x192xf32> to vector<16x8xf32>
    %cst_242 = arith.constant dense<0.000000e+00> : vector<16x16xf32>
    %553 = tpu.matmul %550, %551, %cst_242 {dimension_numbers = #tpu.dot_dimension_numbers<[1], [1], [0], [0], [0, 0, 1, 0], [], []>} : vector<16x8xf32>, vector<16x8xf32>, vector<16x16xf32> -> vector<16x16xf32>
    %554 = arith.addf %553, %5 : vector<16x16xf32>
    %cst_243 = arith.constant dense<0xFF800000> : vector<16xf32>
    %555 = vector.multi_reduction <maximumf>, %554, %cst_243 [1] : vector<16x16xf32> to vector<16xf32>
    %556 = vector.shape_cast %555 : vector<16xf32> to vector<16x1xf32>
    %557 = vector.broadcast %556 : vector<16x1xf32> to vector<16x16xf32>
    %558 = arith.subf %554, %557 : vector<16x16xf32>
    %559 = math.exp %558 : vector<16x16xf32>
    %cst_244 = arith.constant dense<0.000000e+00> : vector<16xf32>
    %560 = vector.multi_reduction <add>, %559, %cst_244 [1] : vector<16x16xf32> to vector<16xf32>
    %561 = vector.shape_cast %560 : vector<16xf32> to vector<16x1xf32>
    %562 = vector.broadcast %561 : vector<16x1xf32> to vector<16x16xf32>
    %563 = arith.divf %559, %562 : vector<16x16xf32>
    %cst_245 = arith.constant dense<0.000000e+00> : vector<16x8xf32>
    %564 = tpu.matmul %563, %552, %cst_245 {dimension_numbers = #tpu.dot_dimension_numbers<[1], [0], [0], [1], [0, 0, 1, 1], [], []>} : vector<16x16xf32>, vector<16x8xf32>, vector<16x8xf32> -> vector<16x8xf32>
    %565 = vector.extract_strided_slice %455 {offsets = [32, 0], sizes = [8, 64], strides = [1, 1]} : vector<64x64xf32> to vector<8x64xf32>
    %cst_246 = arith.constant dense<0.000000e+00> : vector<16x64xf32>
    %566 = tpu.matmul %564, %565, %cst_246 {dimension_numbers = #tpu.dot_dimension_numbers<[1], [0], [0], [1], [0, 0, 1, 1], [], []>} : vector<16x8xf32>, vector<8x64xf32>, vector<16x64xf32> -> vector<16x64xf32>
    %567 = arith.addf %549, %566 : vector<16x64xf32>
    %568 = vector.extract_strided_slice %476 {offsets = [0, 40], sizes = [16, 8], strides = [1, 1]} : vector<16x192xf32> to vector<16x8xf32>
    %569 = vector.extract_strided_slice %476 {offsets = [0, 104], sizes = [16, 8], strides = [1, 1]} : vector<16x192xf32> to vector<16x8xf32>
    %570 = vector.extract_strided_slice %476 {offsets = [0, 168], sizes = [16, 8], strides = [1, 1]} : vector<16x192xf32> to vector<16x8xf32>
    %cst_247 = arith.constant dense<0.000000e+00> : vector<16x16xf32>
    %571 = tpu.matmul %568, %569, %cst_247 {dimension_numbers = #tpu.dot_dimension_numbers<[1], [1], [0], [0], [0, 0, 1, 0], [], []>} : vector<16x8xf32>, vector<16x8xf32>, vector<16x16xf32> -> vector<16x16xf32>
    %572 = arith.addf %571, %5 : vector<16x16xf32>
    %cst_248 = arith.constant dense<0xFF800000> : vector<16xf32>
    %573 = vector.multi_reduction <maximumf>, %572, %cst_248 [1] : vector<16x16xf32> to vector<16xf32>
    %574 = vector.shape_cast %573 : vector<16xf32> to vector<16x1xf32>
    %575 = vector.broadcast %574 : vector<16x1xf32> to vector<16x16xf32>
    %576 = arith.subf %572, %575 : vector<16x16xf32>
    %577 = math.exp %576 : vector<16x16xf32>
    %cst_249 = arith.constant dense<0.000000e+00> : vector<16xf32>
    %578 = vector.multi_reduction <add>, %577, %cst_249 [1] : vector<16x16xf32> to vector<16xf32>
    %579 = vector.shape_cast %578 : vector<16xf32> to vector<16x1xf32>
    %580 = vector.broadcast %579 : vector<16x1xf32> to vector<16x16xf32>
    %581 = arith.divf %577, %580 : vector<16x16xf32>
    %cst_250 = arith.constant dense<0.000000e+00> : vector<16x8xf32>
    %582 = tpu.matmul %581, %570, %cst_250 {dimension_numbers = #tpu.dot_dimension_numbers<[1], [0], [0], [1], [0, 0, 1, 1], [], []>} : vector<16x16xf32>, vector<16x8xf32>, vector<16x8xf32> -> vector<16x8xf32>
    %583 = vector.extract_strided_slice %455 {offsets = [40, 0], sizes = [8, 64], strides = [1, 1]} : vector<64x64xf32> to vector<8x64xf32>
    %cst_251 = arith.constant dense<0.000000e+00> : vector<16x64xf32>
    %584 = tpu.matmul %582, %583, %cst_251 {dimension_numbers = #tpu.dot_dimension_numbers<[1], [0], [0], [1], [0, 0, 1, 1], [], []>} : vector<16x8xf32>, vector<8x64xf32>, vector<16x64xf32> -> vector<16x64xf32>
    %585 = arith.addf %567, %584 : vector<16x64xf32>
    %586 = vector.extract_strided_slice %476 {offsets = [0, 48], sizes = [16, 8], strides = [1, 1]} : vector<16x192xf32> to vector<16x8xf32>
    %587 = vector.extract_strided_slice %476 {offsets = [0, 112], sizes = [16, 8], strides = [1, 1]} : vector<16x192xf32> to vector<16x8xf32>
    %588 = vector.extract_strided_slice %476 {offsets = [0, 176], sizes = [16, 8], strides = [1, 1]} : vector<16x192xf32> to vector<16x8xf32>
    %cst_252 = arith.constant dense<0.000000e+00> : vector<16x16xf32>
    %589 = tpu.matmul %586, %587, %cst_252 {dimension_numbers = #tpu.dot_dimension_numbers<[1], [1], [0], [0], [0, 0, 1, 0], [], []>} : vector<16x8xf32>, vector<16x8xf32>, vector<16x16xf32> -> vector<16x16xf32>
    %590 = arith.addf %589, %5 : vector<16x16xf32>
    %cst_253 = arith.constant dense<0xFF800000> : vector<16xf32>
    %591 = vector.multi_reduction <maximumf>, %590, %cst_253 [1] : vector<16x16xf32> to vector<16xf32>
    %592 = vector.shape_cast %591 : vector<16xf32> to vector<16x1xf32>
    %593 = vector.broadcast %592 : vector<16x1xf32> to vector<16x16xf32>
    %594 = arith.subf %590, %593 : vector<16x16xf32>
    %595 = math.exp %594 : vector<16x16xf32>
    %cst_254 = arith.constant dense<0.000000e+00> : vector<16xf32>
    %596 = vector.multi_reduction <add>, %595, %cst_254 [1] : vector<16x16xf32> to vector<16xf32>
    %597 = vector.shape_cast %596 : vector<16xf32> to vector<16x1xf32>
    %598 = vector.broadcast %597 : vector<16x1xf32> to vector<16x16xf32>
    %599 = arith.divf %595, %598 : vector<16x16xf32>
    %cst_255 = arith.constant dense<0.000000e+00> : vector<16x8xf32>
    %600 = tpu.matmul %599, %588, %cst_255 {dimension_numbers = #tpu.dot_dimension_numbers<[1], [0], [0], [1], [0, 0, 1, 1], [], []>} : vector<16x16xf32>, vector<16x8xf32>, vector<16x8xf32> -> vector<16x8xf32>
    %601 = vector.extract_strided_slice %455 {offsets = [48, 0], sizes = [8, 64], strides = [1, 1]} : vector<64x64xf32> to vector<8x64xf32>
    %cst_256 = arith.constant dense<0.000000e+00> : vector<16x64xf32>
    %602 = tpu.matmul %600, %601, %cst_256 {dimension_numbers = #tpu.dot_dimension_numbers<[1], [0], [0], [1], [0, 0, 1, 1], [], []>} : vector<16x8xf32>, vector<8x64xf32>, vector<16x64xf32> -> vector<16x64xf32>
    %603 = arith.addf %585, %602 : vector<16x64xf32>
    %604 = vector.extract_strided_slice %476 {offsets = [0, 56], sizes = [16, 8], strides = [1, 1]} : vector<16x192xf32> to vector<16x8xf32>
    %605 = vector.extract_strided_slice %476 {offsets = [0, 120], sizes = [16, 8], strides = [1, 1]} : vector<16x192xf32> to vector<16x8xf32>
    %606 = vector.extract_strided_slice %476 {offsets = [0, 184], sizes = [16, 8], strides = [1, 1]} : vector<16x192xf32> to vector<16x8xf32>
    %cst_257 = arith.constant dense<0.000000e+00> : vector<16x16xf32>
    %607 = tpu.matmul %604, %605, %cst_257 {dimension_numbers = #tpu.dot_dimension_numbers<[1], [1], [0], [0], [0, 0, 1, 0], [], []>} : vector<16x8xf32>, vector<16x8xf32>, vector<16x16xf32> -> vector<16x16xf32>
    %608 = arith.addf %607, %5 : vector<16x16xf32>
    %cst_258 = arith.constant dense<0xFF800000> : vector<16xf32>
    %609 = vector.multi_reduction <maximumf>, %608, %cst_258 [1] : vector<16x16xf32> to vector<16xf32>
    %610 = vector.shape_cast %609 : vector<16xf32> to vector<16x1xf32>
    %611 = vector.broadcast %610 : vector<16x1xf32> to vector<16x16xf32>
    %612 = arith.subf %608, %611 : vector<16x16xf32>
    %613 = math.exp %612 : vector<16x16xf32>
    %cst_259 = arith.constant dense<0.000000e+00> : vector<16xf32>
    %614 = vector.multi_reduction <add>, %613, %cst_259 [1] : vector<16x16xf32> to vector<16xf32>
    %615 = vector.shape_cast %614 : vector<16xf32> to vector<16x1xf32>
    %616 = vector.broadcast %615 : vector<16x1xf32> to vector<16x16xf32>
    %617 = arith.divf %613, %616 : vector<16x16xf32>
    %cst_260 = arith.constant dense<0.000000e+00> : vector<16x8xf32>
    %618 = tpu.matmul %617, %606, %cst_260 {dimension_numbers = #tpu.dot_dimension_numbers<[1], [0], [0], [1], [0, 0, 1, 1], [], []>} : vector<16x16xf32>, vector<16x8xf32>, vector<16x8xf32> -> vector<16x8xf32>
    %619 = vector.extract_strided_slice %455 {offsets = [56, 0], sizes = [8, 64], strides = [1, 1]} : vector<64x64xf32> to vector<8x64xf32>
    %cst_261 = arith.constant dense<0.000000e+00> : vector<16x64xf32>
    %620 = tpu.matmul %618, %619, %cst_261 {dimension_numbers = #tpu.dot_dimension_numbers<[1], [0], [0], [1], [0, 0, 1, 1], [], []>} : vector<16x8xf32>, vector<8x64xf32>, vector<16x64xf32> -> vector<16x64xf32>
    %621 = arith.addf %603, %620 : vector<16x64xf32>
    %622 = arith.addf %449, %621 : vector<16x64xf32>
    %cst_262 = arith.constant dense<0.000000e+00> : vector<16xf32>
    %623 = vector.multi_reduction <add>, %622, %cst_262 [1] : vector<16x64xf32> to vector<16xf32>
    %624 = vector.shape_cast %623 : vector<16xf32> to vector<16x1xf32>
    %cst_263 = arith.constant 6.400000e+01 : f32
    %625 = vector.broadcast %cst_263 : f32 to vector<16x1xf32>
    %626 = arith.divf %624, %625 : vector<16x1xf32>
    %627 = vector.broadcast %626 : vector<16x1xf32> to vector<16x64xf32>
    %628 = arith.subf %622, %627 : vector<16x64xf32>
    %629 = arith.mulf %628, %628 : vector<16x64xf32>
    %cst_264 = arith.constant dense<0.000000e+00> : vector<16xf32>
    %630 = vector.multi_reduction <add>, %629, %cst_264 [1] : vector<16x64xf32> to vector<16xf32>
    %631 = vector.shape_cast %630 : vector<16xf32> to vector<16x1xf32>
    %cst_265 = arith.constant 6.400000e+01 : f32
    %632 = vector.broadcast %cst_265 : f32 to vector<16x1xf32>
    %633 = arith.divf %631, %632 : vector<16x1xf32>
    %cst_266 = arith.constant 9.99999974E-6 : f32
    %634 = vector.broadcast %cst_266 : f32 to vector<16x1xf32>
    %635 = arith.addf %633, %634 : vector<16x1xf32>
    %636 = math.rsqrt %635 : vector<16x1xf32>
    %637 = vector.broadcast %636 : vector<16x1xf32> to vector<16x64xf32>
    %638 = arith.mulf %628, %637 : vector<16x64xf32>
    %639 = vector.broadcast %459 : vector<1x64xf32> to vector<16x64xf32>
    %640 = arith.mulf %638, %639 : vector<16x64xf32>
    %641 = vector.broadcast %461 : vector<1x64xf32> to vector<16x64xf32>
    %642 = arith.addf %640, %641 : vector<16x64xf32>
    %cst_267 = arith.constant dense<0.000000e+00> : vector<16x256xf32>
    %643 = tpu.matmul %642, %463, %cst_267 {dimension_numbers = #tpu.dot_dimension_numbers<[1], [0], [0], [1], [0, 0, 1, 1], [], []>} : vector<16x64xf32>, vector<64x256xf32>, vector<16x256xf32> -> vector<16x256xf32>
    %644 = vector.broadcast %465 : vector<1x256xf32> to vector<16x256xf32>
    %645 = arith.addf %643, %644 : vector<16x256xf32>
    %cst_268 = arith.constant 0.000000e+00 : f32
    %646 = vector.broadcast %cst_268 : f32 to vector<16x256xf32>
    %647 = arith.maximumf %645, %646 : vector<16x256xf32>
    %cst_269 = arith.constant dense<0.000000e+00> : vector<16x64xf32>
    %648 = tpu.matmul %647, %467, %cst_269 {dimension_numbers = #tpu.dot_dimension_numbers<[1], [0], [0], [1], [0, 0, 1, 1], [], []>} : vector<16x256xf32>, vector<256x64xf32>, vector<16x64xf32> -> vector<16x64xf32>
    %649 = vector.broadcast %469 : vector<1x64xf32> to vector<16x64xf32>
    %650 = arith.addf %648, %649 : vector<16x64xf32>
    %651 = arith.addf %642, %650 : vector<16x64xf32>
    %cst_270 = arith.constant dense<0.000000e+00> : vector<16xf32>
    %652 = vector.multi_reduction <add>, %651, %cst_270 [1] : vector<16x64xf32> to vector<16xf32>
    %653 = vector.shape_cast %652 : vector<16xf32> to vector<16x1xf32>
    %cst_271 = arith.constant 6.400000e+01 : f32
    %654 = vector.broadcast %cst_271 : f32 to vector<16x1xf32>
    %655 = arith.divf %653, %654 : vector<16x1xf32>
    %656 = vector.broadcast %655 : vector<16x1xf32> to vector<16x64xf32>
    %657 = arith.subf %651, %656 : vector<16x64xf32>
    %658 = arith.mulf %657, %657 : vector<16x64xf32>
    %cst_272 = arith.constant dense<0.000000e+00> : vector<16xf32>
    %659 = vector.multi_reduction <add>, %658, %cst_272 [1] : vector<16x64xf32> to vector<16xf32>
    %660 = vector.shape_cast %659 : vector<16xf32> to vector<16x1xf32>
    %cst_273 = arith.constant 6.400000e+01 : f32
    %661 = vector.broadcast %cst_273 : f32 to vector<16x1xf32>
    %662 = arith.divf %660, %661 : vector<16x1xf32>
    %cst_274 = arith.constant 9.99999974E-6 : f32
    %663 = vector.broadcast %cst_274 : f32 to vector<16x1xf32>
    %664 = arith.addf %662, %663 : vector<16x1xf32>
    %665 = math.rsqrt %664 : vector<16x1xf32>
    %666 = vector.broadcast %665 : vector<16x1xf32> to vector<16x64xf32>
    %667 = arith.mulf %657, %666 : vector<16x64xf32>
    %668 = vector.broadcast %471 : vector<1x64xf32> to vector<16x64xf32>
    %669 = arith.mulf %667, %668 : vector<16x64xf32>
    %670 = vector.broadcast %473 : vector<1x64xf32> to vector<16x64xf32>
    %671 = arith.addf %669, %670 : vector<16x64xf32>
    %c0_275 = arith.constant 0 : index
    %c0_276 = arith.constant 0 : index
    %672 = vector.load %arg16[%c0_275, %c0_276] : memref<2x16xf32, #tpu.memory_space<vmem>>, vector<2x16xf32>
    %cst_277 = arith.constant dense<0.000000e+00> : vector<2x64xf32>
    %673 = tpu.matmul %672, %671, %cst_277 {dimension_numbers = #tpu.dot_dimension_numbers<[1], [0], [0], [1], [0, 0, 1, 1], [], []>} : vector<2x16xf32>, vector<16x64xf32>, vector<2x64xf32> -> vector<2x64xf32>
    %c0_278 = arith.constant 0 : index
    %c0_279 = arith.constant 0 : index
    %674 = vector.load %arg17[%c0_278, %c0_279] : memref<64x4xf32, #tpu.memory_space<vmem>>, vector<64x4xf32>
    %cst_280 = arith.constant dense<0.000000e+00> : vector<2x4xf32>
    %675 = tpu.matmul %673, %674, %cst_280 {dimension_numbers = #tpu.dot_dimension_numbers<[1], [0], [0], [1], [0, 0, 1, 1], [], []>} : vector<2x64xf32>, vector<64x4xf32>, vector<2x4xf32> -> vector<2x4xf32>
    %c0_281 = arith.constant 0 : index
    %c0_282 = arith.constant 0 : index
    %676 = vector.load %arg18[%c0_281, %c0_282] : memref<1x4xf32, #tpu.memory_space<vmem>>, vector<1x4xf32>
    %677 = vector.broadcast %676 : vector<1x4xf32> to vector<2x4xf32>
    %678 = arith.addf %675, %677 : vector<2x4xf32>
    %c0_283 = arith.constant 0 : index
    %c0_284 = arith.constant 0 : index
    %679 = vector.load %arg19[%c0_283, %c0_284] : memref<2x4xf32, #tpu.memory_space<vmem>>, vector<2x4xf32>
    tpu.vector_store %arg19[%c0_283, %c0_284], %678 {strides = array<i32>} : memref<2x4xf32, #tpu.memory_space<vmem>>, vector<2x4xf32>,
    return
  }
}

</mosaic_0001>

<bundles_post_ra>
// kernel: eq.17
= control target key start
LH: loop header
LB: loop body
LE: loop exit
PB: predicated region body
PF: predicated region fallthrough
CT: control target
= control target key end

     0   :  { %vm7_vm0 = vcmask 64512   ;;  %vm13_vm1 = vcmask 130112   ;;  %s39_s0 = inlined_call_operand.vmem [shape: s32[2,8], index: 0, kind: input, shape index: {}]   ;;  %s40_s1 = inlined_call_operand.vmem [shape: s32[16], index: 1, kind: output, shape index: {}]  }
   0x1   :  { %v4_v0 = vld [vmem:[%s39_s0] sm:$0x3]  ;;  %s22_s0 = smov 8  }
   0x2   :  { %5 = vst [vmem:[#allocation1] sm:$0x3] %v4_v0 }
   0x9   :  { %v10_v1 = vld [vmem:[#allocation1 + $0x1] sm:$0x1]   ;;  %v6_v2 = vld [vmem:[#allocation1] sm:$0x1]  }
   0xa   :  { %11 = vrot.lane.b32.xlu0 %v10_v1, %s22_s0  ;;  %8 = vst.msk [vmem:[#allocation0] sm:$0x1] %vm7_vm0, %v6_v2  }
  0x7c   :  { %v12_v3 = vpop.permute.xlu0 %11  }
  0x7d   :  { %14 = vst.msk [vmem:[#allocation0] sm:$0x1] %vm13_vm1, %v12_v3  }
  0x84   :  { %v18_v4 = vld [vmem:[#allocation0] sm:$0x1] }
  0x85   :  { %20 = vst [vmem:[%s40_s1] sm:$0x1] %v18_v4 }

// kernel: transformer_classifier_forward.1
= control target key start
LH: loop header
LB: loop body
LE: loop exit
PB: predicated region body
PF: predicated region fallthrough
CT: control target
= control target key end

     0   :  { %s12397_s0 = inlined_call_operand.vmem [shape: f32[16,16], index: 0, kind: input, shape index: {}]   ;;  %s12398_s1 = inlined_call_operand.vmem [shape: f32[16,16], index: 1, kind: input, shape index: {}]   ;;  %s12399_s2 = inlined_call_operand.vmem [shape: f32[16,64], index: 2, kind: input, shape index: {}]   ;;  %s12400_s3 = inlined_call_operand.vmem [shape: f32[16,64], index: 3, kind: input, shape index: {}]   ;;  %s12401_s4 = inlined_call_operand.vmem [shape: f32[3,64,192], index: 4, kind: input, shape index: {}]   ;;  %s12402_s5 = inlined_call_operand.vmem [shape: f32[3,1,192], index: 5, kind: input, shape index: {}]   ;;  %s12403_s6 = inlined_call_operand.vmem [shape: f32[3,64,64], index: 6, kind: input, shape index: {}]   ;;  %s12404_s7 = inlined_call_operand.vmem [shape: f32[3,1,64], index: 7, kind: input, shape index: {}]   ;;  %s12405_s8 = inlined_call_operand.vmem [shape: f32[3,1,64], index: 8, kind: input, shape index: {}]   ;;  %s12406_s9 = inlined_call_operand.vmem [shape: f32[3,1,64], index: 9, kind: input, shape index: {}]   ;;  %s12407_s10 = inlined_call_operand.vmem [shape: f32[3,64,256], index: 10, kind: input, shape index: {}]   ;;  %s12408_s11 = inlined_call_operand.vmem [shape: f32[3,1,256], index: 11, kind: input, shape index: {}]   ;;  %s12409_s12 = inlined_call_operand.vmem [shape: f32[3,256,64], index: 12, kind: input, shape index: {}]   ;;  %s12410_s13 = inlined_call_operand.vmem [shape: f32[3,1,64], index: 13, kind: input, shape index: {}]   ;;  %s12411_s14 = inlined_call_operand.vmem [shape: f32[3,1,64], index: 14, kind: input, shape index: {}]   ;;  %s12412_s15 = inlined_call_operand.vmem [shape: f32[3,1,64], index: 15, kind: input, shape index: {}]   ;;  %s12413_s16 = inlined_call_operand.vmem [shape: f32[2,16], index: 16, kind: input, shape index: {}]   ;;  %s12414_s17 = inlined_call_operand.vmem [shape: f32[64,4], index: 17, kind: input, shape index: {}]   ;;  %s12415_s18 = inlined_call_operand.vmem [shape: f32[1,4], index: 18, kind: input, shape index: {}]   ;;  %s12416_s19 = inlined_call_operand.hbm [shape: f32[2,4], index: 19, kind: output, shape index: {}]  }
   0x1   :  { %12456 = sst [smem:[#allocation5_spill]] %s12397_s0 }
   0x2   :  { %12457 = sst [smem:[#allocation6_spill]] %s12398_s1 }
   0x3   :  { %12458 = sst [smem:[#allocation7_spill]] %s12399_s2 }
   0x4   :  { %12459 = sst [smem:[#allocation8_spill]] %s12400_s3 }
   0x5   :  { %12460 = sst [smem:[#allocation9_spill]] %s12404_s7 }
   0x6   :  { %12461 = sst [smem:[#allocation10_spill]] %s12407_s10 }
   0x7   :  { %12462 = sst [smem:[#allocation11_spill]] %s12413_s16 }
   0x8   :  { %12463 = sst [smem:[#allocation12_spill]] %s12414_s17 }
   0x9   :  { %12464 = sst [smem:[#allocation13_spill]] %s12415_s18 }
   0xa   :  { %12465 = sst [smem:[#allocation14_spill]] %s12416_s19 }
   0xb   :  { %s12466_s20 = sld [smem:[#allocation8_spill]]  ;;  %s12467_s23 = sld [smem:[#allocation5_spill]]  ;;  %vm69_vm0 = vcmask 130048   ;;  %v154_v4 = vld [vmem:[%s12401_s4 + $0x8] sm:$0xff]  ;;  %v156_v5 = vld [vmem:[%s12401_s4 + $0x18] sm:$0xff]  ;;  %v153_v7 = vld [vmem:[%s12401_s4] sm:$0xff] }
   0xc   :  { %v9747_v6 = vpack.c.bf16 %v156_v5, %v154_v4  ;;  %v155_v8 = vld [vmem:[%s12401_s4 + $0x10] sm:$0xff]  ;;  %v158_v9 = vld [vmem:[%s12401_s4 + $0x28] sm:$0xff]  ;;  %v160_v11 = vld [vmem:[%s12401_s4 + $0x38] sm:$0xff] }
   0xd   :  { %v9749_v10 = vpack.c.bf16 %v155_v8, %v153_v7  ;;  %v157_v12 = vld [vmem:[%s12401_s4 + $0x20] sm:$0xff]  ;;  %v159_v13 = vld [vmem:[%s12401_s4 + $0x30] sm:$0xff]  ;;  %v9751_v15 = vpack.c.bf16 %v160_v11, %v158_v9  ;;  %v162_v16 = vld [vmem:[%s12401_s4 + $0x48] sm:$0xff] }
   0xe   :  { %9748 = vmatprep.subr.bf16.mxu1 %v9747_v6  ;;  %v164_v17 = vld [vmem:[%s12401_s4 + $0x58] sm:$0xff]  ;;  %v9753_v18 = vpack.c.bf16 %v159_v13, %v157_v12 }
   0xf   :  { %9750 = vmatpush1.bf16.msra.mxu1 %v9749_v10 }
  0x11   :  { %v65_v0 = vld [vmem:[%s12466_s20] sm:$0xff]  ;;  %v66_v1 = vld [vmem:[%s12466_s20 + $0x8] sm:$0xff] }
  0x12   :  { %v63_v2 = vld [vmem:[%s12467_s23] sm:$0xff]  ;;  %v9743_v3 = vpack.c.bf16 %v66_v1, %v65_v0  ;;  %v64_v14 = vld [vmem:[%s12467_s23 + $0x8] sm:$0xff] }
  0x13   :  { %9258 = vmatprep.mubr.msk.f32.mxu0 %vm69_vm0, %v63_v2 }
  0x14   :  { %9744 = vmatprep.subr.bf16.mxu0 %v9743_v3 }
  0x15   :  { %9746 = vmatpush3.bf16.msra.mxu0 %v9743_v3 }
  0x16   :  { %24 = vsyncpa [#allocation3], 0  ;;  %9752 = vmatprep.subr.bf16.mxu1 %v9751_v15  ;;  %v9755_v19 = vpack.c.bf16 %v164_v17, %v162_v16  ;;  %v161_v20 = vld [vmem:[%s12401_s4 + $0x40] sm:$0xff]  ;;  %v163_v21 = vld [vmem:[%s12401_s4 + $0x50] sm:$0xff]  ;;  %v10730_v29 = vmov 0.0   ;;  %s12468_s0 = sld [smem:[#allocation7_spill]]  ;;  %v234_v36 = vlaneseq }
  0x17   :  { %9754 = vmatpush1.bf16.msra.mxu1 %v9753_v18  ;;  %v9757_v22 = vpack.c.bf16 %v163_v21, %v161_v20  ;;  %v166_v23 = vld [vmem:[%s12401_s4 + $0x68] sm:$0xff]  ;;  %v168_v24 = vld [vmem:[%s12401_s4 + $0x78] sm:$0xff]  ;;  %v165_v26 = vld [vmem:[%s12401_s4 + $0x60] sm:$0xff]  ;;  %315 = vmatprep.mubr.f32.mxu1 %v10730_v29  ;;  %vm244_vm1 = vcmask 523264   ;;  %vm334_vm2 = vcmask 64512   ;;  %s12446_s1 = smov 120  }
  0x18   :  { %9259 = vmatmul.mubr.msk.f32.vlgmr.msra.gmra.mrb[0].mxu0 %vm69_vm0, %v64_v14  ;;  %9756 = vmatprep.subr.bf16.mxu1 %v9755_v19  ;;  %v9759_v25 = vpack.c.bf16 %v168_v24, %v166_v23  ;;  %v167_v27 = vld [vmem:[%s12401_s4 + $0x70] sm:$0xff]  ;;  %v235_v37 = vshrl.u32 %v234_v36, 7  ;;  %v169_v39 = vld [vmem:[%s12402_s5] sm:$0x3]  ;;  %s12448_s22 = smov 64   ;;  %s12441_s2 = smov 56   ;;  %vm10959_vm3 = vmpackc.low %vm334_vm2, %vm334_vm2 }
  0x19   :  { %v9761_v28 = vpack.c.bf16 %v167_v27, %v165_v26  ;;  %s12471_s3 = sld [smem:[#allocation6_spill]]  ;;  %s12445_s28 = smov 48   ;;  %vm10747_vm4 = vmmov 0   ;;  %vm8457_vm5 = vcmask 25600  }
  0x1a   :  { %v10927_v38 = vsub.s32 0, %v235_v37  ;;  %v10933_v41 = vsub.s32 1, %v235_v37  ;;  %s12443_s29 = smov 112   ;;  %s12439_s20 = smov 104  }
  0x1b   :  { %9758 = vmatpush1.bf16.msra.mxu1 %v9757_v22  ;;  %s12435_s23 = smov 40   ;;  %s12425_s25 = smov 32  }
  0x1c   :  { %9760 = vmatprep.subr.bf16.mxu1 %v9759_v25  ;;  %v67_v30 = vld [vmem:[%s12468_s0] sm:$0xff]  ;;  %v68_v34 = vld [vmem:[%s12468_s0 + $0x8] sm:$0xff]  ;;  %v237_v40 = vrot.slane %v169_v39, %v10927_v38  ;;  %v241_v45 = vrot.slane %v169_v39, %v10933_v41  ;;  %s12437_s26 = smov 96   ;;  %s12423_s27 = smov 24  }
  0x1d   :  { %v170_v39 = vld [vmem:[%s12403_s6] sm:$0xff]  ;;  %s12433_s21 = smov 88   ;;  %s12421_s30 = smov 16  }
  0x1e   :  { %s12431_s24 = smov 80   ;;  %s12427_s0 = smov 8  }
  0x1f   :  { %9762 = vmatpush1.bf16.msra.mxu1 %v9761_v28  ;;  %v10977_v1 = vld [vmem:[%s12471_s3 + $0x8] sm:$0xff]  ;;  %v10982_v2 = vld [vmem:[%s12471_s3] sm:$0xff]  ;;  %s12485_s17 = smov 120   ;;  %s12489_s18 = smov 72  }
  0xeb   :  { %v9260_v31 = vpop.f32.mrb[0].mxu0 }
  0xec   :  { %v142_v32 = vpop.f32.mrb[1].mxu0  ;;  %v10923_v35 = vadd.f32 %v9260_v31, %v68_v34 }
  0xed   :  { %v10915_v33 = vadd.f32 %v142_v32, %v67_v30 }
  0xef   :  { %8475 = vmatmul.mubr.msk.f32.vlgmr.msra.gmra.mrb[0].mxu1 %vm244_vm1, %v10915_v33 }
  0xf0   :  { %321 = vmatprep.mubr.f32.mxu1 %v10730_v29 }
  0xf3   :  { %8476 = vmatmul.mubr.msk.f32.gmra.mrb[2].mxu1 %vm244_vm1, %v10923_v35 }
 0x1c2   :  { %v317_v42 = vpop.f32.mrb[0].mxu1 }
 0x1c3   :  { %v10935_v43 = vadd.f32 %v317_v42, %v237_v40  ;;  %v319_v44 = vpop.f32.mrb[1].mxu1 }
 0x1c4   :  { %v320_v49 = vadd.f32 %v319_v44, %v241_v45 }
 0x1c5   :  { %610 = vrot.lane.b32.xlu1 %v10935_v43, %s12446_s1  ;;  %9265 = vmatprep.mubr.msk.f32.mxu0 %vm334_vm2, %v10935_v43 }
 0x1c6   :  { %v323_v46 = vpop.f32.mrb[2].mxu1 }
 0x1c7   :  { %v10942_v47 = vadd.f32 %v323_v46, %v237_v40  ;;  %v325_v48 = vpop.f32.mrb[3].mxu1 }
 0x1c8   :  { %v326_v50 = vadd.f32 %v325_v48, %v241_v45 }
 0x1c9   :  { %612 = vrot.lane.b32.xlu1 %v10942_v47, %s12446_s1  ;;  %v10948_v51 = vpack.i.bf16 %v10942_v47, %v10935_v43 }
 0x1ca   :  { %v9769_v52 = vpack.c.bf16 %v326_v50, %v320_v49  ;;  %v10950_v53 = vpack.i.bf16 %v326_v50, %v320_v49 }
 0x1cb   :  { %10262 = vrot.lane.b32.xlu0 %v10948_v51, %s12448_s22 }
 0x1cf   :  { %10267 = vrot.lane.b32.xlu0 %v10948_v51, %s12441_s2  ;;  %s12480_s2 = smov 80  }
 0x237   :  { %v611_v54 = vpop.permute.xlu1 %610 }
 0x238   :  { %9284 = vmatprep.mubr.msk.f32.mxu1 %vm334_vm2, %v611_v54 }
 0x23b   :  { %v613_v0 = vpop.permute.xlu1 %612 }
 0x23d   :  { %v10263_v55 = vpop.permute.xlu0 %10262 }
 0x23e   :  { %v10265_v56 = vunpack.i.h.bf16 %v10263_v55  ;;  %v10264_v57 = vunpack.i.l.bf16 %v10263_v55 }
 0x240   :  { %v9763_v59 = vpack.c.bf16 %v10265_v56, %v10264_v57 }
 0x241   :  { %v10268_v60 = vpop.permute.xlu0 %10267 }
 0x242   :  { %v10270_v61 = vunpack.i.h.bf16 %v10268_v60  ;;  %v10269_v62 = vunpack.i.l.bf16 %v10268_v60  ;;  %9765 = vmatprep.subr.msk.bf16.mxu0 %vm10959_vm3, %v9763_v59 }
 0x243   :  { %9768 = vmatpush3.bf16.xpose.msk.msra.mxu0 %vm10959_vm3, %v9763_v59 }
 0x244   :  { %v9773_v63 = vpack.c.bf16 %v10270_v61, %v10269_v62  ;;  %9770 = vmatprep.subr.bf16.mxu0 %v9769_v52 }
 0x246   :  { %9775 = vmatprep.subr.msk.bf16.mxu1 %vm10959_vm3, %v9773_v63 }
 0x247   :  { %9778 = vmatpush3.bf16.xpose.msk.msra.mxu1 %vm10959_vm3, %v9773_v63 }
 0x24a   :  { %9266 = vmatmul.mubr.msk.f32.vlgmr.msra.gmra.mrb[2].mxu0 %vm334_vm2, %v10942_v47 }
 0x24b   :  { %9772 = vmatpush3.bf16.msra.mxu0 %v9769_v52 }
 0x24c   :  { %9275 = vmatprep.subr.mxu0 %v170_v39 }
 0x24e   :  { %9285 = vmatmul.mubr.msk.f32.vlgmr.msra.gmra.mrb[4].mxu1 %vm334_vm2, %v613_v0 }
 0x31d   :  { %v9267_v3 = vpop.f32.mrb[2].mxu0 }
 0x31e   :  { %v415_v4 = vadd.f32 %v9267_v3, %v10977_v1  ;;  %v409_v5 = vpop.f32.mrb[3].mxu0 }
 0x31f   :  { %v410_v6 = vadd.f32 %v409_v5, %v10982_v2 }
 0x320   :  { %v421_v7 = vsel %vm69_vm0, %v415_v4, -inf }
 0x321   :  { %v9286_v8 = vpop.f32.mrb[4].mxu1  ;;  %422 = vmax.xlane.f32.xlu1 %v421_v7  ;;  %v418_v9 = vsel %vm69_vm0, %v410_v6, -inf }
 0x322   :  { %v692_v10 = vpop.f32.mrb[5].mxu1  ;;  %419 = vmax.xlane.f32.xlu0 %v418_v9  ;;  %v698_v32 = vadd.f32 %v9286_v8, %v10977_v1 }
 0x323   :  { %v693_v11 = vadd.f32 %v692_v10, %v10982_v2 }
 0x324   :  { %v704_v34 = vsel %vm69_vm0, %v698_v32, -inf }
 0x325   :  { %v701_v12 = vsel %vm69_vm0, %v693_v11, -inf }
 0x332   :  { %10272 = vrot.lane.b32.xlu1 %v10948_v51, %s12445_s28 }
 0x336   :  { %897 = vrot.lane.b32.xlu1 %v10942_v47, %s12443_s29 }
 0x35a   :  { %702 = vmax.xlane.f32.xlu1 %v701_v12 }
 0x3ae   :  { %v423_v13 = vpop.xlane.xlu1 %422 }
 0x3af   :  { %v425_v14 = vsub.f32 %v415_v4, %v423_v13  ;;  %v420_v15 = vpop.xlane.xlu0 %419 }
 0x3b0   :  { %v424_v16 = vsub.f32 %v410_v6, %v420_v15 }
 0x3b1   :  { %v428_v17 = vmul.f32 1.442695, %v425_v14 }
 0x3b2   :  { %v426_v18 = vmul.f32 1.442695, %v424_v16  ;;  %v10273_v19 = vpop.permute.xlu1 %10272 }
 0x3b3   :  { %v10275_v20 = vunpack.i.h.bf16 %v10273_v19  ;;  %v10274_v21 = vunpack.i.l.bf16 %v10273_v19 }
 0x3b4   :  { %10486 = vpow2.f32 %v426_v18 }
 0x3b5   :  { %v9783_v22 = vpack.c.bf16 %v10275_v20, %v10274_v21  ;;  %10488 = vpow2.f32 %v428_v17  ;;  %v171_v20 = vld [vmem:[%s12403_s6 + $0x8] sm:$0xff] }
 0x3b6   :  { %v898_v27 = vpop.permute.xlu1 %897 }
 0x3b7   :  { %9785 = vmatprep.subr.msk.bf16.mxu1 %vm10959_vm3, %v9783_v22 }
 0x3b8   :  { %9788 = vmatpush3.bf16.xpose.msk.msra.mxu1 %vm10959_vm3, %v9783_v22 }
 0x3be   :  { %v10487_v23 = vpop.eup %10486 }
 0x3bf   :  { %v430_v24 = vsel %vm69_vm0, %v10487_v23, 0.0  ;;  %v10489_v25 = vpop.eup %10488 }
 0x3c0   :  { %431 = vadd.xlane.f32.xlu0 %v430_v24  ;;  %v433_v26 = vsel %vm69_vm0, %v10489_v25, 0.0 }
 0x3c4   :  { %434 = vadd.xlane.f32.xlu0 %v433_v26 }
 0x3da   :  { %895 = vrot.lane.b32.xlu0 %v10935_v43, %s12443_s29 }
 0x3e7   :  { %v703_v28 = vpop.xlane.xlu1 %702 }
 0x3e8   :  { %v707_v30 = vsub.f32 %v693_v11, %v703_v28 }
 0x3ea   :  { %v709_v31 = vmul.f32 1.442695, %v707_v30 }
 0x3ec   :  { %10490 = vpow2.f32 %v709_v31 }
 0x3f6   :  { %v11004_v36 = vpop.eup %10490 }
 0x3f7   :  { %v713_v37 = vsel %vm69_vm0, %v11004_v36, 0.0 }
 0x3f9   :  { %705 = vmax.xlane.f32.xlu0 %v704_v34 }
 0x3fd   :  { %714 = vadd.xlane.f32.xlu0 %v713_v37 }
 0x413   :  { %10277 = vrot.lane.b32.xlu0 %v10950_v53, %s12446_s1 }
 0x417   :  { %1180 = vrot.lane.b32.xlu0 %v10942_v47, %s12439_s20 }
 0x44d   :  { %v432_v40 = vpop.xlane.xlu0 %431 }
 0x44e   :  { %10492 = vrcp.f32 %v432_v40 }
 0x451   :  { %v435_v42 = vpop.xlane.xlu0 %434 }
 0x452   :  { %10494 = vrcp.f32 %v435_v42 }
 0x455   :  { %v896_v44 = vpop.permute.xlu0 %895 }
 0x456   :  { %9303 = vmatprep.mubr.msk.f32.mxu1 %vm334_vm2, %v896_v44 }
 0x457   :  { %9304 = vmatmul.mubr.msk.f32.vlgmr.msra.gmra.mrb[6].mxu1 %vm334_vm2, %v898_v27 }
 0x458   :  { %v10493_v45 = vpop.eup %10492 }
 0x459   :  { %v437_v46 = vmul.f32 %v10493_v45, %v10487_v23 }
 0x45b   :  { %9272 = vmatprep.mubr.msk.f32.mxu0 %vm69_vm0, %v437_v46 }
 0x45c   :  { %v10495_v48 = vpop.eup %10494 }
 0x45d   :  { %v439_v49 = vmul.f32 %v10495_v48, %v10489_v25 }
 0x45f   :  { %9273 = vmatmul.mubr.msk.f32.vlgmr.msra.gmra.mrb[4].mxu0 %vm69_vm0, %v439_v49 }
 0x460   :  { %9276 = vmatpush3.msra.mxu0 %v170_v39 }
 0x486   :  { %v706_v50 = vpop.xlane.xlu0 %705 }
 0x487   :  { %v708_v52 = vsub.f32 %v698_v32, %v706_v50 }
 0x489   :  { %v711_v54 = vmul.f32 1.442695, %v708_v52 }
 0x48a   :  { %v715_v55 = vpop.xlane.xlu0 %714 }
 0x48b   :  { %10496 = vpow2.f32 %v711_v54 }
 0x48c   :  { %10498 = vrcp.f32 %v715_v55 }
 0x48e   :  { %v10278_v56 = vpop.permute.xlu0 %10277 }
 0x48f   :  { %v10280_v57 = vunpack.i.h.bf16 %v10278_v56  ;;  %v10279_v59 = vunpack.i.l.bf16 %v10278_v56 }
 0x491   :  { %v9779_v60 = vpack.c.bf16 %v10280_v57, %v10279_v59 }
 0x492   :  { %v1181_v17 = vpop.permute.xlu0 %1180 }
 0x493   :  { %9780 = vmatprep.subr.bf16.mxu0 %v9779_v60 }
 0x495   :  { %v10497_v61 = vpop.eup %10496 }
 0x496   :  { %v716_v62 = vsel %vm69_vm0, %v10497_v61, 0.0  ;;  %v10499_v13 = vpop.eup %10498 }
 0x497   :  { %717 = vadd.xlane.f32.xlu1 %v716_v62  ;;  %v720_v18 = vmul.f32 %v10499_v13, %v11004_v36  ;;  %v172_v13 = vld [vmem:[%s12403_s6 + $0x10] sm:$0xff] }
 0x4a8   :  { %10282 = vrot.lane.b32.xlu1 %v10948_v51, %s12435_s23 }
 0x4ac   :  { %1178 = vrot.lane.b32.xlu1 %v10935_v43, %s12439_s20 }
 0x524   :  { %v718_v63 = vpop.xlane.xlu1 %717 }
 0x525   :  { %10500 = vrcp.f32 %v718_v63 }
 0x528   :  { %v10283_v0 = vpop.permute.xlu1 %10282 }
 0x529   :  { %v10285_v3 = vunpack.i.h.bf16 %v10283_v0  ;;  %v10284_v4 = vunpack.i.l.bf16 %v10283_v0 }
 0x52a   :  { %v9305_v5 = vpop.f32.mrb[6].mxu1 }
 0x52b   :  { %v9793_v6 = vpack.c.bf16 %v10285_v3, %v10284_v4  ;;  %v983_v7 = vadd.f32 %v9305_v5, %v10977_v1  ;;  %v977_v8 = vpop.f32.mrb[7].mxu1 }
 0x52c   :  { %v978_v9 = vadd.f32 %v977_v8, %v10982_v2  ;;  %v1179_v10 = vpop.permute.xlu1 %1178 }
 0x52d   :  { %9795 = vmatprep.subr.msk.bf16.mxu1 %vm10959_vm3, %v9793_v6  ;;  %9322 = vmatprep.mubr.msk.f32.mxu1 %vm334_vm2, %v1179_v10  ;;  %v989_v11 = vsel %vm69_vm0, %v983_v7, -inf }
 0x52e   :  { %990 = vmax.xlane.f32.xlu0 %v989_v11  ;;  %9798 = vmatpush3.bf16.xpose.msk.msra.mxu1 %vm10959_vm3, %v9793_v6  ;;  %v986_v12 = vsel %vm69_vm0, %v978_v9, -inf }
 0x52f   :  { %987 = vmax.xlane.f32.xlu1 %v986_v12  ;;  %v10501_v16 = vpop.eup %10500 }
 0x530   :  { %v722_v19 = vmul.f32 %v10501_v16, %v10497_v61 }
 0x532   :  { %v9274_v14 = vpop.f32.mrb[4].mxu0 }
 0x533   :  { %v512_v15 = vpop.f32.mrb[5].mxu0 }
 0x534   :  { %9277 = vmatprep.mubr.msk.f32.mxu0 %vm334_vm2, %v512_v15 }
 0x535   :  { %9278 = vmatmul.mubr.msk.f32.vlgmr.msra.gmra.mrb[6].mxu0 %vm334_vm2, %v9274_v14  ;;  %9323 = vmatmul.mubr.msk.f32.vlgmr.msra.gmra.mrb[8].mxu1 %vm334_vm2, %v1181_v17 }
 0x536   :  { %9782 = vmatpush3.bf16.msra.mxu0 %v9779_v60  ;;  %9291 = vmatprep.mubr.msk.f32.mxu0 %vm69_vm0, %v720_v18 }
 0x537   :  { %9294 = vmatprep.subr.mxu0 %v171_v20 }
 0x539   :  { %9292 = vmatmul.mubr.msk.f32.vlgmr.msra.gmra.mrb[8].mxu0 %vm69_vm0, %v722_v19 }
 0x53a   :  { %9295 = vmatpush3.msra.mxu0 %v171_v20 }
 0x5bb   :  { %v991_v21 = vpop.xlane.xlu0 %990 }
 0x5bc   :  { %v993_v22 = vsub.f32 %v983_v7, %v991_v21  ;;  %v988_v23 = vpop.xlane.xlu1 %987 }
 0x5bd   :  { %v992_v24 = vsub.f32 %v978_v9, %v988_v23 }
 0x5be   :  { %v996_v25 = vmul.f32 1.442695, %v993_v22 }
 0x5bf   :  { %v994_v26 = vmul.f32 1.442695, %v992_v24 }
 0x5c0   :  { %10502 = vpow2.f32 %v996_v25 }
 0x5c1   :  { %10504 = vpow2.f32 %v994_v26 }
 0x5ca   :  { %v10503_v27 = vpop.eup %10502 }
 0x5cb   :  { %v10505_v28 = vpop.eup %10504  ;;  %v1001_v30 = vsel %vm69_vm0, %v10503_v27, 0.0 }
 0x5cc   :  { %1002 = vadd.xlane.f32.xlu1 %v1001_v30  ;;  %v998_v31 = vsel %vm69_vm0, %v10505_v28, 0.0 }
 0x5cd   :  { %999 = vadd.xlane.f32.xlu0 %v998_v31 }
 0x5dd   :  { %10292 = vrot.lane.b32.xlu1 %v10948_v51, %s12425_s25  ;;  %s12429_s25 = smov 72  }
 0x5e1   :  { %1461 = vrot.lane.b32.xlu1 %v10935_v43, %s12437_s26 }
 0x5e3   :  { %10287 = vrot.lane.b32.xlu0 %v10950_v53, %s12443_s29  ;;  %s12475_s29 = smov 96  }
 0x5e7   :  { %1463 = vrot.lane.b32.xlu0 %v10942_v47, %s12437_s26 }
 0x608   :  { %v9324_v32 = vpop.f32.mrb[8].mxu1 }
 0x609   :  { %v1266_v34 = vadd.f32 %v9324_v32, %v10977_v1  ;;  %v1260_v36 = vpop.f32.mrb[9].mxu1 }
 0x60a   :  { %v1261_v37 = vadd.f32 %v1260_v36, %v10982_v2 }
 0x60b   :  { %v1272_v39 = vsel %vm69_vm0, %v1266_v34, -inf }
 0x60c   :  { %1273 = vmax.xlane.f32.xlu0 %v1272_v39  ;;  %v9293_v40 = vpop.f32.mrb[8].mxu0  ;;  %v1269_v42 = vsel %vm69_vm0, %v1261_v37, -inf }
 0x60d   :  { %1270 = vmax.xlane.f32.xlu1 %v1269_v42  ;;  %v803_v44 = vpop.f32.mrb[9].mxu0 }
 0x60e   :  { %9296 = vmatprep.mubr.msk.f32.mxu0 %vm334_vm2, %v803_v44  ;;  %v173_v44 = vld [vmem:[%s12403_s6 + $0x18] sm:$0xff] }
 0x60f   :  { %9297 = vmatmul.mubr.msk.f32.vlgmr.msra.gmra.mrb[6].mxu0 %vm334_vm2, %v9293_v40 }
 0x659   :  { %v1003_v45 = vpop.xlane.xlu1 %1002 }
 0x65a   :  { %10506 = vrcp.f32 %v1003_v45  ;;  %v1000_v46 = vpop.xlane.xlu0 %999 }
 0x65b   :  { %10508 = vrcp.f32 %v1000_v46 }
 0x65d   :  { %v10293_v48 = vpop.permute.xlu1 %10292 }
 0x65e   :  { %v10295_v49 = vunpack.i.h.bf16 %v10293_v48  ;;  %v10294_v50 = vunpack.i.l.bf16 %v10293_v48  ;;  %v10288_v52 = vpop.permute.xlu0 %10287 }
 0x65f   :  { %v10290_v54 = vunpack.i.h.bf16 %v10288_v52  ;;  %v10289_v55 = vunpack.i.l.bf16 %v10288_v52 }
 0x660   :  { %v9803_v56 = vpack.c.bf16 %v10295_v49, %v10294_v50 }
 0x661   :  { %v1462_v57 = vpop.permute.xlu1 %1461  ;;  %v9789_v59 = vpack.c.bf16 %v10290_v54, %v10289_v55 }
 0x662   :  { %9805 = vmatprep.subr.msk.bf16.mxu1 %vm10959_vm3, %v9803_v56  ;;  %9341 = vmatprep.mubr.msk.f32.mxu1 %vm334_vm2, %v1462_v57  ;;  %v1464_v0 = vpop.permute.xlu0 %1463 }
 0x663   :  { %9790 = vmatprep.subr.bf16.mxu0 %v9789_v59  ;;  %9808 = vmatpush3.bf16.xpose.msk.msra.mxu1 %vm10959_vm3, %v9803_v56 }
 0x664   :  { %v10507_v60 = vpop.eup %10506  ;;  %9792 = vmatpush3.bf16.msra.mxu0 %v9789_v59 }
 0x665   :  { %v10509_v61 = vpop.eup %10508  ;;  %v1007_v63 = vmul.f32 %v10507_v60, %v10503_v27  ;;  %9313 = vmatprep.subr.mxu0 %v172_v13 }
 0x666   :  { %v1005_v62 = vmul.f32 %v10509_v61, %v10505_v28 }
 0x668   :  { %9310 = vmatprep.mubr.msk.f32.mxu0 %vm69_vm0, %v1005_v62 }
 0x669   :  { %9311 = vmatmul.mubr.msk.f32.vlgmr.msra.gmra.mrb[10].mxu0 %vm69_vm0, %v1007_v63 }
 0x66a   :  { %9342 = vmatmul.mubr.msk.f32.vlgmr.msra.gmra.mrb[10].mxu1 %vm334_vm2, %v1464_v0  ;;  %9314 = vmatpush3.msra.mxu0 %v172_v13 }
 0x699   :  { %v1274_v3 = vpop.xlane.xlu0 %1273 }
 0x69a   :  { %v1276_v4 = vsub.f32 %v1266_v34, %v1274_v3  ;;  %v1271_v5 = vpop.xlane.xlu1 %1270 }
 0x69b   :  { %v1275_v6 = vsub.f32 %v1261_v37, %v1271_v5 }
 0x69c   :  { %v1279_v7 = vmul.f32 1.442695, %v1276_v4 }
 0x69d   :  { %v1277_v8 = vmul.f32 1.442695, %v1275_v6 }
 0x69e   :  { %10510 = vpow2.f32 %v1279_v7 }
 0x69f   :  { %10512 = vpow2.f32 %v1277_v8 }
 0x6a8   :  { %v10511_v9 = vpop.eup %10510 }
 0x6a9   :  { %v10513_v10 = vpop.eup %10512  ;;  %v1284_v11 = vsel %vm69_vm0, %v10511_v9, 0.0 }
 0x6aa   :  { %1285 = vadd.xlane.f32.xlu1 %v1284_v11  ;;  %v1281_v12 = vsel %vm69_vm0, %v10513_v10, 0.0 }
 0x6ab   :  { %1282 = vadd.xlane.f32.xlu0 %v1281_v12 }
 0x6bb   :  { %10302 = vrot.lane.b32.xlu1 %v10948_v51, %s12423_s27  ;;  %s12472_s27 = smov 112  }
 0x6bf   :  { %1744 = vrot.lane.b32.xlu1 %v10935_v43, %s12433_s21 }
 0x6c1   :  { %10297 = vrot.lane.b32.xlu0 %v10950_v53, %s12439_s20  ;;  %s12478_s20 = smov 88  }
 0x6c5   :  { %1746 = vrot.lane.b32.xlu0 %v10942_v47, %s12433_s21 }
 0x737   :  { %v1286_v14 = vpop.xlane.xlu1 %1285 }
 0x738   :  { %10514 = vrcp.f32 %v1286_v14  ;;  %v1283_v15 = vpop.xlane.xlu0 %1282 }
 0x739   :  { %10516 = vrcp.f32 %v1283_v15 }
 0x73b   :  { %v10303_v16 = vpop.permute.xlu1 %10302 }
 0x73c   :  { %v10305_v17 = vunpack.i.h.bf16 %v10303_v16  ;;  %v10304_v18 = vunpack.i.l.bf16 %v10303_v16  ;;  %v10298_v19 = vpop.permute.xlu0 %10297  ;;  %v9312_v20 = vpop.f32.mrb[10].mxu0 }
 0x73d   :  { %v10300_v21 = vunpack.i.h.bf16 %v10298_v19  ;;  %v10299_v22 = vunpack.i.l.bf16 %v10298_v19  ;;  %v1086_v23 = vpop.f32.mrb[11].mxu0  ;;  %v9343_v24 = vpop.f32.mrb[10].mxu1 }
 0x73e   :  { %v9813_v25 = vpack.c.bf16 %v10305_v17, %v10304_v18  ;;  %v1549_v26 = vadd.f32 %v9343_v24, %v10977_v1  ;;  %9315 = vmatprep.mubr.msk.f32.mxu0 %vm334_vm2, %v1086_v23  ;;  %v1543_v27 = vpop.f32.mrb[11].mxu1 }
 0x73f   :  { %v1544_v28 = vadd.f32 %v1543_v27, %v10982_v2  ;;  %v1745_v30 = vpop.permute.xlu1 %1744  ;;  %9316 = vmatmul.mubr.msk.f32.vlgmr.msra.gmra.mrb[6].mxu0 %vm334_vm2, %v9312_v20  ;;  %v9799_v31 = vpack.c.bf16 %v10300_v21, %v10299_v22 }
 0x740   :  { %9815 = vmatprep.subr.msk.bf16.mxu1 %vm10959_vm3, %v9813_v25  ;;  %9360 = vmatprep.mubr.msk.f32.mxu1 %vm334_vm2, %v1745_v30  ;;  %v1555_v32 = vsel %vm69_vm0, %v1549_v26, -inf  ;;  %v1747_v42 = vpop.permute.xlu0 %1746 }
 0x741   :  { %1556 = vmax.xlane.f32.xlu0 %v1555_v32  ;;  %9800 = vmatprep.subr.bf16.mxu0 %v9799_v31  ;;  %v1552_v34 = vsel %vm69_vm0, %v1544_v28, -inf  ;;  %v174_v32 = vld [vmem:[%s12403_s6 + $0x20] sm:$0xff] }
 0x742   :  { %v10515_v36 = vpop.eup %10514  ;;  %9818 = vmatpush3.bf16.xpose.msk.msra.mxu1 %vm10959_vm3, %v9813_v25  ;;  %1553 = vmax.xlane.f32.xlu1 %v1552_v34 }
 0x743   :  { %v10517_v37 = vpop.eup %10516  ;;  %9802 = vmatpush3.bf16.msra.mxu0 %v9799_v31  ;;  %v1290_v40 = vmul.f32 %v10515_v36, %v10511_v9 }
 0x744   :  { %v1288_v39 = vmul.f32 %v10517_v37, %v10513_v10  ;;  %9332 = vmatprep.subr.mxu0 %v173_v44 }
 0x746   :  { %9329 = vmatprep.mubr.msk.f32.mxu0 %vm69_vm0, %v1288_v39 }
 0x747   :  { %9330 = vmatmul.mubr.msk.f32.vlgmr.msra.gmra.mrb[12].mxu0 %vm69_vm0, %v1290_v40 }
 0x748   :  { %9333 = vmatpush3.msra.mxu0 %v173_v44 }
 0x749   :  { %9361 = vmatmul.mubr.msk.f32.vlgmr.msra.gmra.mrb[12].mxu1 %vm334_vm2, %v1747_v42 }
 0x7ce   :  { %v1557_v45 = vpop.xlane.xlu0 %1556 }
 0x7cf   :  { %v1559_v46 = vsub.f32 %v1549_v26, %v1557_v45  ;;  %v1554_v48 = vpop.xlane.xlu1 %1553 }
 0x7d0   :  { %v1558_v49 = vsub.f32 %v1544_v28, %v1554_v48 }
 0x7d1   :  { %v1562_v50 = vmul.f32 1.442695, %v1559_v46 }
 0x7d2   :  { %v1560_v52 = vmul.f32 1.442695, %v1558_v49 }
 0x7d3   :  { %10518 = vpow2.f32 %v1562_v50 }
 0x7d4   :  { %10520 = vpow2.f32 %v1560_v52 }
 0x7dd   :  { %v10519_v54 = vpop.eup %10518 }
 0x7de   :  { %v10521_v55 = vpop.eup %10520  ;;  %v1567_v56 = vsel %vm69_vm0, %v10519_v54, 0.0 }
 0x7df   :  { %1568 = vadd.xlane.f32.xlu1 %v1567_v56  ;;  %v1564_v57 = vsel %vm69_vm0, %v10521_v55, 0.0 }
 0x7e0   :  { %1565 = vadd.xlane.f32.xlu0 %v1564_v57 }
 0x7f0   :  { %10312 = vrot.lane.b32.xlu1 %v10948_v51, %s12421_s30  ;;  %s12479_s30 = smov 24  }
 0x7f4   :  { %2027 = vrot.lane.b32.xlu1 %v10935_v43, %s12431_s24 }
 0x7f6   :  { %10307 = vrot.lane.b32.xlu0 %v10950_v53, %s12437_s26  ;;  %s12473_s26 = smov 56  }
 0x7fa   :  { %2029 = vrot.lane.b32.xlu0 %v10942_v47, %s12431_s24 }
 0x81a   :  { %v9331_v59 = vpop.f32.mrb[12].mxu0 }
 0x81b   :  { %v1369_v60 = vpop.f32.mrb[13].mxu0 }
 0x81c   :  { %v9362_v61 = vpop.f32.mrb[12].mxu1  ;;  %9334 = vmatprep.mubr.msk.f32.mxu0 %vm334_vm2, %v1369_v60 }
 0x81d   :  { %v1832_v62 = vadd.f32 %v9362_v61, %v10977_v1  ;;  %v1826_v63 = vpop.f32.mrb[13].mxu1  ;;  %9335 = vmatmul.mubr.msk.f32.vlgmr.msra.gmra.mrb[6].mxu0 %vm334_vm2, %v9331_v59 }
 0x81e   :  { %v1827_v0 = vadd.f32 %v1826_v63, %v10982_v2  ;;  %v175_v63 = vld [vmem:[%s12403_s6 + $0x28] sm:$0xff] }
 0x81f   :  { %v1838_v3 = vsel %vm69_vm0, %v1832_v62, -inf }
 0x820   :  { %1839 = vmax.xlane.f32.xlu0 %v1838_v3  ;;  %v1835_v4 = vsel %vm69_vm0, %v1827_v0, -inf }
 0x821   :  { %1836 = vmax.xlane.f32.xlu1 %v1835_v4 }
 0x86c   :  { %v1569_v5 = vpop.xlane.xlu1 %1568 }
 0x86d   :  { %10522 = vrcp.f32 %v1569_v5  ;;  %v1566_v6 = vpop.xlane.xlu0 %1565 }
 0x86e   :  { %10524 = vrcp.f32 %v1566_v6 }
 0x870   :  { %v10313_v7 = vpop.permute.xlu1 %10312 }
 0x871   :  { %v10315_v8 = vunpack.i.h.bf16 %v10313_v7  ;;  %v10314_v9 = vunpack.i.l.bf16 %v10313_v7  ;;  %v10308_v10 = vpop.permute.xlu0 %10307 }
 0x872   :  { %v10310_v11 = vunpack.i.h.bf16 %v10308_v10  ;;  %v10309_v12 = vunpack.i.l.bf16 %v10308_v10 }
 0x873   :  { %v9823_v13 = vpack.c.bf16 %v10315_v8, %v10314_v9 }
 0x874   :  { %v2028_v14 = vpop.permute.xlu1 %2027  ;;  %v9809_v15 = vpack.c.bf16 %v10310_v11, %v10309_v12 }
 0x875   :  { %9825 = vmatprep.subr.msk.bf16.mxu1 %vm10959_vm3, %v9823_v13  ;;  %9379 = vmatprep.mubr.msk.f32.mxu1 %vm334_vm2, %v2028_v14  ;;  %v2030_v20 = vpop.permute.xlu0 %2029 }
 0x876   :  { %9810 = vmatprep.subr.bf16.mxu0 %v9809_v15  ;;  %9828 = vmatpush3.bf16.xpose.msk.msra.mxu1 %vm10959_vm3, %v9823_v13 }
 0x877   :  { %v10523_v16 = vpop.eup %10522  ;;  %9812 = vmatpush3.bf16.msra.mxu0 %v9809_v15 }
 0x878   :  { %v10525_v17 = vpop.eup %10524  ;;  %v1573_v19 = vmul.f32 %v10523_v16, %v10519_v54  ;;  %9351 = vmatprep.subr.mxu0 %v174_v32 }
 0x879   :  { %v1571_v18 = vmul.f32 %v10525_v17, %v10521_v55 }
 0x87b   :  { %9348 = vmatprep.mubr.msk.f32.mxu0 %vm69_vm0, %v1571_v18 }
 0x87c   :  { %9349 = vmatmul.mubr.msk.f32.vlgmr.msra.gmra.mrb[14].mxu0 %vm69_vm0, %v1573_v19 }
 0x87d   :  { %9380 = vmatmul.mubr.msk.f32.vlgmr.msra.gmra.mrb[14].mxu1 %vm334_vm2, %v2030_v20  ;;  %9352 = vmatpush3.msra.mxu0 %v174_v32 }
 0x8ad   :  { %v1840_v21 = vpop.xlane.xlu0 %1839 }
 0x8ae   :  { %v1842_v22 = vsub.f32 %v1832_v62, %v1840_v21  ;;  %v1837_v23 = vpop.xlane.xlu1 %1836 }
 0x8af   :  { %v1841_v24 = vsub.f32 %v1827_v0, %v1837_v23 }
 0x8b0   :  { %v1845_v25 = vmul.f32 1.442695, %v1842_v22 }
 0x8b1   :  { %v1843_v26 = vmul.f32 1.442695, %v1841_v24 }
 0x8b2   :  { %10526 = vpow2.f32 %v1845_v25 }
 0x8b3   :  { %10528 = vpow2.f32 %v1843_v26 }
 0x8bc   :  { %v10527_v27 = vpop.eup %10526 }
 0x8bd   :  { %v10529_v28 = vpop.eup %10528  ;;  %v1850_v30 = vsel %vm69_vm0, %v10527_v27, 0.0 }
 0x8be   :  { %1851 = vadd.xlane.f32.xlu1 %v1850_v30  ;;  %v1847_v31 = vsel %vm69_vm0, %v10529_v28, 0.0 }
 0x8bf   :  { %1848 = vadd.xlane.f32.xlu0 %v1847_v31 }
 0x8cf   :  { %10322 = vrot.lane.b32.xlu1 %v10948_v51, %s12427_s0  ;;  %s12476_s0 = smov 40  }
 0x8d3   :  { %2310 = vrot.lane.b32.xlu1 %v10935_v43, %s12429_s25 }
 0x8d5   :  { %10317 = vrot.lane.b32.xlu0 %v10950_v53, %s12433_s21  ;;  %s12481_s21 = smov 16  }
 0x8d9   :  { %2312 = vrot.lane.b32.xlu0 %v10942_v47, %s12429_s25 }
 0x94b   :  { %v1852_v34 = vpop.xlane.xlu1 %1851 }
 0x94c   :  { %10530 = vrcp.f32 %v1852_v34  ;;  %v1849_v36 = vpop.xlane.xlu0 %1848 }
 0x94d   :  { %10532 = vrcp.f32 %v1849_v36 }
 0x94f   :  { %v10323_v51 = vpop.permute.xlu1 %10322  ;;  %v9350_v37 = vpop.f32.mrb[14].mxu0 }
 0x950   :  { %v10325_v39 = vunpack.i.h.bf16 %v10323_v51  ;;  %v10324_v40 = vunpack.i.l.bf16 %v10323_v51  ;;  %v10318_v42 = vpop.permute.xlu0 %10317  ;;  %v1652_v44 = vpop.f32.mrb[15].mxu0 }
 0x951   :  { %v10320_v45 = vunpack.i.h.bf16 %v10318_v42  ;;  %v10319_v43 = vunpack.i.l.bf16 %v10318_v42  ;;  %v9381_v46 = vpop.f32.mrb[14].mxu1  ;;  %9353 = vmatprep.mubr.msk.f32.mxu0 %vm334_vm2, %v1652_v44  ;;  %v176_v42 = vld [vmem:[%s12403_s6 + $0x30] sm:$0xff] }
 0x952   :  { %v9833_v48 = vpack.c.bf16 %v10325_v39, %v10324_v40  ;;  %v2115_v49 = vadd.f32 %v9381_v46, %v10977_v1  ;;  %v2109_v50 = vpop.f32.mrb[15].mxu1  ;;  %9354 = vmatmul.mubr.msk.f32.vlgmr.msra.gmra.mrb[6].mxu0 %vm334_vm2, %v9350_v37 }
 0x953   :  { %v2110_v47 = vadd.f32 %v2109_v50, %v10982_v2  ;;  %v2311_v52 = vpop.permute.xlu1 %2310  ;;  %v9819_v54 = vpack.c.bf16 %v10320_v45, %v10319_v43 }
 0x954   :  { %9835 = vmatprep.subr.msk.bf16.mxu1 %vm10959_vm3, %v9833_v48  ;;  %9398 = vmatprep.mubr.msk.f32.mxu1 %vm334_vm2, %v2311_v52  ;;  %v2121_v55 = vsel %vm69_vm0, %v2115_v49, -inf  ;;  %v2313_v62 = vpop.permute.xlu0 %2312 }
 0x955   :  { %2122 = vmax.xlane.f32.xlu0 %v2121_v55  ;;  %9820 = vmatprep.subr.bf16.mxu0 %v9819_v54  ;;  %v2118_v56 = vsel %vm69_vm0, %v2110_v47, -inf }
 0x956   :  { %v10531_v57 = vpop.eup %10530  ;;  %9838 = vmatpush3.bf16.xpose.msk.msra.mxu1 %vm10959_vm3, %v9833_v48  ;;  %2119 = vmax.xlane.f32.xlu1 %v2118_v56  ;;  %v177_v56 = vld [vmem:[%s12403_s6 + $0x38] sm:$0xff] }
 0x957   :  { %v10533_v59 = vpop.eup %10532  ;;  %9822 = vmatpush3.bf16.msra.mxu0 %v9819_v54  ;;  %v1856_v61 = vmul.f32 %v10531_v57, %v10527_v27 }
 0x958   :  { %v1854_v60 = vmul.f32 %v10533_v59, %v10529_v28  ;;  %9370 = vmatprep.subr.mxu0 %v175_v63 }
 0x95a   :  { %9367 = vmatprep.mubr.msk.f32.mxu0 %vm69_vm0, %v1854_v60  ;;  %v8485_v60 = vld [vmem:[%s12404_s7] ss:$0 sm:$0xff] }
 0x95b   :  { %9368 = vmatmul.mubr.msk.f32.vlgmr.msra.gmra.mrb[16].mxu0 %vm69_vm0, %v1856_v61 }
 0x95c   :  { %9371 = vmatpush3.msra.mxu0 %v175_v63 }
 0x95d   :  { %9399 = vmatmul.mubr.msk.f32.vlgmr.msra.gmra.mrb[16].mxu1 %vm334_vm2, %v2313_v62 }
 0x95e   :  { %2719 = vmatprep.mubr.f32.mxu1 %v10730_v29 }
 0x9e2   :  { %v2123_v0 = vpop.xlane.xlu0 %2122 }
 0x9e3   :  { %v2125_v3 = vsub.f32 %v2115_v49, %v2123_v0  ;;  %v2120_v4 = vpop.xlane.xlu1 %2119 }
 0x9e4   :  { %v2124_v5 = vsub.f32 %v2110_v47, %v2120_v4 }
 0x9e5   :  { %v2128_v6 = vmul.f32 1.442695, %v2125_v3 }
 0x9e6   :  { %v2126_v7 = vmul.f32 1.442695, %v2124_v5 }
 0x9e7   :  { %10534 = vpow2.f32 %v2128_v6 }
 0x9e8   :  { %10536 = vpow2.f32 %v2126_v7 }
 0x9f1   :  { %v10535_v8 = vpop.eup %10534 }
 0x9f2   :  { %v10537_v9 = vpop.eup %10536  ;;  %v2133_v10 = vsel %vm69_vm0, %v10535_v8, 0.0 }
 0x9f3   :  { %2134 = vadd.xlane.f32.xlu1 %v2133_v10  ;;  %v2130_v11 = vsel %vm69_vm0, %v10537_v9, 0.0 }
 0x9f4   :  { %2131 = vadd.xlane.f32.xlu0 %v2130_v11 }
 0xa0a   :  { %10327 = vrot.lane.b32.xlu0 %v10950_v53, %s12431_s24  ;;  %s12477_s24 = smov 32  }
 0xa2e   :  { %v9369_v12 = vpop.f32.mrb[16].mxu0 }
 0xa2f   :  { %v1935_v13 = vpop.f32.mrb[17].mxu0 }
 0xa30   :  { %v9400_v14 = vpop.f32.mrb[16].mxu1  ;;  %9372 = vmatprep.mubr.msk.f32.mxu0 %vm334_vm2, %v1935_v13 }
 0xa31   :  { %v2392_v15 = vpop.f32.mrb[17].mxu1  ;;  %9373 = vmatmul.mubr.msk.f32.vlgmr.msra.gmra.mrb[6].mxu0 %vm334_vm2, %v9369_v12  ;;  %v2398_v17 = vadd.f32 %v9400_v14, %v10977_v1 }
 0xa32   :  { %v2393_v16 = vadd.f32 %v2392_v15, %v10982_v2  ;;  %v182_v15 = vld [vmem:[%s12407_s10 + $0x8] sm:$0xff] }
 0xa33   :  { %v2404_v19 = vsel %vm69_vm0, %v2398_v17, -inf }
 0xa34   :  { %v2401_v18 = vsel %vm69_vm0, %v2393_v16, -inf }
 0xa35   :  { %2402 = vmax.xlane.f32.xlu1 %v2401_v18  ;;  %v181_v18 = vld [vmem:[%s12407_s10] sm:$0xff] }
 0xa39   :  { %2405 = vmax.xlane.f32.xlu1 %v2404_v19  ;;  %v183_v19 = vld [vmem:[%s12407_s10 + $0x10] sm:$0xff] }
 0xa80   :  { %v2135_v20 = vpop.xlane.xlu1 %2134 }
 0xa81   :  { %10538 = vrcp.f32 %v2135_v20  ;;  %v2132_v21 = vpop.xlane.xlu0 %2131  ;;  %v9845_v20 = vpack.c.bf16 %v183_v19, %v181_v18 }
 0xa82   :  { %10540 = vrcp.f32 %v2132_v21  ;;  %v186_v21 = vld [vmem:[%s12407_s10 + $0x28] sm:$0xff] }
 0xa85   :  { %v10328_v22 = vpop.permute.xlu0 %10327 }
 0xa86   :  { %v10330_v23 = vunpack.i.h.bf16 %v10328_v22  ;;  %v10329_v24 = vunpack.i.l.bf16 %v10328_v22  ;;  %v188_v22 = vld [vmem:[%s12407_s10 + $0x38] sm:$0xff] }
 0xa88   :  { %v9829_v25 = vpack.c.bf16 %v10330_v23, %v10329_v24  ;;  %v9847_v23 = vpack.c.bf16 %v188_v22, %v186_v21  ;;  %v185_v24 = vld [vmem:[%s12407_s10 + $0x20] sm:$0xff] }
 0xa8a   :  { %9830 = vmatprep.subr.bf16.mxu0 %v9829_v25 }
 0xa8b   :  { %v10539_v26 = vpop.eup %10538  ;;  %9832 = vmatpush3.bf16.msra.mxu0 %v9829_v25  ;;  %v187_v25 = vld [vmem:[%s12407_s10 + $0x30] sm:$0xff] }
 0xa8c   :  { %v10541_v2 = vpop.eup %10540  ;;  %v2139_v1 = vmul.f32 %v10539_v26, %v10535_v8  ;;  %9389 = vmatprep.subr.mxu0 %v176_v42  ;;  %v9849_v26 = vpack.c.bf16 %v187_v25, %v185_v24 }
 0xa8d   :  { %v2137_v27 = vmul.f32 %v10541_v2, %v10537_v9  ;;  %v190_v2 = vld [vmem:[%s12407_s10 + $0x48] sm:$0xff] }
 0xa8f   :  { %9386 = vmatprep.mubr.msk.f32.mxu0 %vm69_vm0, %v2137_v27  ;;  %v192_v27 = vld [vmem:[%s12407_s10 + $0x58] sm:$0xff] }
 0xa90   :  { %9387 = vmatmul.mubr.msk.f32.vlgmr.msra.gmra.mrb[18].mxu0 %vm69_vm0, %v2139_v1  ;;  %v9851_v1 = vpack.c.bf16 %v192_v27, %v190_v2  ;;  %v8542_v2 = vld [vmem:[%s12405_s8] ss:$0 sm:$0xff] }
 0xa91   :  { %9390 = vmatpush3.msra.mxu0 %v176_v42  ;;  %v215_v42 = vld [vmem:[%s12409_s12 + $0x88] sm:$0xff] }
 0xac2   :  { %v2403_v28 = vpop.xlane.xlu1 %2402 }
 0xac3   :  { %v2407_v30 = vsub.f32 %v2393_v16, %v2403_v28  ;;  %v184_v16 = vld [vmem:[%s12407_s10 + $0x18] sm:$0xff]  ;;  %v189_v28 = vld [vmem:[%s12407_s10 + $0x40] sm:$0xff] }
 0xac5   :  { %v2409_v34 = vmul.f32 1.442695, %v2407_v30  ;;  %v191_v30 = vld [vmem:[%s12407_s10 + $0x50] sm:$0xff] }
 0xac6   :  { %v2406_v31 = vpop.xlane.xlu1 %2405 }
 0xac7   :  { %v2408_v32 = vsub.f32 %v2398_v17, %v2406_v31  ;;  %v9843_v17 = vpack.c.bf16 %v184_v16, %v182_v15  ;;  %v9853_v31 = vpack.c.bf16 %v191_v30, %v189_v28  ;;  %v209_v15 = vld [vmem:[%s12409_s12 + $0x58] sm:$0xff]  ;;  %v226_v16 = vld [vmem:[%s12409_s12 + $0xe0] sm:$0xff] }
 0xac9   :  { %v2411_v36 = vmul.f32 1.442695, %v2408_v32  ;;  %9844 = vmatprep.subr.bf16.mxu1 %v9843_v17  ;;  %v194_v32 = vld [vmem:[%s12407_s10 + $0x68] sm:$0xff] }
 0xaca   :  { %9846 = vmatpush1.bf16.msra.mxu1 %v9845_v20  ;;  %v227_v17 = vld [vmem:[%s12409_s12 + $0xe8] sm:$0xff] }
 0xacb   :  { %10542 = vpow2.f32 %v2411_v36  ;;  %9848 = vmatprep.subr.bf16.mxu1 %v9847_v23  ;;  %v193_v36 = vld [vmem:[%s12407_s10 + $0x60] sm:$0xff]  ;;  %v9883_v19 = vpack.c.bf16 %v227_v17, %v226_v16 }
 0xacc   :  { %10544 = vpow2.f32 %v2409_v34  ;;  %v196_v34 = vld [vmem:[%s12407_s10 + $0x78] sm:$0xff] }
 0xace   :  { %9850 = vmatpush1.bf16.msra.mxu1 %v9849_v26 }
 0xacf   :  { %9852 = vmatprep.subr.bf16.mxu1 %v9851_v1  ;;  %v8543_v1 = vld [vmem:[%s12406_s9] ss:$0 sm:$0xff] }
 0xad2   :  { %9854 = vmatpush1.bf16.msra.mxu1 %v9853_v31 }
 0xad5   :  { %v10543_v51 = vpop.eup %10542 }
 0xad6   :  { %v2416_v37 = vsel %vm69_vm0, %v10543_v51, 0.0  ;;  %v10545_v39 = vpop.eup %10544 }
 0xad7   :  { %2417 = vadd.xlane.f32.xlu1 %v2416_v37  ;;  %v2413_v40 = vsel %vm69_vm0, %v10545_v39, 0.0  ;;  %v195_v37 = vld [vmem:[%s12407_s10 + $0x70] sm:$0xff] }
 0xadb   :  { %2414 = vadd.xlane.f32.xlu1 %v2413_v40  ;;  %v214_v40 = vld [vmem:[%s12409_s12 + $0x80] sm:$0xff] }
 0xaec   :  { %10332 = vrot.lane.b32.xlu1 %v10950_v53, %s12429_s25  ;;  %s12474_s25 = smov 104  }
 0xb63   :  { %v9388_v44 = vpop.f32.mrb[18].mxu0 }
 0xb64   :  { %v2418_v45 = vpop.xlane.xlu1 %2417  ;;  %v2218_v43 = vpop.f32.mrb[19].mxu0 }
 0xb65   :  { %9391 = vmatprep.mubr.msk.f32.mxu0 %vm334_vm2, %v2218_v43  ;;  %10546 = vrcp.f32 %v2418_v45  ;;  %v9859_v45 = vpack.c.bf16 %v215_v42, %v214_v40  ;;  %v199_v43 = vld [vmem:[%s12409_s12 + $0x8] sm:$0xff]  ;;  %v212_v42 = vld [vmem:[%s12409_s12 + $0x70] sm:$0xff] }
 0xb66   :  { %9392 = vmatmul.mubr.msk.f32.vlgmr.msra.gmra.mrb[6].mxu0 %vm334_vm2, %v9388_v44  ;;  %v198_v44 = vld [vmem:[%s12409_s12] sm:$0xff] }
 0xb68   :  { %v2415_v46 = vpop.xlane.xlu1 %2414 }
 0xb69   :  { %10548 = vrcp.f32 %v2415_v46  ;;  %v216_v46 = vld [vmem:[%s12409_s12 + $0x90] sm:$0xff] }
 0xb6c   :  { %v10333_v48 = vpop.permute.xlu1 %10332 }
 0xb6d   :  { %v10335_v49 = vunpack.i.h.bf16 %v10333_v48  ;;  %v10334_v50 = vunpack.i.l.bf16 %v10333_v48  ;;  %v217_v48 = vld [vmem:[%s12409_s12 + $0x98] sm:$0xff] }
 0xb6f   :  { %v9839_v47 = vpack.c.bf16 %v10335_v49, %v10334_v50  ;;  %v10547_v52 = vpop.eup %10546  ;;  %v9861_v49 = vpack.c.bf16 %v199_v43, %v198_v44  ;;  %v9863_v50 = vpack.c.bf16 %v217_v48, %v216_v46  ;;  %v213_v44 = vld [vmem:[%s12409_s12 + $0x78] sm:$0xff]  ;;  %v197_v43 = vld [vmem:[%s12408_s11] sm:$0x3] }
 0xb70   :  { %v2422_v53 = vmul.f32 %v10547_v52, %v10543_v51  ;;  %v9855_v51 = vpack.c.bf16 %v196_v34, %v194_v32  ;;  %v201_v52 = vld [vmem:[%s12409_s12 + $0x18] sm:$0xff]  ;;  %v2642_v46 = vrot.slane %v197_v43, %v10927_v38  ;;  %v2646_v48 = vrot.slane %v197_v43, %v10933_v41  ;;  %v8563_v43 = vld [vmem:[%s12401_s4 + $0xf0] sm:$0xff] }
 0xb71   :  { %9840 = vmatprep.subr.bf16.mxu0 %v9839_v47 }
 0xb72   :  { %9842 = vmatpush3.bf16.msra.mxu0 %v9839_v47  ;;  %9856 = vmatprep.subr.bf16.mxu1 %v9855_v51  ;;  %v200_v47 = vld [vmem:[%s12409_s12 + $0x10] sm:$0xff]  ;;  %v211_v51 = vld [vmem:[%s12409_s12 + $0x68] sm:$0xff] }
 0xb73   :  { %v10549_v54 = vpop.eup %10548  ;;  %9408 = vmatprep.subr.mxu0 %v177_v56 }
 0xb74   :  { %v2420_v55 = vmul.f32 %v10549_v54, %v10545_v39  ;;  %v9857_v39 = vpack.c.bf16 %v195_v37, %v193_v36  ;;  %v218_v54 = vld [vmem:[%s12409_s12 + $0xa0] sm:$0xff] }
 0xb76   :  { %9405 = vmatprep.mubr.msk.f32.mxu0 %vm69_vm0, %v2420_v55  ;;  %9858 = vmatpush1.bf16.msra.mxu1 %v9857_v39  ;;  %v219_v55 = vld [vmem:[%s12409_s12 + $0xa8] sm:$0xff]  ;;  %v229_v39 = vld [vmem:[%s12409_s12 + $0xf8] sm:$0xff] }
 0xb77   :  { %9406 = vmatmul.mubr.msk.f32.vlgmr.msra.gmra.mrb[20].mxu0 %vm69_vm0, %v2422_v53  ;;  %v9865_v53 = vpack.c.bf16 %v201_v52, %v200_v47 }
 0xb78   :  { %9409 = vmatpush3.msra.mxu0 %v177_v56  ;;  %v9867_v56 = vpack.c.bf16 %v219_v55, %v218_v54 }
 0xb79   :  { %9860 = vmatprep.subr.bf16.mxu0 %v9859_v45  ;;  %v9889_v45 = vpack.c.bf16 %v213_v44, %v212_v42  ;;  %v8564_v42 = vld [vmem:[%s12401_s4 + $0xf8] sm:$0xff] }
 0xc4a   :  { %v9407_v57 = vpop.f32.mrb[20].mxu0 }
 0xc4b   :  { %v2501_v59 = vpop.f32.mrb[21].mxu0 }
 0xc4c   :  { %9410 = vmatprep.mubr.msk.f32.mxu0 %vm334_vm2, %v2501_v59  ;;  %v203_v59 = vld [vmem:[%s12409_s12 + $0x28] sm:$0xff] }
 0xc4d   :  { %9411 = vmatmul.mubr.msk.f32.vlgmr.msra.gmra.mrb[6].mxu0 %vm334_vm2, %v9407_v57  ;;  %v202_v57 = vld [vmem:[%s12409_s12 + $0x20] sm:$0xff] }
 0xc4e   :  { %9862 = vmatpush3.bf16.msra.mxu0 %v9861_v49 }
 0xc4f   :  { %9864 = vmatprep.subr.bf16.mxu0 %v9863_v50 }
 0xc52   :  { %9866 = vmatpush3.bf16.msra.mxu0 %v9865_v53 }
 0xc53   :  { %9868 = vmatprep.subr.bf16.mxu0 %v9867_v56 }
 0xd20   :  { %v9412_v61 = vpop.f32.mrb[6].mxu0 }
 0xd21   :  { %v10194_v62 = vadd.f32 %v9412_v61, %v8485_v60  ;;  %v2582_v63 = vpop.f32.mrb[7].mxu0  ;;  %v221_v61 = vld [vmem:[%s12409_s12 + $0xb8] sm:$0xff] }
 0xd22   :  { %v10195_v0 = vadd.f32 %v8485_v60, %v2582_v63  ;;  %v220_v60 = vld [vmem:[%s12409_s12 + $0xb0] sm:$0xff] }
 0xd23   :  { %v2594_v3 = vadd.f32 %v10194_v62, %v10923_v35  ;;  %v9869_v62 = vpack.c.bf16 %v203_v59, %v202_v57  ;;  %v9871_v63 = vpack.c.bf16 %v221_v61, %v220_v60 }
 0xd24   :  { %v2593_v4 = vadd.f32 %v10195_v0, %v10915_v33  ;;  %v204_v0 = vld [vmem:[%s12409_s12 + $0x30] sm:$0xff] }
 0xd25   :  { %v2598_v5 = vsel %vm244_vm1, %v2594_v3, 0.0  ;;  %9870 = vmatpush3.bf16.msra.mxu0 %v9869_v62 }
 0xd26   :  { %2599 = vadd.xlane.f32.xlu1 %v2598_v5  ;;  %v2595_v6 = vsel %vm244_vm1, %v2593_v4, 0.0  ;;  %v223_v5 = vld [vmem:[%s12409_s12 + $0xc8] sm:$0xff]  ;;  %9872 = vmatprep.subr.bf16.mxu0 %v9871_v63  ;;  %v8546_v63 = vld [vmem:[%s12410_s13] ss:$0 sm:$0xff] }
 0xd27   :  { %2596 = vadd.xlane.f32.xlu0 %v2595_v6 }
 0xdb3   :  { %v2600_v7 = vpop.xlane.xlu1 %2599 }
 0xdb4   :  { %v2603_v8 = vmul.f32 0.015625, %v2600_v7  ;;  %v2597_v9 = vpop.xlane.xlu0 %2596 }
 0xdb5   :  { %v2602_v10 = vmul.f32 0.015625, %v2597_v9  ;;  %v207_v9 = vld [vmem:[%s12409_s12 + $0x48] sm:$0xff] }
 0xdb6   :  { %v11186_v11 = vsub.f32 %v2594_v3, %v2603_v8  ;;  %v205_v3 = vld [vmem:[%s12409_s12 + $0x38] sm:$0xff]  ;;  %v206_v8 = vld [vmem:[%s12409_s12 + $0x40] sm:$0xff] }
 0xdb7   :  { %v11188_v12 = vsub.f32 %v2593_v4, %v2602_v10  ;;  %v222_v4 = vld [vmem:[%s12409_s12 + $0xc0] sm:$0xff]  ;;  %v9873_v6 = vpack.c.bf16 %v205_v3, %v204_v0  ;;  %v224_v10 = vld [vmem:[%s12409_s12 + $0xd0] sm:$0xff] }
 0xdb8   :  { %v2607_v33 = vmul.f32 %v11186_v11, %v11186_v11  ;;  %v9875_v7 = vpack.c.bf16 %v223_v5, %v222_v4 }
 0xdb9   :  { %v2606_v13 = vmul.f32 %v11188_v12, %v11188_v12  ;;  %9874 = vmatpush3.bf16.msra.mxu0 %v9873_v6 }
 0xdba   :  { %v2611_v14 = vsel %vm244_vm1, %v2607_v33, 0.0  ;;  %9876 = vmatprep.subr.bf16.mxu0 %v9875_v7 }
 0xdbb   :  { %v2608_v35 = vsel %vm244_vm1, %v2606_v13, 0.0  ;;  %v225_v13 = vld [vmem:[%s12409_s12 + $0xd8] sm:$0xff] }
 0xdbc   :  { %2609 = vadd.xlane.f32.xlu0 %v2608_v35  ;;  %v9877_v35 = vpack.c.bf16 %v207_v9, %v206_v8  ;;  %v9879_v33 = vpack.c.bf16 %v225_v13, %v224_v10 }
 0xdbe   :  { %9878 = vmatpush3.bf16.msra.mxu0 %v9877_v35 }
 0xdbf   :  { %9880 = vmatprep.subr.bf16.mxu0 %v9879_v33 }
 0xdc0   :  { %2612 = vadd.xlane.f32.xlu0 %v2611_v14  ;;  %v208_v14 = vld [vmem:[%s12409_s12 + $0x50] sm:$0xff] }
 0xdc1   :  { %v9881_v18 = vpack.c.bf16 %v209_v15, %v208_v14 }
 0xdc3   :  { %9882 = vmatpush3.bf16.msra.mxu0 %v9881_v18 }
 0xdc4   :  { %9884 = vmatprep.subr.bf16.mxu0 %v9883_v19 }
 0xe49   :  { %v2610_v20 = vpop.xlane.xlu0 %2609 }
 0xe4a   :  { %v2614_v21 = vmul.f32 0.015625, %v2610_v20 }
 0xe4c   :  { %v2616_v22 = vadd.f32 1e-05, %v2614_v21 }
 0xe4d   :  { %v2613_v23 = vpop.xlane.xlu0 %2612 }
 0xe4e   :  { %10550 = vrsqrt.f32 %v2616_v22  ;;  %v2615_v24 = vmul.f32 0.015625, %v2613_v23  ;;  %v8550_v23 = vld [vmem:[%s12401_s4 + $0x88] sm:$0xff] }
 0xe50   :  { %v2617_v25 = vadd.f32 1e-05, %v2615_v24  ;;  %v8552_v24 = vld [vmem:[%s12401_s4 + $0x98] sm:$0xff] }
 0xe52   :  { %10552 = vrsqrt.f32 %v2617_v25  ;;  %v9891_v25 = vpack.c.bf16 %v8552_v24, %v8550_v23  ;;  %v11463_v23 = vld [vmem:[%s12471_s3] sm:$0xff] }
 0xe54   :  { %9892 = vmatprep.subr.bf16.mxu1 %v9891_v25  ;;  %v11469_v25 = vld [vmem:[%s12471_s3 + $0x8] sm:$0xff] }
 0xe58   :  { %v10551_v26 = vpop.eup %10550 }
 0xe59   :  { %v2620_v27 = vmul.f32 %v10551_v26, %v11188_v12  ;;  %v210_v12 = vld [vmem:[%s12409_s12 + $0x60] sm:$0xff] }
 0xe5a   :  { %v9885_v37 = vpack.c.bf16 %v211_v51, %v210_v12  ;;  %v8549_v26 = vld [vmem:[%s12401_s4 + $0x80] sm:$0xff]  ;;  %v8560_v12 = vld [vmem:[%s12401_s4 + $0xd8] sm:$0xff] }
 0xe5b   :  { %v2628_v28 = vmul.f32 %v8542_v2, %v2620_v27 }
 0xe5c   :  { %v10553_v30 = vpop.eup %10552  ;;  %9886 = vmatpush3.bf16.msra.mxu0 %v9885_v37  ;;  %v8557_v37 = vld [vmem:[%s12401_s4 + $0xc0] sm:$0xff] }
 0xe5d   :  { %v2636_v31 = vadd.f32 %v8543_v1, %v2628_v28  ;;  %v2621_v32 = vmul.f32 %v10553_v30, %v11186_v11  ;;  %v228_v11 = vld [vmem:[%s12409_s12 + $0xf0] sm:$0xff]  ;;  %v8556_v28 = vld [vmem:[%s12401_s4 + $0xb8] sm:$0xff] }
 0xe5e   :  { %v9887_v40 = vpack.c.bf16 %v229_v39, %v228_v11  ;;  %v8559_v11 = vld [vmem:[%s12401_s4 + $0xd0] sm:$0xff] }
 0xe5f   :  { %8544 = vmatmul.mubr.msk.f32.vlgmr.msra.gmra.mrb[18].mxu1 %vm244_vm1, %v2636_v31  ;;  %v2629_v34 = vmul.f32 %v8542_v2, %v2621_v32  ;;  %v8551_v2 = vld [vmem:[%s12401_s4 + $0x90] sm:$0xff]  ;;  %v9901_v39 = vpack.c.bf16 %v8559_v11, %v8557_v37 }
 0xe60   :  { %2725 = vmatprep.mubr.f32.mxu1 %v10730_v29  ;;  %9888 = vmatprep.subr.bf16.mxu0 %v9887_v40  ;;  %v9893_v27 = vpack.c.bf16 %v8551_v2, %v8549_v26  ;;  %v8555_v32 = vld [vmem:[%s12401_s4 + $0xb0] sm:$0xff]  ;;  %v8562_v40 = vld [vmem:[%s12401_s4 + $0xe8] sm:$0xff] }
 0xe61   :  { %v2637_v36 = vadd.f32 %v8543_v1, %v2629_v34  ;;  %9890 = vmatpush3.bf16.msra.mxu0 %v9889_v45  ;;  %v8554_v1 = vld [vmem:[%s12401_s4 + $0xa8] sm:$0xff]  ;;  %v9903_v44 = vpack.c.bf16 %v8564_v42, %v8562_v40  ;;  %v8561_v45 = vld [vmem:[%s12401_s4 + $0xe0] sm:$0xff] }
 0xe62   :  { %9894 = vmatpush1.bf16.msra.mxu1 %v9893_v27  ;;  %v9895_v30 = vpack.c.bf16 %v8556_v28, %v8554_v1 }
 0xe63   :  { %8545 = vmatmul.mubr.msk.f32.gmra.mrb[20].mxu1 %vm244_vm1, %v2637_v36 }
 0xe64   :  { %3034 = vmatprep.mubr.f32.mxu1 %v10730_v29  ;;  %9896 = vmatprep.subr.bf16.mxu1 %v9895_v30 }
 0xf32   :  { %v2721_v49 = vpop.f32.mrb[18].mxu1 }
 0xf33   :  { %v2722_v50 = vadd.f32 %v2721_v49, %v2642_v46  ;;  %v2723_v47 = vpop.f32.mrb[19].mxu1 }
 0xf34   :  { %v2724_v52 = vadd.f32 %v2723_v47, %v2646_v48 }
 0xf35   :  { %v2732_v53 = vmax.f32 %v2722_v50, 0.0 }
 0xf36   :  { %v2733_v54 = vmax.f32 %v2724_v52, 0.0  ;;  %v2727_v55 = vpop.f32.mrb[20].mxu1 }
 0xf37   :  { %v2728_v56 = vadd.f32 %v2727_v55, %v2642_v46  ;;  %v2729_v57 = vpop.f32.mrb[21].mxu1  ;;  %v9905_v46 = vpack.c.bf16 %v8563_v43, %v8561_v45 }
 0xf38   :  { %v2730_v59 = vadd.f32 %v2729_v57, %v2646_v48  ;;  %2806 = vmatprep.mubr.f32.mxu0 %v2733_v54  ;;  %v8548_v57 = vld [vmem:[%s12412_s15] ss:$0 sm:$0xff] }
 0xf39   :  { %2807 = vmatmul.mubr.f32.vlgmr.msra.gmra.mrb[22].mxu0 %v2732_v53  ;;  %v2734_v61 = vmax.f32 %v2728_v56, 0.0  ;;  %v8547_v53 = vld [vmem:[%s12411_s14] ss:$0 sm:$0xff] }
 0xf3a   :  { %v2735_v60 = vmax.f32 %v2730_v59, 0.0 }
 0xf3c   :  { %2811 = vmatprep.mubr.f32.mxu0 %v2735_v60 }
 0xf3d   :  { %2812 = vmatmul.mubr.f32.gmra.mrb[24].mxu0 %v2734_v61 }
0x100c   :  { %v8984_v62 = vpop.f32.mrb[22].mxu0 }
0x100d   :  { %v8985_v0 = vpop.f32.mrb[23].mxu0 }
0x100e   :  { %v8986_v3 = vadd.f32 %v8985_v0, %v8984_v62 }
0x1010   :  { %v2809_v4 = vadd.f32 %v8986_v3, %v8546_v63  ;;  %v8987_v5 = vpop.f32.mrb[24].mxu0  ;;  %v8565_v3 = vld [vmem:[%s12402_s5 + $0x2] sm:$0x3] }
0x1011   :  { %v8988_v6 = vpop.f32.mrb[25].mxu0 }
0x1012   :  { %v8989_v7 = vadd.f32 %v8988_v6, %v8987_v5  ;;  %v2817_v8 = vadd.f32 %v2809_v4, %v2636_v31  ;;  %v8553_v31 = vld [vmem:[%s12401_s4 + $0xa0] sm:$0xff]  ;;  %v2957_v4 = vrot.slane %v8565_v3, %v10927_v38 }
0x1013   :  { %v9897_v34 = vpack.c.bf16 %v8555_v32, %v8553_v31 }
0x1014   :  { %v2814_v9 = vadd.f32 %v8989_v7, %v8546_v63  ;;  %v2819_v10 = vsel %vm244_vm1, %v2817_v8, 0.0 }
0x1015   :  { %2820 = vadd.xlane.f32.xlu0 %v2819_v10  ;;  %9898 = vmatpush1.bf16.msra.mxu1 %v9897_v34 }
0x1016   :  { %v2818_v13 = vadd.f32 %v2814_v9, %v2637_v36  ;;  %v8558_v36 = vld [vmem:[%s12401_s4 + $0xc8] sm:$0xff] }
0x1017   :  { %v9899_v51 = vpack.c.bf16 %v8560_v12, %v8558_v36 }
0x1018   :  { %v2822_v35 = vsel %vm244_vm1, %v2818_v13, 0.0 }
0x1019   :  { %2823 = vadd.xlane.f32.xlu0 %v2822_v35  ;;  %9900 = vmatprep.subr.bf16.mxu1 %v9899_v51 }
0x101a   :  { %9902 = vmatpush1.bf16.msra.mxu1 %v9901_v39 }
0x101b   :  { %9904 = vmatprep.subr.bf16.mxu1 %v9903_v44 }
0x101e   :  { %9906 = vmatpush1.bf16.msra.mxu1 %v9905_v46 }
0x10a2   :  { %v2821_v33 = vpop.xlane.xlu0 %2820 }
0x10a3   :  { %v2825_v14 = vmul.f32 0.015625, %v2821_v33 }
0x10a5   :  { %v2827_v15 = vsub.f32 %v2817_v8, %v2825_v14  ;;  %v2961_v8 = vrot.slane %v8565_v3, %v10933_v41 }
0x10a6   :  { %v2824_v16 = vpop.xlane.xlu0 %2823 }
0x10a7   :  { %v2826_v17 = vmul.f32 0.015625, %v2824_v16  ;;  %v2829_v18 = vmul.f32 %v2827_v15, %v2827_v15 }
0x10a9   :  { %v2828_v19 = vsub.f32 %v2818_v13, %v2826_v17  ;;  %v2831_v20 = vsel %vm244_vm1, %v2829_v18, 0.0 }
0x10aa   :  { %2832 = vadd.xlane.f32.xlu0 %v2831_v20 }
0x10ab   :  { %v2830_v21 = vmul.f32 %v2828_v19, %v2828_v19 }
0x10ad   :  { %v2834_v22 = vsel %vm244_vm1, %v2830_v21, 0.0 }
0x10ae   :  { %2835 = vadd.xlane.f32.xlu1 %v2834_v22 }
0x1137   :  { %v2833_v48 = vpop.xlane.xlu0 %2832 }
0x1138   :  { %v2837_v49 = vmul.f32 0.015625, %v2833_v48 }
0x113a   :  { %v2839_v50 = vadd.f32 1e-05, %v2837_v49 }
0x113b   :  { %v2836_v47 = vpop.xlane.xlu1 %2835 }
0x113c   :  { %10554 = vrsqrt.f32 %v2839_v50  ;;  %v2838_v52 = vmul.f32 0.015625, %v2836_v47 }
0x113e   :  { %v2840_v54 = vadd.f32 1e-05, %v2838_v52 }
0x1140   :  { %10556 = vrsqrt.f32 %v2840_v54 }
0x1146   :  { %v10555_v55 = vpop.eup %10554 }
0x1147   :  { %v2843_v56 = vmul.f32 %v10555_v55, %v2827_v15 }
0x1149   :  { %v2851_v59 = vmul.f32 %v8547_v53, %v2843_v56 }
0x114a   :  { %v10557_v60 = vpop.eup %10556 }
0x114b   :  { %v11418_v61 = vadd.f32 %v8548_v57, %v2851_v59  ;;  %v2844_v62 = vmul.f32 %v10557_v60, %v2828_v19  ;;  %v8566_v59 = vld [vmem:[%s12403_s6 + $0x40] sm:$0xff] }
0x114d   :  { %8629 = vmatmul.mubr.msk.f32.vlgmr.msra.gmra.mrb[22].mxu1 %vm244_vm1, %v11418_v61  ;;  %v2852_v63 = vmul.f32 %v8547_v53, %v2844_v62 }
0x114e   :  { %3040 = vmatprep.mubr.f32.mxu1 %v10730_v29 }
0x114f   :  { %v11423_v0 = vadd.f32 %v8548_v57, %v2852_v63 }
0x1151   :  { %8630 = vmatmul.mubr.msk.f32.gmra.mrb[24].mxu1 %vm244_vm1, %v11423_v0 }
0x1220   :  { %v3036_v5 = vpop.f32.mrb[22].mxu1 }
0x1221   :  { %v11431_v6 = vadd.f32 %v3036_v5, %v2957_v4  ;;  %v3038_v7 = vpop.f32.mrb[23].mxu1 }
0x1222   :  { %v3039_v35 = vadd.f32 %v3038_v7, %v2961_v8 }
0x1223   :  { %9417 = vmatprep.mubr.msk.f32.mxu1 %vm334_vm2, %v11431_v6 }
0x1224   :  { %v3042_v9 = vpop.f32.mrb[24].mxu1 }
0x1225   :  { %v11436_v10 = vadd.f32 %v3042_v9, %v2957_v4  ;;  %v3044_v13 = vpop.f32.mrb[25].mxu1 }
0x1226   :  { %v3045_v33 = vadd.f32 %v3044_v13, %v2961_v8 }
0x1227   :  { %v11440_v14 = vpack.i.bf16 %v11436_v10, %v11431_v6 }
0x1228   :  { %v9913_v15 = vpack.c.bf16 %v3045_v33, %v3039_v35  ;;  %v11442_v16 = vpack.i.bf16 %v3045_v33, %v3039_v35 }
0x1229   :  { %10337 = vrot.lane.b32.xlu0 %v11440_v14, %s12448_s22 }
0x122a   :  { %9914 = vmatprep.subr.bf16.mxu0 %v9913_v15 }
0x122b   :  { %9916 = vmatpush3.bf16.msra.mxu0 %v9913_v15 }
0x122d   :  { %3328 = vrot.lane.b32.xlu0 %v11431_v6, %s12446_s1 }
0x1231   :  { %3330 = vrot.lane.b32.xlu0 %v11436_v10, %s12446_s1 }
0x1235   :  { %10347 = vrot.lane.b32.xlu0 %v11440_v14, %s12445_s28  ;;  %s12483_s28 = smov 8  }
0x1239   :  { %3613 = vrot.lane.b32.xlu0 %v11431_v6, %s12472_s27 }
0x129b   :  { %v10338_v17 = vpop.permute.xlu0 %10337 }
0x129c   :  { %v10340_v18 = vunpack.i.h.bf16 %v10338_v17  ;;  %v10339_v19 = vunpack.i.l.bf16 %v10338_v17 }
0x129e   :  { %v9907_v20 = vpack.c.bf16 %v10340_v18, %v10339_v19 }
0x129f   :  { %v3329_v11 = vpop.permute.xlu0 %3328 }
0x12a0   :  { %9909 = vmatprep.subr.msk.bf16.mxu1 %vm10959_vm3, %v9907_v20 }
0x12a1   :  { %9912 = vmatpush3.bf16.xpose.msk.msra.mxu1 %vm10959_vm3, %v9907_v20 }
0x12a2   :  { %9427 = vmatprep.subr.mxu1 %v8566_v59 }
0x12a3   :  { %v3331_v42 = vpop.permute.xlu0 %3330 }
0x12a7   :  { %v10348_v48 = vpop.permute.xlu0 %10347 }
0x12a8   :  { %9418 = vmatmul.mubr.msk.f32.vlgmr.msra.gmra.mrb[26].mxu1 %vm334_vm2, %v11436_v10  ;;  %v10350_v47 = vunpack.i.h.bf16 %v10348_v48  ;;  %v10349_v52 = vunpack.i.l.bf16 %v10348_v48 }
0x12a9   :  { %9428 = vmatpush3.msra.mxu1 %v8566_v59 }
0x12aa   :  { %v9927_v53 = vpack.c.bf16 %v10350_v47, %v10349_v52 }
0x12ab   :  { %v3614_v56 = vpop.permute.xlu0 %3613 }
0x137b   :  { %v9419_v21 = vpop.f32.mrb[26].mxu1 }
0x137c   :  { %v3127_v22 = vpop.f32.mrb[27].mxu1  ;;  %v3133_v26 = vadd.f32 %v11469_v25, %v9419_v21 }
0x137d   :  { %v3128_v24 = vadd.f32 %v11463_v23, %v3127_v22 }
0x137e   :  { %v3139_v27 = vsel %vm69_vm0, %v3133_v26, -inf }
0x137f   :  { %v3136_v2 = vsel %vm69_vm0, %v3128_v24, -inf }
0x1380   :  { %3137 = vmax.xlane.f32.xlu1 %v3136_v2 }
0x1384   :  { %3140 = vmax.xlane.f32.xlu1 %v3139_v27 }
0x140d   :  { %v3138_v1 = vpop.xlane.xlu1 %3137 }
0x140e   :  { %v3142_v28 = vsub.f32 %v3128_v24, %v3138_v1 }
0x1410   :  { %v3144_v32 = vmul.f32 1.442695, %v3142_v28 }
0x1411   :  { %v3141_v30 = vpop.xlane.xlu1 %3140 }
0x1412   :  { %v3143_v31 = vsub.f32 %v3133_v26, %v3141_v30 }
0x1414   :  { %v3146_v34 = vmul.f32 1.442695, %v3143_v31 }
0x1416   :  { %10558 = vpow2.f32 %v3146_v34 }
0x1417   :  { %10560 = vpow2.f32 %v3144_v32  ;;  %v8567_v32 = vld [vmem:[%s12403_s6 + $0x48] sm:$0xff] }
0x1420   :  { %v10559_v36 = vpop.eup %10558 }
0x1421   :  { %v3151_v12 = vsel %vm69_vm0, %v10559_v36, 0.0  ;;  %v10561_v51 = vpop.eup %10560 }
0x1422   :  { %3152 = vadd.xlane.f32.xlu1 %v3151_v12  ;;  %v3148_v37 = vsel %vm69_vm0, %v10561_v51, 0.0 }
0x1426   :  { %3149 = vadd.xlane.f32.xlu1 %v3148_v37 }
0x1437   :  { %10342 = vrot.lane.b32.xlu1 %v11440_v14, %s12473_s26 }
0x143b   :  { %3615 = vrot.lane.b32.xlu1 %v11436_v10, %s12472_s27 }
0x14af   :  { %v3153_v39 = vpop.xlane.xlu1 %3152 }
0x14b0   :  { %10562 = vrcp.f32 %v3153_v39 }
0x14b3   :  { %v3150_v40 = vpop.xlane.xlu1 %3149 }
0x14b4   :  { %10564 = vrcp.f32 %v3150_v40 }
0x14b7   :  { %v10343_v44 = vpop.permute.xlu1 %10342 }
0x14b8   :  { %v10345_v45 = vunpack.i.h.bf16 %v10343_v44  ;;  %v10344_v43 = vunpack.i.l.bf16 %v10343_v44 }
0x14ba   :  { %v9917_v46 = vpack.c.bf16 %v10345_v45, %v10344_v43  ;;  %v10563_v49 = vpop.eup %10562 }
0x14bb   :  { %v3157_v55 = vmul.f32 %v10563_v49, %v10559_v36  ;;  %v3616_v57 = vpop.permute.xlu1 %3615 }
0x14bc   :  { %9919 = vmatprep.subr.msk.bf16.mxu0 %vm10959_vm3, %v9917_v46 }
0x14be   :  { %v10565_v50 = vpop.eup %10564 }
0x14bf   :  { %v3155_v54 = vmul.f32 %v10565_v50, %v10561_v51 }
0x14c1   :  { %9424 = vmatprep.mubr.msk.f32.mxu0 %vm69_vm0, %v3155_v54 }
0x14c2   :  { %9425 = vmatmul.mubr.msk.f32.vlgmr.msra.gmra.mrb[26].mxu0 %vm69_vm0, %v3157_v55 }
0x14c3   :  { %9922 = vmatpush3.bf16.xpose.msk.msra.mxu0 %vm10959_vm3, %v9917_v46  ;;  %9436 = vmatprep.mubr.msk.f32.mxu0 %vm334_vm2, %v3329_v11 }
0x14c4   :  { %9929 = vmatprep.subr.msk.bf16.mxu0 %vm10959_vm3, %v9927_v53 }
0x14ca   :  { %9437 = vmatmul.mubr.msk.f32.vlgmr.msra.gmra.mrb[28].mxu0 %vm334_vm2, %v3331_v42 }
0x14cb   :  { %9932 = vmatpush3.bf16.xpose.msk.msra.mxu0 %vm10959_vm3, %v9927_v53  ;;  %9455 = vmatprep.mubr.msk.f32.mxu0 %vm334_vm2, %v3614_v56 }
0x14d2   :  { %9456 = vmatmul.mubr.msk.f32.vlgmr.msra.gmra.mrb[30].mxu0 %vm334_vm2, %v3616_v57 }
0x1595   :  { %v9426_v60 = vpop.f32.mrb[26].mxu0 }
0x1596   :  { %v3230_v62 = vpop.f32.mrb[27].mxu0 }
0x1597   :  { %9429 = vmatprep.mubr.msk.f32.mxu1 %vm334_vm2, %v3230_v62 }
0x1598   :  { %9430 = vmatmul.mubr.msk.f32.vlgmr.msra.gmra.mrb[28].mxu1 %vm334_vm2, %v9426_v60 }
0x159d   :  { %v9438_v63 = vpop.f32.mrb[28].mxu0 }
0x159e   :  { %v3416_v3 = vadd.f32 %v11469_v25, %v9438_v63  ;;  %v3410_v4 = vpop.f32.mrb[29].mxu0 }
0x159f   :  { %v3411_v5 = vadd.f32 %v11463_v23, %v3410_v4 }
0x15a0   :  { %v3422_v7 = vsel %vm69_vm0, %v3416_v3, -inf }
0x15a1   :  { %3423 = vmax.xlane.f32.xlu1 %v3422_v7  ;;  %v3419_v8 = vsel %vm69_vm0, %v3411_v5, -inf }
0x15a2   :  { %3420 = vmax.xlane.f32.xlu0 %v3419_v8 }
0x15a5   :  { %v9457_v9 = vpop.f32.mrb[30].mxu0 }
0x15a6   :  { %v3695_v13 = vpop.f32.mrb[31].mxu0  ;;  %v11510_v35 = vadd.f32 %v11469_v25, %v9457_v9 }
0x15a7   :  { %v3696_v34 = vadd.f32 %v11463_v23, %v3695_v13 }
0x15a8   :  { %v3707_v33 = vsel %vm69_vm0, %v11510_v35, -inf }
0x15a9   :  { %v3704_v36 = vsel %vm69_vm0, %v3696_v34, -inf }
0x15b2   :  { %10352 = vrot.lane.b32.xlu1 %v11442_v16, %s12446_s1  ;;  %s12482_s1 = smov 72  }
0x15b6   :  { %3896 = vrot.lane.b32.xlu1 %v11431_v6, %s12474_s25 }
0x15ba   :  { %3898 = vrot.lane.b32.xlu1 %v11436_v10, %s12474_s25 }
0x15de   :  { %3708 = vmax.xlane.f32.xlu1 %v3707_v33 }
0x15ef   :  { %10362 = vrot.lane.b32.xlu1 %v11442_v16, %s12472_s27 }
0x15f3   :  { %4179 = vrot.lane.b32.xlu1 %v11431_v6, %s12475_s29 }
0x15f7   :  { %4181 = vrot.lane.b32.xlu1 %v11436_v10, %s12475_s29 }
0x162e   :  { %v3424_v15 = vpop.xlane.xlu1 %3423 }
0x162f   :  { %v3426_v17 = vsub.f32 %v3416_v3, %v3424_v15  ;;  %v3421_v18 = vpop.xlane.xlu0 %3420 }
0x1630   :  { %v3425_v19 = vsub.f32 %v3411_v5, %v3421_v18 }
0x1631   :  { %v3429_v20 = vmul.f32 1.442695, %v3426_v17 }
0x1632   :  { %v3427_v21 = vmul.f32 1.442695, %v3425_v19  ;;  %v10353_v22 = vpop.permute.xlu1 %10352 }
0x1633   :  { %v10355_v24 = vunpack.i.h.bf16 %v10353_v22  ;;  %v10354_v26 = vunpack.i.l.bf16 %v10353_v22 }
0x1634   :  { %10566 = vpow2.f32 %v3427_v21 }
0x1635   :  { %v9923_v2 = vpack.c.bf16 %v10355_v24, %v10354_v26  ;;  %10568 = vpow2.f32 %v3429_v20 }
0x1636   :  { %v3897_v27 = vpop.permute.xlu1 %3896 }
0x1637   :  { %9924 = vmatprep.subr.bf16.mxu1 %v9923_v2  ;;  %9474 = vmatprep.mubr.msk.f32.mxu0 %vm334_vm2, %v3897_v27 }
0x1638   :  { %9926 = vmatpush3.bf16.msra.mxu1 %v9923_v2 }
0x1639   :  { %9446 = vmatprep.subr.mxu1 %v8567_v32 }
0x163a   :  { %v3899_v51 = vpop.permute.xlu1 %3898 }
0x163e   :  { %v10567_v1 = vpop.eup %10566 }
0x163f   :  { %v3431_v28 = vsel %vm69_vm0, %v10567_v1, 0.0  ;;  %v10569_v30 = vpop.eup %10568 }
0x1640   :  { %3432 = vadd.xlane.f32.xlu0 %v3431_v28  ;;  %v3434_v31 = vsel %vm69_vm0, %v10569_v30, 0.0 }
0x1644   :  { %3435 = vadd.xlane.f32.xlu0 %v3434_v31 }
0x165a   :  { %10357 = vrot.lane.b32.xlu0 %v11440_v14, %s12476_s0 }
0x166b   :  { %v3709_v11 = vpop.xlane.xlu1 %3708 }
0x166c   :  { %v3711_v55 = vsub.f32 %v11510_v35, %v3709_v11 }
0x166e   :  { %v3714_v57 = vmul.f32 1.442695, %v3711_v55  ;;  %v8569_v55 = vld [vmem:[%s12403_s6 + $0x58] sm:$0xff] }
0x166f   :  { %v10363_v45 = vpop.permute.xlu1 %10362 }
0x1670   :  { %v10365_v48 = vunpack.i.h.bf16 %v10363_v45  ;;  %v10364_v49 = vunpack.i.l.bf16 %v10363_v45 }
0x1672   :  { %v9933_v52 = vpack.c.bf16 %v10365_v48, %v10364_v49 }
0x1673   :  { %v4180_v54 = vpop.permute.xlu1 %4179 }
0x1677   :  { %v4182_v26 = vpop.permute.xlu1 %4181 }
0x1679   :  { %3705 = vmax.xlane.f32.xlu0 %v3704_v36 }
0x16cd   :  { %v3433_v12 = vpop.xlane.xlu0 %3432 }
0x16ce   :  { %10570 = vrcp.f32 %v3433_v12 }
0x16d1   :  { %v3436_v37 = vpop.xlane.xlu0 %3435 }
0x16d2   :  { %10572 = vrcp.f32 %v3436_v37 }
0x16d5   :  { %v10358_v39 = vpop.permute.xlu0 %10357 }
0x16d6   :  { %v10360_v40 = vunpack.i.h.bf16 %v10358_v39  ;;  %v10359_v42 = vunpack.i.l.bf16 %v10358_v39 }
0x16d8   :  { %v10571_v44 = vpop.eup %10570  ;;  %v9937_v43 = vpack.c.bf16 %v10360_v40, %v10359_v42 }
0x16d9   :  { %v3438_v46 = vmul.f32 %v10571_v44, %v10567_v1  ;;  %v8568_v1 = vld [vmem:[%s12403_s6 + $0x50] sm:$0xff] }
0x16da   :  { %9939 = vmatprep.subr.msk.bf16.mxu0 %vm10959_vm3, %v9937_v43 }
0x16db   :  { %9443 = vmatprep.mubr.msk.f32.mxu1 %vm69_vm0, %v3438_v46  ;;  %9942 = vmatpush3.bf16.xpose.msk.msra.mxu0 %vm10959_vm3, %v9937_v43 }
0x16dc   :  { %v10573_v50 = vpop.eup %10572 }
0x16dd   :  { %v3440_v47 = vmul.f32 %v10573_v50, %v10569_v30 }
0x16df   :  { %9444 = vmatmul.mubr.msk.f32.vlgmr.msra.gmra.mrb[30].mxu1 %vm69_vm0, %v3440_v47 }
0x16e0   :  { %9447 = vmatpush3.msra.mxu1 %v8567_v32 }
0x16e1   :  { %9934 = vmatprep.subr.bf16.mxu1 %v9933_v52 }
0x16e2   :  { %9475 = vmatmul.mubr.msk.f32.vlgmr.msra.gmra.mrb[32].mxu0 %vm334_vm2, %v3899_v51 }
0x16e3   :  { %9493 = vmatprep.mubr.msk.f32.mxu0 %vm334_vm2, %v4180_v54 }
0x1706   :  { %v3706_v53 = vpop.xlane.xlu0 %3705 }
0x1707   :  { %v3710_v56 = vsub.f32 %v3696_v34, %v3706_v53 }
0x1709   :  { %v3712_v59 = vmul.f32 1.442695, %v3710_v56 }
0x170b   :  { %10574 = vpow2.f32 %v3712_v59 }
0x170c   :  { %10576 = vpow2.f32 %v3714_v57 }
0x1715   :  { %v10575_v60 = vpop.eup %10574 }
0x1716   :  { %v3716_v62 = vsel %vm69_vm0, %v10575_v60, 0.0  ;;  %v10577_v63 = vpop.eup %10576 }
0x1717   :  { %3717 = vadd.xlane.f32.xlu0 %v3716_v62  ;;  %v3719_v3 = vsel %vm69_vm0, %v10577_v63, 0.0 }
0x171b   :  { %3720 = vadd.xlane.f32.xlu0 %v3719_v3 }
0x1731   :  { %10367 = vrot.lane.b32.xlu0 %v11440_v14, %s12477_s24 }
0x17a4   :  { %v3718_v4 = vpop.xlane.xlu0 %3717 }
0x17a5   :  { %10578 = vrcp.f32 %v3718_v4 }
0x17a8   :  { %v3721_v5 = vpop.xlane.xlu0 %3720 }
0x17a9   :  { %10580 = vrcp.f32 %v3721_v5 }
0x17ac   :  { %v10368_v7 = vpop.permute.xlu0 %10367 }
0x17ad   :  { %v10370_v8 = vunpack.i.h.bf16 %v10368_v7  ;;  %v10369_v9 = vunpack.i.l.bf16 %v10368_v7 }
0x17af   :  { %v9947_v13 = vpack.c.bf16 %v10370_v8, %v10369_v9  ;;  %v10579_v35 = vpop.eup %10578 }
0x17b0   :  { %v3723_v18 = vmul.f32 %v10579_v35, %v10575_v60 }
0x17b1   :  { %9949 = vmatprep.subr.msk.bf16.mxu0 %vm10959_vm3, %v9947_v13 }
0x17b2   :  { %v9445_v33 = vpop.f32.mrb[30].mxu1  ;;  %9952 = vmatpush3.bf16.xpose.msk.msra.mxu0 %vm10959_vm3, %v9947_v13 }
0x17b3   :  { %v3521_v15 = vpop.f32.mrb[31].mxu1  ;;  %v10581_v17 = vpop.eup %10580 }
0x17b4   :  { %9448 = vmatprep.mubr.msk.f32.mxu1 %vm334_vm2, %v3521_v15  ;;  %v3725_v24 = vmul.f32 %v10581_v17, %v10577_v63 }
0x17b5   :  { %9449 = vmatmul.mubr.msk.f32.vlgmr.msra.gmra.mrb[28].mxu1 %vm334_vm2, %v9445_v33  ;;  %v9476_v19 = vpop.f32.mrb[32].mxu0 }
0x17b6   :  { %9936 = vmatpush3.bf16.msra.mxu1 %v9933_v52  ;;  %v3984_v20 = vadd.f32 %v11469_v25, %v9476_v19  ;;  %9462 = vmatprep.mubr.msk.f32.mxu1 %vm69_vm0, %v3723_v18  ;;  %v3978_v21 = vpop.f32.mrb[33].mxu0 }
0x17b7   :  { %v3979_v22 = vadd.f32 %v11463_v23, %v3978_v21  ;;  %9465 = vmatprep.subr.mxu1 %v8568_v1 }
0x17b8   :  { %v3990_v2 = vsel %vm69_vm0, %v3984_v20, -inf }
0x17b9   :  { %9463 = vmatmul.mubr.msk.f32.vlgmr.msra.gmra.mrb[32].mxu1 %vm69_vm0, %v3725_v24  ;;  %9494 = vmatmul.mubr.msk.f32.vlgmr.msra.gmra.mrb[34].mxu0 %vm334_vm2, %v4182_v26  ;;  %v3987_v27 = vsel %vm69_vm0, %v3979_v22, -inf }
0x17ba   :  { %3991 = vmax.xlane.f32.xlu1 %v3990_v2  ;;  %3988 = vmax.xlane.f32.xlu0 %v3987_v27 }
0x17bb   :  { %9466 = vmatpush3.msra.mxu1 %v8568_v1 }
0x17cb   :  { %10372 = vrot.lane.b32.xlu1 %v11442_v16, %s12474_s25 }
0x17cf   :  { %4462 = vrot.lane.b32.xlu1 %v11431_v6, %s12478_s20 }
0x17d3   :  { %4464 = vrot.lane.b32.xlu1 %v11436_v10, %s12478_s20 }
0x1847   :  { %v3992_v28 = vpop.xlane.xlu1 %3991  ;;  %v3989_v30 = vpop.xlane.xlu0 %3988 }
0x1848   :  { %v3994_v31 = vsub.f32 %v3984_v20, %v3992_v28  ;;  %v3993_v32 = vsub.f32 %v3979_v22, %v3989_v30 }
0x184a   :  { %v3995_v34 = vmul.f32 1.442695, %v3993_v32  ;;  %v3997_v36 = vmul.f32 1.442695, %v3994_v31 }
0x184b   :  { %v10373_v12 = vpop.permute.xlu1 %10372 }
0x184c   :  { %v10375_v51 = vunpack.i.h.bf16 %v10373_v12  ;;  %v10374_v37 = vunpack.i.l.bf16 %v10373_v12  ;;  %10582 = vpow2.f32 %v3995_v34 }
0x184d   :  { %10584 = vpow2.f32 %v3997_v36 }
0x184e   :  { %v9943_v11 = vpack.c.bf16 %v10375_v51, %v10374_v37 }
0x184f   :  { %v4463_v39 = vpop.permute.xlu1 %4462 }
0x1850   :  { %9944 = vmatprep.subr.bf16.mxu1 %v9943_v11  ;;  %9512 = vmatprep.mubr.msk.f32.mxu0 %vm334_vm2, %v4463_v39 }
0x1853   :  { %v4465_v7 = vpop.permute.xlu1 %4464 }
0x1856   :  { %v10583_v40 = vpop.eup %10582 }
0x1857   :  { %v3999_v42 = vsel %vm69_vm0, %v10583_v40, 0.0  ;;  %v10585_v44 = vpop.eup %10584 }
0x1858   :  { %4000 = vadd.xlane.f32.xlu0 %v3999_v42  ;;  %v4002_v45 = vsel %vm69_vm0, %v10585_v44, 0.0 }
0x185c   :  { %4003 = vadd.xlane.f32.xlu0 %v4002_v45 }
0x1872   :  { %10377 = vrot.lane.b32.xlu0 %v11440_v14, %s12479_s30 }
0x188c   :  { %v9464_v43 = vpop.f32.mrb[32].mxu1  ;;  %v9495_v46 = vpop.f32.mrb[34].mxu0 }
0x188d   :  { %v4267_v48 = vadd.f32 %v11469_v25, %v9495_v46  ;;  %v3804_v49 = vpop.f32.mrb[33].mxu1  ;;  %v4261_v50 = vpop.f32.mrb[35].mxu0 }
0x188e   :  { %v4262_v47 = vadd.f32 %v11463_v23, %v4261_v50  ;;  %9467 = vmatprep.mubr.msk.f32.mxu1 %vm334_vm2, %v3804_v49 }
0x188f   :  { %9468 = vmatmul.mubr.msk.f32.vlgmr.msra.gmra.mrb[28].mxu1 %vm334_vm2, %v9464_v43  ;;  %v4273_v52 = vsel %vm69_vm0, %v4267_v48, -inf }
0x1890   :  { %9946 = vmatpush3.bf16.msra.mxu1 %v9943_v11  ;;  %4274 = vmax.xlane.f32.xlu1 %v4273_v52  ;;  %v4270_v54 = vsel %vm69_vm0, %v4262_v47, -inf }
0x1891   :  { %4271 = vmax.xlane.f32.xlu0 %v4270_v54  ;;  %9484 = vmatprep.subr.mxu1 %v8569_v55 }
0x18a1   :  { %10382 = vrot.lane.b32.xlu1 %v11442_v16, %s12475_s29 }
0x18a5   :  { %4745 = vrot.lane.b32.xlu1 %v11431_v6, %s12480_s2 }
0x18a9   :  { %4747 = vrot.lane.b32.xlu1 %v11436_v10, %s12480_s2 }
0x18e5   :  { %v4001_v53 = vpop.xlane.xlu0 %4000 }
0x18e6   :  { %10586 = vrcp.f32 %v4001_v53 }
0x18e9   :  { %v4004_v56 = vpop.xlane.xlu0 %4003 }
0x18ea   :  { %10588 = vrcp.f32 %v4004_v56 }
0x18ed   :  { %v10378_v57 = vpop.permute.xlu0 %10377 }
0x18ee   :  { %v10380_v59 = vunpack.i.h.bf16 %v10378_v57  ;;  %v10379_v60 = vunpack.i.l.bf16 %v10378_v57 }
0x18f0   :  { %v10587_v62 = vpop.eup %10586  ;;  %v9957_v63 = vpack.c.bf16 %v10380_v59, %v10379_v60 }
0x18f1   :  { %v4006_v3 = vmul.f32 %v10587_v62, %v10583_v40 }
0x18f2   :  { %9959 = vmatprep.subr.msk.bf16.mxu0 %vm10959_vm3, %v9957_v63 }
0x18f3   :  { %9481 = vmatprep.mubr.msk.f32.mxu1 %vm69_vm0, %v4006_v3  ;;  %9962 = vmatpush3.bf16.xpose.msk.msra.mxu0 %vm10959_vm3, %v9957_v63 }
0x18f4   :  { %v10589_v4 = vpop.eup %10588 }
0x18f5   :  { %v4008_v5 = vmul.f32 %v10589_v4, %v10585_v44 }
0x18f7   :  { %9482 = vmatmul.mubr.msk.f32.vlgmr.msra.gmra.mrb[34].mxu1 %vm69_vm0, %v4008_v5 }
0x18f8   :  { %9485 = vmatpush3.msra.mxu1 %v8569_v55 }
0x18fa   :  { %9513 = vmatmul.mubr.msk.f32.vlgmr.msra.gmra.mrb[36].mxu0 %vm334_vm2, %v4465_v7 }
0x191d   :  { %v4275_v8 = vpop.xlane.xlu1 %4274 }
0x191e   :  { %v4277_v9 = vsub.f32 %v4267_v48, %v4275_v8  ;;  %v4272_v13 = vpop.xlane.xlu0 %4271  ;;  %v8570_v48 = vld [vmem:[%s12403_s6 + $0x60] sm:$0xff] }
0x191f   :  { %v4276_v35 = vsub.f32 %v4262_v47, %v4272_v13 }
0x1920   :  { %v4280_v15 = vmul.f32 1.442695, %v4277_v9 }
0x1921   :  { %v10383_v33 = vpop.permute.xlu1 %10382  ;;  %v4278_v17 = vmul.f32 1.442695, %v4276_v35 }
0x1922   :  { %v10385_v18 = vunpack.i.h.bf16 %v10383_v33  ;;  %v10384_v19 = vunpack.i.l.bf16 %v10383_v33 }
0x1923   :  { %10590 = vpow2.f32 %v4278_v17 }
0x1924   :  { %v9953_v20 = vpack.c.bf16 %v10385_v18, %v10384_v19  ;;  %10592 = vpow2.f32 %v4280_v15 }
0x1925   :  { %v4746_v21 = vpop.permute.xlu1 %4745 }
0x1926   :  { %9954 = vmatprep.subr.bf16.mxu1 %v9953_v20  ;;  %9531 = vmatprep.mubr.msk.f32.mxu0 %vm334_vm2, %v4746_v21 }
0x1929   :  { %v4748_v45 = vpop.permute.xlu1 %4747 }
0x192d   :  { %v10591_v22 = vpop.eup %10590 }
0x192e   :  { %v4282_v24 = vsel %vm69_vm0, %v10591_v22, 0.0  ;;  %v10593_v26 = vpop.eup %10592 }
0x192f   :  { %4283 = vadd.xlane.f32.xlu0 %v4282_v24  ;;  %v4285_v2 = vsel %vm69_vm0, %v10593_v26, 0.0 }
0x1933   :  { %4286 = vadd.xlane.f32.xlu0 %v4285_v2 }
0x1949   :  { %10387 = vrot.lane.b32.xlu0 %v11440_v14, %s12481_s21 }
0x19bc   :  { %v4284_v27 = vpop.xlane.xlu0 %4283 }
0x19bd   :  { %10594 = vrcp.f32 %v4284_v27 }
0x19c0   :  { %v4287_v1 = vpop.xlane.xlu0 %4286 }
0x19c1   :  { %10596 = vrcp.f32 %v4287_v1 }
0x19c4   :  { %v10388_v28 = vpop.permute.xlu0 %10387 }
0x19c5   :  { %v10390_v30 = vunpack.i.h.bf16 %v10388_v28  ;;  %v10389_v31 = vunpack.i.l.bf16 %v10388_v28 }
0x19c7   :  { %v9967_v32 = vpack.c.bf16 %v10390_v30, %v10389_v31  ;;  %v10595_v34 = vpop.eup %10594 }
0x19c8   :  { %v4289_v37 = vmul.f32 %v10595_v34, %v10591_v22 }
0x19c9   :  { %9969 = vmatprep.subr.msk.bf16.mxu0 %vm10959_vm3, %v9967_v32 }
0x19ca   :  { %v9483_v36 = vpop.f32.mrb[34].mxu1  ;;  %9972 = vmatpush3.bf16.xpose.msk.msra.mxu0 %vm10959_vm3, %v9967_v32 }
0x19cb   :  { %v4087_v12 = vpop.f32.mrb[35].mxu1  ;;  %v10597_v51 = vpop.eup %10596 }
0x19cc   :  { %9486 = vmatprep.mubr.msk.f32.mxu1 %vm334_vm2, %v4087_v12  ;;  %v4291_v44 = vmul.f32 %v10597_v51, %v10593_v26 }
0x19cd   :  { %9487 = vmatmul.mubr.msk.f32.vlgmr.msra.gmra.mrb[28].mxu1 %vm334_vm2, %v9483_v36  ;;  %v9514_v11 = vpop.f32.mrb[36].mxu0 }
0x19ce   :  { %9956 = vmatpush3.bf16.msra.mxu1 %v9953_v20  ;;  %v4550_v39 = vadd.f32 %v11469_v25, %v9514_v11  ;;  %9500 = vmatprep.mubr.msk.f32.mxu1 %vm69_vm0, %v4289_v37  ;;  %v4544_v40 = vpop.f32.mrb[37].mxu0 }
0x19cf   :  { %v4545_v42 = vadd.f32 %v11463_v23, %v4544_v40  ;;  %9503 = vmatprep.subr.mxu1 %v8570_v48 }
0x19d0   :  { %v4556_v43 = vsel %vm69_vm0, %v4550_v39, -inf }
0x19d1   :  { %9501 = vmatmul.mubr.msk.f32.vlgmr.msra.gmra.mrb[36].mxu1 %vm69_vm0, %v4291_v44  ;;  %9532 = vmatmul.mubr.msk.f32.vlgmr.msra.gmra.mrb[38].mxu0 %vm334_vm2, %v4748_v45  ;;  %v4553_v46 = vsel %vm69_vm0, %v4545_v42, -inf }
0x19d2   :  { %4557 = vmax.xlane.f32.xlu1 %v4556_v43  ;;  %4554 = vmax.xlane.f32.xlu0 %v4553_v46 }
0x19d3   :  { %9504 = vmatpush3.msra.mxu1 %v8570_v48 }
0x19e3   :  { %10392 = vrot.lane.b32.xlu1 %v11442_v16, %s12478_s20 }
0x19e7   :  { %5028 = vrot.lane.b32.xlu1 %v11431_v6, %s12482_s1 }
0x19eb   :  { %5030 = vrot.lane.b32.xlu1 %v11436_v10, %s12482_s1 }
0x1a5f   :  { %v4558_v49 = vpop.xlane.xlu1 %4557  ;;  %v4555_v50 = vpop.xlane.xlu0 %4554 }
0x1a60   :  { %v4560_v47 = vsub.f32 %v4550_v39, %v4558_v49  ;;  %v4559_v52 = vsub.f32 %v4545_v42, %v4555_v50  ;;  %v8572_v50 = vld [vmem:[%s12403_s6 + $0x70] sm:$0xff] }
0x1a62   :  { %v4561_v54 = vmul.f32 1.442695, %v4559_v52  ;;  %v4563_v55 = vmul.f32 1.442695, %v4560_v47 }
0x1a63   :  { %v10393_v53 = vpop.permute.xlu1 %10392 }
0x1a64   :  { %v10395_v56 = vunpack.i.h.bf16 %v10393_v53  ;;  %v10394_v57 = vunpack.i.l.bf16 %v10393_v53  ;;  %10598 = vpow2.f32 %v4561_v54 }
0x1a65   :  { %10600 = vpow2.f32 %v4563_v55 }
0x1a66   :  { %v9963_v59 = vpack.c.bf16 %v10395_v56, %v10394_v57 }
0x1a67   :  { %v5029_v60 = vpop.permute.xlu1 %5028 }
0x1a68   :  { %9964 = vmatprep.subr.bf16.mxu1 %v9963_v59  ;;  %9550 = vmatprep.mubr.msk.f32.mxu0 %vm334_vm2, %v5029_v60 }
0x1a6b   :  { %v5031_v26 = vpop.permute.xlu1 %5030 }
0x1a6e   :  { %v10599_v6 = vpop.eup %10598 }
0x1a6f   :  { %v4565_v62 = vsel %vm69_vm0, %v10599_v6, 0.0  ;;  %v10601_v10 = vpop.eup %10600 }
0x1a70   :  { %4566 = vadd.xlane.f32.xlu0 %v4565_v62  ;;  %v4568_v63 = vsel %vm69_vm0, %v10601_v10, 0.0 }
0x1a74   :  { %4569 = vadd.xlane.f32.xlu0 %v4568_v63 }
0x1a8a   :  { %10397 = vrot.lane.b32.xlu0 %v11440_v14, %s12483_s28  ;;  %v8571_v14 = vld [vmem:[%s12403_s6 + $0x68] sm:$0xff]  ;;  %s12488_s28 = smov 8  }
0x1aa4   :  { %v9502_v3 = vpop.f32.mrb[36].mxu1  ;;  %v9533_v4 = vpop.f32.mrb[38].mxu0 }
0x1aa5   :  { %v4833_v5 = vadd.f32 %v11469_v25, %v9533_v4  ;;  %v4370_v7 = vpop.f32.mrb[37].mxu1  ;;  %v4827_v8 = vpop.f32.mrb[39].mxu0 }
0x1aa6   :  { %v4828_v9 = vadd.f32 %v11463_v23, %v4827_v8  ;;  %9505 = vmatprep.mubr.msk.f32.mxu1 %vm334_vm2, %v4370_v7 }
0x1aa7   :  { %9506 = vmatmul.mubr.msk.f32.vlgmr.msra.gmra.mrb[28].mxu1 %vm334_vm2, %v9502_v3  ;;  %v4839_v13 = vsel %vm69_vm0, %v4833_v5, -inf }
0x1aa8   :  { %9966 = vmatpush3.bf16.msra.mxu1 %v9963_v59  ;;  %4840 = vmax.xlane.f32.xlu1 %v4839_v13  ;;  %v4836_v35 = vsel %vm69_vm0, %v4828_v9, -inf }
0x1aa9   :  { %4837 = vmax.xlane.f32.xlu0 %v4836_v35  ;;  %9522 = vmatprep.subr.mxu1 %v8571_v14 }
0x1ab9   :  { %10402 = vrot.lane.b32.xlu1 %v11442_v16, %s12480_s2  ;;  %s12487_s2 = smov 80  }
0x1abd   :  { %10407 = vrot.lane.b32.xlu1 %v11442_v16, %s12482_s1 }
0x1afd   :  { %v4567_v33 = vpop.xlane.xlu0 %4566 }
0x1afe   :  { %10602 = vrcp.f32 %v4567_v33 }
0x1b01   :  { %v4570_v15 = vpop.xlane.xlu0 %4569 }
0x1b02   :  { %10604 = vrcp.f32 %v4570_v15 }
0x1b05   :  { %v10398_v17 = vpop.permute.xlu0 %10397 }
0x1b06   :  { %v10400_v18 = vunpack.i.h.bf16 %v10398_v17  ;;  %v10399_v19 = vunpack.i.l.bf16 %v10398_v17 }
0x1b08   :  { %v10603_v20 = vpop.eup %10602  ;;  %v9977_v21 = vpack.c.bf16 %v10400_v18, %v10399_v19  ;;  %v8573_v19 = vld [vmem:[%s12403_s6 + $0x78] sm:$0xff] }
0x1b09   :  { %v4572_v22 = vmul.f32 %v10603_v20, %v10599_v6 }
0x1b0a   :  { %9979 = vmatprep.subr.msk.bf16.mxu0 %vm10959_vm3, %v9977_v21 }
0x1b0b   :  { %9519 = vmatprep.mubr.msk.f32.mxu1 %vm69_vm0, %v4572_v22  ;;  %9982 = vmatpush3.bf16.xpose.msk.msra.mxu0 %vm10959_vm3, %v9977_v21  ;;  %v8639_v22 = vld [vmem:[%s12404_s7 + $0x1] ss:$0 sm:$0xff]  ;;  %s12494_s7 = sld [smem:[#allocation13_spill]] }
0x1b0c   :  { %v10605_v16 = vpop.eup %10604 }
0x1b0d   :  { %v4574_v24 = vmul.f32 %v10605_v16, %v10601_v10 }
0x1b0f   :  { %9520 = vmatmul.mubr.msk.f32.vlgmr.msra.gmra.mrb[38].mxu1 %vm69_vm0, %v4574_v24 }
0x1b10   :  { %9523 = vmatpush3.msra.mxu1 %v8571_v14 }
0x1b12   :  { %9551 = vmatmul.mubr.msk.f32.vlgmr.msra.gmra.mrb[40].mxu0 %vm334_vm2, %v5031_v26 }
0x1b13   :  { %5436 = vmatprep.mubr.f32.mxu0 %v10730_v29 }
0x1b35   :  { %v4841_v2 = vpop.xlane.xlu1 %4840 }
0x1b36   :  { %v4843_v27 = vsub.f32 %v4833_v5, %v4841_v2  ;;  %v4838_v1 = vpop.xlane.xlu0 %4837 }
0x1b37   :  { %v4842_v28 = vsub.f32 %v4828_v9, %v4838_v1 }
0x1b38   :  { %v4846_v31 = vmul.f32 1.442695, %v4843_v27 }
0x1b39   :  { %v10403_v30 = vpop.permute.xlu1 %10402  ;;  %v4844_v32 = vmul.f32 1.442695, %v4842_v28 }
0x1b3a   :  { %v10405_v34 = vunpack.i.h.bf16 %v10403_v30  ;;  %v10404_v36 = vunpack.i.l.bf16 %v10403_v30 }
0x1b3b   :  { %10606 = vpow2.f32 %v4844_v32 }
0x1b3c   :  { %v9973_v12 = vpack.c.bf16 %v10405_v34, %v10404_v36  ;;  %10608 = vpow2.f32 %v4846_v31 }
0x1b3d   :  { %v10408_v45 = vpop.permute.xlu1 %10407 }
0x1b3e   :  { %9974 = vmatprep.subr.bf16.mxu1 %v9973_v12  ;;  %v10410_v47 = vunpack.i.h.bf16 %v10408_v45  ;;  %v10409_v52 = vunpack.i.l.bf16 %v10408_v45  ;;  %v8579_v45 = vld [vmem:[%s12407_s10 + $0x90] sm:$0xff] }
0x1b40   :  { %v9983_v57 = vpack.c.bf16 %v10410_v47, %v10409_v52  ;;  %v8583_v47 = vld [vmem:[%s12407_s10 + $0xb0] sm:$0xff] }
0x1b45   :  { %v10607_v51 = vpop.eup %10606 }
0x1b46   :  { %v4848_v37 = vsel %vm69_vm0, %v10607_v51, 0.0  ;;  %v10609_v11 = vpop.eup %10608 }
0x1b47   :  { %4849 = vadd.xlane.f32.xlu0 %v4848_v37  ;;  %v4851_v39 = vsel %vm69_vm0, %v10609_v11, 0.0 }
0x1b4b   :  { %4852 = vadd.xlane.f32.xlu0 %v4851_v39  ;;  %v8578_v39 = vld [vmem:[%s12407_s10 + $0x88] sm:$0xff] }
0x1bd4   :  { %v4850_v40 = vpop.xlane.xlu0 %4849 }
0x1bd5   :  { %10610 = vrcp.f32 %v4850_v40  ;;  %v8580_v40 = vld [vmem:[%s12407_s10 + $0x98] sm:$0xff] }
0x1bd8   :  { %v4853_v42 = vpop.xlane.xlu0 %4852 }
0x1bd9   :  { %10612 = vrcp.f32 %v4853_v42  ;;  %v9987_v42 = vpack.c.bf16 %v8580_v40, %v8578_v39  ;;  %v8605_v39 = vld [vmem:[%s12409_s12 + $0x158] sm:$0xff]  ;;  %v8622_v40 = vld [vmem:[%s12409_s12 + $0x1e0] sm:$0xff] }
0x1bdb   :  { %9988 = vmatprep.subr.bf16.mxu0 %v9987_v42  ;;  %v8623_v42 = vld [vmem:[%s12409_s12 + $0x1e8] sm:$0xff] }
0x1bdf   :  { %v10611_v44 = vpop.eup %10610 }
0x1be0   :  { %v4855_v49 = vmul.f32 %v10611_v44, %v10607_v51  ;;  %v8577_v44 = vld [vmem:[%s12407_s10 + $0x80] sm:$0xff] }
0x1be2   :  { %v9521_v43 = vpop.f32.mrb[38].mxu1 }
0x1be3   :  { %v4653_v46 = vpop.f32.mrb[39].mxu1  ;;  %v10613_v48 = vpop.eup %10612 }
0x1be4   :  { %9524 = vmatprep.mubr.msk.f32.mxu1 %vm334_vm2, %v4653_v46  ;;  %v4857_v53 = vmul.f32 %v10613_v48, %v10609_v11  ;;  %v8582_v46 = vld [vmem:[%s12407_s10 + $0xa8] sm:$0xff]  ;;  %v8584_v48 = vld [vmem:[%s12407_s10 + $0xb8] sm:$0xff] }
0x1be5   :  { %9525 = vmatmul.mubr.msk.f32.vlgmr.msra.gmra.mrb[28].mxu1 %vm334_vm2, %v9521_v43  ;;  %v9552_v54 = vpop.f32.mrb[40].mxu0  ;;  %v9989_v43 = vpack.c.bf16 %v8579_v45, %v8577_v44  ;;  %v10027_v45 = vpack.c.bf16 %v8623_v42, %v8622_v40 }
0x1be6   :  { %9976 = vmatpush3.bf16.msra.mxu1 %v9973_v12  ;;  %9538 = vmatprep.mubr.msk.f32.mxu1 %vm69_vm0, %v4855_v49  ;;  %v5110_v55 = vpop.f32.mrb[41].mxu0  ;;  %v5116_v59 = vadd.f32 %v11469_v25, %v9552_v54  ;;  %v9991_v49 = vpack.c.bf16 %v8584_v48, %v8582_v46  ;;  %v8586_v54 = vld [vmem:[%s12407_s10 + $0xc8] sm:$0xff] }
0x1be7   :  { %v5111_v56 = vadd.f32 %v11463_v23, %v5110_v55  ;;  %9541 = vmatprep.subr.mxu1 %v8572_v50  ;;  %9990 = vmatpush1.bf16.msra.mxu0 %v9989_v43  ;;  %v8588_v55 = vld [vmem:[%s12407_s10 + $0xd8] sm:$0xff] }
0x1be8   :  { %v5122_v6 = vsel %vm69_vm0, %v5116_v59, -inf  ;;  %9992 = vmatprep.subr.bf16.mxu0 %v9991_v49 }
0x1be9   :  { %9539 = vmatmul.mubr.msk.f32.vlgmr.msra.gmra.mrb[40].mxu1 %vm69_vm0, %v4857_v53  ;;  %v5119_v60 = vsel %vm69_vm0, %v5111_v56, -inf  ;;  %v9995_v53 = vpack.c.bf16 %v8588_v55, %v8586_v54  ;;  %v8696_v54 = vld [vmem:[%s12405_s8 + $0x1] ss:$0 sm:$0xff] }
0x1bea   :  { %9542 = vmatpush3.msra.mxu1 %v8572_v50  ;;  %5120 = vmax.xlane.f32.xlu0 %v5119_v60  ;;  %v8581_v50 = vld [vmem:[%s12407_s10 + $0xa0] sm:$0xff]  ;;  %v8590_v60 = vld [vmem:[%s12407_s10 + $0xe8] sm:$0xff] }
0x1beb   :  { %9984 = vmatprep.subr.bf16.mxu1 %v9983_v57  ;;  %v9993_v52 = vpack.c.bf16 %v8583_v47, %v8581_v50 }
0x1bed   :  { %9994 = vmatpush1.bf16.msra.mxu0 %v9993_v52 }
0x1bee   :  { %5123 = vmax.xlane.f32.xlu0 %v5122_v6  ;;  %9996 = vmatprep.subr.bf16.mxu0 %v9995_v53  ;;  %v8592_v6 = vld [vmem:[%s12407_s10 + $0xf8] sm:$0xff]  ;;  %v8697_v53 = vld [vmem:[%s12406_s9 + $0x1] ss:$0 sm:$0xff] }
0x1c77   :  { %v5121_v62 = vpop.xlane.xlu0 %5120 }
0x1c78   :  { %v5125_v10 = vsub.f32 %v5111_v56, %v5121_v62  ;;  %v8585_v56 = vld [vmem:[%s12407_s10 + $0xc0] sm:$0xff] }
0x1c79   :  { %v8589_v62 = vld [vmem:[%s12407_s10 + $0xe0] sm:$0xff] }
0x1c7a   :  { %v5127_v63 = vmul.f32 1.442695, %v5125_v10  ;;  %v9999_v10 = vpack.c.bf16 %v8592_v6, %v8590_v60 }
0x1c7b   :  { %v5124_v3 = vpop.xlane.xlu0 %5123 }
0x1c7c   :  { %10614 = vpow2.f32 %v5127_v63  ;;  %v5126_v23 = vsub.f32 %v5116_v59, %v5124_v3  ;;  %v8591_v63 = vld [vmem:[%s12407_s10 + $0xf0] sm:$0xff] }
0x1c7d   :  { %v10001_v3 = vpack.c.bf16 %v8591_v63, %v8589_v62 }
0x1c7e   :  { %v5129_v4 = vmul.f32 1.442695, %v5126_v23  ;;  %v8610_v23 = vld [vmem:[%s12409_s12 + $0x180] sm:$0xff] }
0x1c80   :  { %10616 = vpow2.f32 %v5129_v4  ;;  %v8611_v4 = vld [vmem:[%s12409_s12 + $0x188] sm:$0xff] }
0x1c86   :  { %v10615_v5 = vpop.eup %10614 }
0x1c87   :  { %v5131_v25 = vsel %vm69_vm0, %v10615_v5, 0.0 }
0x1c88   :  { %5132 = vadd.xlane.f32.xlu0 %v5131_v25  ;;  %v10003_v25 = vpack.c.bf16 %v8611_v4, %v8610_v23  ;;  %v8608_v4 = vld [vmem:[%s12409_s12 + $0x170] sm:$0xff] }
0x1c8a   :  { %v10617_v7 = vpop.eup %10616 }
0x1c8b   :  { %v5134_v8 = vsel %vm69_vm0, %v10617_v7, 0.0 }
0x1c8c   :  { %5135 = vadd.xlane.f32.xlu0 %v5134_v8  ;;  %v8612_v8 = vld [vmem:[%s12409_s12 + $0x190] sm:$0xff] }
0x1cbc   :  { %v9540_v9 = vpop.f32.mrb[40].mxu1 }
0x1cbd   :  { %v4936_v13 = vpop.f32.mrb[41].mxu1 }
0x1cbe   :  { %9543 = vmatprep.mubr.msk.f32.mxu1 %vm334_vm2, %v4936_v13 }
0x1cbf   :  { %9544 = vmatmul.mubr.msk.f32.vlgmr.msra.gmra.mrb[28].mxu1 %vm334_vm2, %v9540_v9  ;;  %v8613_v9 = vld [vmem:[%s12409_s12 + $0x198] sm:$0xff] }
0x1cc0   :  { %9986 = vmatpush3.bf16.msra.mxu1 %v9983_v57  ;;  %v8587_v57 = vld [vmem:[%s12407_s10 + $0xd0] sm:$0xff] }
0x1cc1   :  { %9560 = vmatprep.subr.mxu1 %v8573_v19  ;;  %v9997_v59 = vpack.c.bf16 %v8587_v57, %v8585_v56 }
0x1cc3   :  { %9998 = vmatpush1.bf16.msra.mxu0 %v9997_v59 }
0x1cc4   :  { %10000 = vmatprep.subr.bf16.mxu0 %v9999_v10  ;;  %v8607_v10 = vld [vmem:[%s12409_s12 + $0x168] sm:$0xff] }
0x1cc7   :  { %10002 = vmatpush1.bf16.msra.mxu0 %v10001_v3  ;;  %v8625_v3 = vld [vmem:[%s12409_s12 + $0x1f8] sm:$0xff] }
0x1d15   :  { %v5133_v35 = vpop.xlane.xlu0 %5132 }
0x1d16   :  { %10618 = vrcp.f32 %v5133_v35  ;;  %v10007_v35 = vpack.c.bf16 %v8613_v9, %v8612_v8 }
0x1d19   :  { %v5136_v14 = vpop.xlane.xlu0 %5135 }
0x1d1a   :  { %10620 = vrcp.f32 %v5136_v14  ;;  %v8596_v14 = vld [vmem:[%s12409_s12 + $0x110] sm:$0xff] }
0x1d20   :  { %v10619_v33 = vpop.eup %10618 }
0x1d21   :  { %v5138_v15 = vmul.f32 %v10619_v33, %v10615_v5  ;;  %v8594_v5 = vld [vmem:[%s12409_s12 + $0x100] sm:$0xff]  ;;  %v8597_v33 = vld [vmem:[%s12409_s12 + $0x118] sm:$0xff] }
0x1d23   :  { %9557 = vmatprep.mubr.msk.f32.mxu1 %vm69_vm0, %v5138_v15  ;;  %v8614_v15 = vld [vmem:[%s12409_s12 + $0x1a0] sm:$0xff] }
0x1d24   :  { %v10621_v17 = vpop.eup %10620 }
0x1d25   :  { %v5140_v18 = vmul.f32 %v10621_v17, %v10617_v7  ;;  %v8595_v7 = vld [vmem:[%s12409_s12 + $0x108] sm:$0xff] }
0x1d26   :  { %v10005_v13 = vpack.c.bf16 %v8595_v7, %v8594_v5  ;;  %v8615_v17 = vld [vmem:[%s12409_s12 + $0x1a8] sm:$0xff]  ;;  %v8609_v5 = vld [vmem:[%s12409_s12 + $0x178] sm:$0xff]  ;;  %v8593_v7 = vld [vmem:[%s12408_s11 + $0x2] sm:$0x3] }
0x1d27   :  { %9558 = vmatmul.mubr.msk.f32.vlgmr.msra.gmra.mrb[42].mxu1 %vm69_vm0, %v5140_v18  ;;  %v10009_v18 = vpack.c.bf16 %v8597_v33, %v8596_v14  ;;  %v5359_v8 = vrot.slane %v8593_v7, %v10927_v38  ;;  %v5363_v9 = vrot.slane %v8593_v7, %v10933_v41  ;;  %v8717_v7 = vld [vmem:[%s12401_s4 + $0x170] sm:$0xff] }
0x1d28   :  { %9561 = vmatpush3.msra.mxu1 %v8573_v19  ;;  %v10011_v19 = vpack.c.bf16 %v8615_v17, %v8614_v15 }
0x1d29   :  { %10004 = vmatprep.subr.bf16.mxu1 %v10003_v25  ;;  %v10033_v25 = vpack.c.bf16 %v8609_v5, %v8608_v4  ;;  %v8718_v4 = vld [vmem:[%s12401_s4 + $0x178] sm:$0xff] }
0x1dfa   :  { %v9559_v20 = vpop.f32.mrb[42].mxu1 }
0x1dfb   :  { %v5219_v21 = vpop.f32.mrb[43].mxu1 }
0x1dfc   :  { %9562 = vmatprep.mubr.msk.f32.mxu1 %vm334_vm2, %v5219_v21  ;;  %v8599_v21 = vld [vmem:[%s12409_s12 + $0x128] sm:$0xff] }
0x1dfd   :  { %9563 = vmatmul.mubr.msk.f32.vlgmr.msra.gmra.mrb[28].mxu1 %vm334_vm2, %v9559_v20  ;;  %v8598_v20 = vld [vmem:[%s12409_s12 + $0x120] sm:$0xff] }
0x1dfe   :  { %10006 = vmatpush3.bf16.msra.mxu1 %v10005_v13 }
0x1dff   :  { %10008 = vmatprep.subr.bf16.mxu1 %v10007_v35 }
0x1e02   :  { %10010 = vmatpush3.bf16.msra.mxu1 %v10009_v18 }
0x1e03   :  { %10012 = vmatprep.subr.bf16.mxu1 %v10011_v19 }
0x1ed0   :  { %v9564_v16 = vpop.f32.mrb[28].mxu1 }
0x1ed1   :  { %v10196_v24 = vadd.f32 %v9564_v16, %v8639_v22  ;;  %v5300_v26 = vpop.f32.mrb[29].mxu1  ;;  %v8617_v16 = vld [vmem:[%s12409_s12 + $0x1b8] sm:$0xff] }
0x1ed2   :  { %v10197_v2 = vadd.f32 %v8639_v22, %v5300_v26  ;;  %v8616_v22 = vld [vmem:[%s12409_s12 + $0x1b0] sm:$0xff] }
0x1ed3   :  { %v5312_v27 = vadd.f32 %v10196_v24, %v11423_v0  ;;  %v10013_v24 = vpack.c.bf16 %v8599_v21, %v8598_v20  ;;  %v10015_v26 = vpack.c.bf16 %v8617_v16, %v8616_v22 }
0x1ed4   :  { %v5311_v1 = vadd.f32 %v10197_v2, %v11418_v61  ;;  %v8600_v2 = vld [vmem:[%s12409_s12 + $0x130] sm:$0xff] }
0x1ed5   :  { %v5316_v28 = vsel %vm244_vm1, %v5312_v27, 0.0  ;;  %10014 = vmatpush3.bf16.msra.mxu1 %v10013_v24 }
0x1ed6   :  { %5317 = vadd.xlane.f32.xlu1 %v5316_v28  ;;  %v5313_v30 = vsel %vm244_vm1, %v5311_v1, 0.0  ;;  %v8619_v28 = vld [vmem:[%s12409_s12 + $0x1c8] sm:$0xff]  ;;  %10016 = vmatprep.subr.bf16.mxu1 %v10015_v26  ;;  %v8700_v26 = vld [vmem:[%s12410_s13 + $0x1] ss:$0 sm:$0xff] }
0x1ed7   :  { %5314 = vadd.xlane.f32.xlu0 %v5313_v30 }
0x1f63   :  { %v5318_v31 = vpop.xlane.xlu1 %5317 }
0x1f64   :  { %v5320_v32 = vmul.f32 0.015625, %v5318_v31  ;;  %v5315_v34 = vpop.xlane.xlu0 %5314 }
0x1f65   :  { %v5319_v36 = vmul.f32 0.015625, %v5315_v34  ;;  %v8603_v34 = vld [vmem:[%s12409_s12 + $0x148] sm:$0xff] }
0x1f66   :  { %v11676_v12 = vsub.f32 %v5312_v27, %v5320_v32  ;;  %v8601_v27 = vld [vmem:[%s12409_s12 + $0x138] sm:$0xff]  ;;  %v8602_v32 = vld [vmem:[%s12409_s12 + $0x140] sm:$0xff] }
0x1f67   :  { %v11678_v51 = vsub.f32 %v5311_v1, %v5319_v36  ;;  %v8618_v1 = vld [vmem:[%s12409_s12 + $0x1c0] sm:$0xff]  ;;  %v10017_v30 = vpack.c.bf16 %v8601_v27, %v8600_v2  ;;  %v8620_v36 = vld [vmem:[%s12409_s12 + $0x1d0] sm:$0xff] }
0x1f68   :  { %v5324_v61 = vmul.f32 %v11676_v12, %v11676_v12  ;;  %v10019_v31 = vpack.c.bf16 %v8619_v28, %v8618_v1 }
0x1f69   :  { %v5323_v37 = vmul.f32 %v11678_v51, %v11678_v51  ;;  %10018 = vmatpush3.bf16.msra.mxu1 %v10017_v30 }
0x1f6a   :  { %v5328_v11 = vsel %vm244_vm1, %v5324_v61, 0.0  ;;  %10020 = vmatprep.subr.bf16.mxu1 %v10019_v31 }
0x1f6b   :  { %v5325_v0 = vsel %vm244_vm1, %v5323_v37, 0.0  ;;  %v8621_v37 = vld [vmem:[%s12409_s12 + $0x1d8] sm:$0xff] }
0x1f6c   :  { %5326 = vadd.xlane.f32.xlu0 %v5325_v0  ;;  %v10021_v0 = vpack.c.bf16 %v8603_v34, %v8602_v32  ;;  %v10023_v61 = vpack.c.bf16 %v8621_v37, %v8620_v36 }
0x1f6e   :  { %10022 = vmatpush3.bf16.msra.mxu1 %v10021_v0 }
0x1f6f   :  { %10024 = vmatprep.subr.bf16.mxu1 %v10023_v61 }
0x1f70   :  { %5329 = vadd.xlane.f32.xlu0 %v5328_v11  ;;  %v8604_v11 = vld [vmem:[%s12409_s12 + $0x150] sm:$0xff] }
0x1f71   :  { %v10025_v44 = vpack.c.bf16 %v8605_v39, %v8604_v11 }
0x1f73   :  { %10026 = vmatpush3.bf16.msra.mxu1 %v10025_v44 }
0x1f74   :  { %10028 = vmatprep.subr.bf16.mxu1 %v10027_v45 }
0x1ff9   :  { %v5327_v43 = vpop.xlane.xlu0 %5326 }
0x1ffa   :  { %v5331_v46 = vmul.f32 0.015625, %v5327_v43 }
0x1ffc   :  { %v5333_v48 = vadd.f32 1e-05, %v5331_v46 }
0x1ffd   :  { %v5330_v49 = vpop.xlane.xlu0 %5329 }
0x1ffe   :  { %10622 = vrsqrt.f32 %v5333_v48  ;;  %v5332_v50 = vmul.f32 0.015625, %v5330_v49  ;;  %v8704_v49 = vld [vmem:[%s12401_s4 + $0x108] sm:$0xff] }
0x2000   :  { %v5334_v47 = vadd.f32 1e-05, %v5332_v50  ;;  %v8706_v50 = vld [vmem:[%s12401_s4 + $0x118] sm:$0xff] }
0x2002   :  { %10624 = vrsqrt.f32 %v5334_v47  ;;  %v10035_v47 = vpack.c.bf16 %v8706_v50, %v8704_v49  ;;  %v11945_v49 = vld [vmem:[%s12471_s3] sm:$0xff] }
0x2004   :  { %10036 = vmatprep.subr.bf16.mxu0 %v10035_v47  ;;  %v11951_v47 = vld [vmem:[%s12471_s3 + $0x8] sm:$0xff]  ;;  %s12486_s3 = smov 48  }
0x2008   :  { %v10623_v52 = vpop.eup %10622 }
0x2009   :  { %v5337_v55 = vmul.f32 %v10623_v52, %v11678_v51  ;;  %v8606_v51 = vld [vmem:[%s12409_s12 + $0x160] sm:$0xff] }
0x200a   :  { %v10029_v63 = vpack.c.bf16 %v8607_v10, %v8606_v51  ;;  %v8703_v52 = vld [vmem:[%s12401_s4 + $0x100] sm:$0xff]  ;;  %v8714_v51 = vld [vmem:[%s12401_s4 + $0x158] sm:$0xff] }
0x200b   :  { %v5345_v56 = vmul.f32 %v8696_v54, %v5337_v55 }
0x200c   :  { %v10625_v57 = vpop.eup %10624  ;;  %10030 = vmatpush3.bf16.msra.mxu1 %v10029_v63  ;;  %v8711_v63 = vld [vmem:[%s12401_s4 + $0x140] sm:$0xff] }
0x200d   :  { %v5353_v59 = vadd.f32 %v8697_v53, %v5345_v56  ;;  %v5338_v60 = vmul.f32 %v10625_v57, %v11676_v12  ;;  %v8624_v12 = vld [vmem:[%s12409_s12 + $0x1f0] sm:$0xff]  ;;  %v8710_v56 = vld [vmem:[%s12401_s4 + $0x138] sm:$0xff] }
0x200e   :  { %v10031_v23 = vpack.c.bf16 %v8625_v3, %v8624_v12  ;;  %v8713_v12 = vld [vmem:[%s12401_s4 + $0x150] sm:$0xff] }
0x200f   :  { %8698 = vmatmul.mubr.msk.f32.vlgmr.msra.gmra.mrb[42].mxu0 %vm244_vm1, %v5353_v59  ;;  %v5346_v6 = vmul.f32 %v8696_v54, %v5338_v60  ;;  %v8705_v54 = vld [vmem:[%s12401_s4 + $0x110] sm:$0xff]  ;;  %v10045_v3 = vpack.c.bf16 %v8713_v12, %v8711_v63 }
0x2010   :  { %5442 = vmatprep.mubr.f32.mxu0 %v10730_v29  ;;  %10032 = vmatprep.subr.bf16.mxu1 %v10031_v23  ;;  %v10037_v55 = vpack.c.bf16 %v8705_v54, %v8703_v52  ;;  %v8709_v60 = vld [vmem:[%s12401_s4 + $0x130] sm:$0xff]  ;;  %v8716_v23 = vld [vmem:[%s12401_s4 + $0x168] sm:$0xff] }
0x2011   :  { %v5354_v62 = vadd.f32 %v8697_v53, %v5346_v6  ;;  %10034 = vmatpush3.bf16.msra.mxu1 %v10033_v25  ;;  %v8708_v53 = vld [vmem:[%s12401_s4 + $0x128] sm:$0xff]  ;;  %v10047_v5 = vpack.c.bf16 %v8718_v4, %v8716_v23  ;;  %v8715_v25 = vld [vmem:[%s12401_s4 + $0x160] sm:$0xff] }
0x2012   :  { %10038 = vmatpush1.bf16.msra.mxu0 %v10037_v55  ;;  %v10039_v57 = vpack.c.bf16 %v8710_v56, %v8708_v53 }
0x2013   :  { %8699 = vmatmul.mubr.msk.f32.gmra.mrb[44].mxu0 %vm244_vm1, %v5354_v62 }
0x2014   :  { %5751 = vmatprep.mubr.f32.mxu0 %v10730_v29  ;;  %10040 = vmatprep.subr.bf16.mxu0 %v10039_v57 }
0x20e2   :  { %v5438_v13 = vpop.f32.mrb[42].mxu0 }
0x20e3   :  { %v5439_v35 = vadd.f32 %v5438_v13, %v5359_v8  ;;  %v5440_v14 = vpop.f32.mrb[43].mxu0 }
0x20e4   :  { %v5441_v33 = vadd.f32 %v5440_v14, %v5363_v9 }
0x20e5   :  { %v5449_v18 = vmax.f32 %v5439_v35, 0.0 }
0x20e6   :  { %v5450_v15 = vmax.f32 %v5441_v33, 0.0  ;;  %v5444_v17 = vpop.f32.mrb[44].mxu0 }
0x20e7   :  { %v5445_v19 = vadd.f32 %v5444_v17, %v5359_v8  ;;  %v5446_v20 = vpop.f32.mrb[45].mxu0  ;;  %v10049_v8 = vpack.c.bf16 %v8717_v7, %v8715_v25 }
0x20e8   :  { %v5447_v21 = vadd.f32 %v5446_v20, %v5363_v9  ;;  %5523 = vmatprep.mubr.f32.mxu1 %v5450_v15  ;;  %v8702_v20 = vld [vmem:[%s12412_s15 + $0x1] ss:$0 sm:$0xff] }
0x20e9   :  { %5524 = vmatmul.mubr.f32.vlgmr.msra.gmra.mrb[44].mxu1 %v5449_v18  ;;  %v5451_v16 = vmax.f32 %v5445_v19, 0.0  ;;  %v8701_v18 = vld [vmem:[%s12411_s14 + $0x1] ss:$0 sm:$0xff] }
0x20ea   :  { %v5452_v22 = vmax.f32 %v5447_v21, 0.0 }
0x20ec   :  { %5528 = vmatprep.mubr.f32.mxu1 %v5452_v22 }
0x20ed   :  { %5529 = vmatmul.mubr.f32.gmra.mrb[46].mxu1 %v5451_v16 }
0x21bc   :  { %v9110_v24 = vpop.f32.mrb[44].mxu1 }
0x21bd   :  { %v9111_v2 = vpop.f32.mrb[45].mxu1 }
0x21be   :  { %v9112_v27 = vadd.f32 %v9111_v2, %v9110_v24 }
0x21c0   :  { %v5526_v1 = vadd.f32 %v9112_v27, %v8700_v26  ;;  %v9113_v28 = vpop.f32.mrb[46].mxu1  ;;  %v8719_v27 = vld [vmem:[%s12402_s5 + $0x4] sm:$0x3]  ;;  %s12484_s5 = smov 64  }
0x21c1   :  { %v9114_v30 = vpop.f32.mrb[47].mxu1 }
0x21c2   :  { %v9115_v31 = vadd.f32 %v9114_v30, %v9113_v28  ;;  %v5534_v32 = vadd.f32 %v5526_v1, %v5353_v59  ;;  %v8707_v59 = vld [vmem:[%s12401_s4 + $0x120] sm:$0xff]  ;;  %v5674_v1 = vrot.slane %v8719_v27, %v10927_v38 }
0x21c3   :  { %v10041_v6 = vpack.c.bf16 %v8709_v60, %v8707_v59 }
0x21c4   :  { %v5531_v34 = vadd.f32 %v9115_v31, %v8700_v26  ;;  %v5536_v36 = vsel %vm244_vm1, %v5534_v32, 0.0 }
0x21c5   :  { %5537 = vadd.xlane.f32.xlu0 %v5536_v36  ;;  %10042 = vmatpush1.bf16.msra.mxu0 %v10041_v6 }
0x21c6   :  { %v5535_v37 = vadd.f32 %v5531_v34, %v5354_v62  ;;  %v8712_v62 = vld [vmem:[%s12401_s4 + $0x148] sm:$0xff] }
0x21c7   :  { %v10043_v10 = vpack.c.bf16 %v8714_v51, %v8712_v62 }
0x21c8   :  { %v5539_v0 = vsel %vm244_vm1, %v5535_v37, 0.0 }
0x21c9   :  { %5540 = vadd.xlane.f32.xlu0 %v5539_v0  ;;  %10044 = vmatprep.subr.bf16.mxu0 %v10043_v10 }
0x21ca   :  { %10046 = vmatpush1.bf16.msra.mxu0 %v10045_v3 }
0x21cb   :  { %10048 = vmatprep.subr.bf16.mxu0 %v10047_v5 }
0x21ce   :  { %10050 = vmatpush1.bf16.msra.mxu0 %v10049_v8 }
0x2252   :  { %v5538_v61 = vpop.xlane.xlu0 %5537 }
0x2253   :  { %v5542_v11 = vmul.f32 0.015625, %v5538_v61 }
0x2255   :  { %v5544_v39 = vsub.f32 %v5534_v32, %v5542_v11  ;;  %v5678_v32 = vrot.slane %v8719_v27, %v10933_v41 }
0x2256   :  { %v5541_v40 = vpop.xlane.xlu0 %5540 }
0x2257   :  { %v5543_v42 = vmul.f32 0.015625, %v5541_v40  ;;  %v5546_v44 = vmul.f32 %v5544_v39, %v5544_v39 }
0x2259   :  { %v5545_v45 = vsub.f32 %v5535_v37, %v5543_v42  ;;  %v5548_v43 = vsel %vm244_vm1, %v5546_v44, 0.0 }
0x225a   :  { %5549 = vadd.xlane.f32.xlu0 %v5548_v43 }
0x225b   :  { %v5547_v46 = vmul.f32 %v5545_v45, %v5545_v45 }
0x225d   :  { %v5551_v48 = vsel %vm244_vm1, %v5547_v46, 0.0 }
0x225e   :  { %5552 = vadd.xlane.f32.xlu0 %v5551_v48 }
0x22e7   :  { %v5550_v9 = vpop.xlane.xlu0 %5549 }
0x22e8   :  { %v5554_v13 = vmul.f32 0.015625, %v5550_v9 }
0x22ea   :  { %v5556_v35 = vadd.f32 1e-05, %v5554_v13 }
0x22eb   :  { %v5553_v14 = vpop.xlane.xlu0 %5552 }
0x22ec   :  { %10626 = vrsqrt.f32 %v5556_v35  ;;  %v5555_v33 = vmul.f32 0.015625, %v5553_v14 }
0x22ee   :  { %v5557_v15 = vadd.f32 1e-05, %v5555_v33 }
0x22f0   :  { %10628 = vrsqrt.f32 %v5557_v15 }
0x22f6   :  { %v10627_v17 = vpop.eup %10626 }
0x22f7   :  { %v5560_v19 = vmul.f32 %v10627_v17, %v5544_v39 }
0x22f9   :  { %v5568_v21 = vmul.f32 %v8701_v18, %v5560_v19 }
0x22fa   :  { %v10629_v22 = vpop.eup %10628 }
0x22fb   :  { %v11908_v16 = vadd.f32 %v8702_v20, %v5568_v21  ;;  %v5561_v24 = vmul.f32 %v10629_v22, %v5545_v45  ;;  %v8720_v21 = vld [vmem:[%s12403_s6 + $0x80] sm:$0xff] }
0x22fd   :  { %8783 = vmatmul.mubr.msk.f32.vlgmr.msra.gmra.mrb[46].mxu0 %vm244_vm1, %v11908_v16  ;;  %v5569_v26 = vmul.f32 %v8701_v18, %v5561_v24 }
0x22fe   :  { %5757 = vmatprep.mubr.f32.mxu0 %v10730_v29 }
0x22ff   :  { %v11913_v2 = vadd.f32 %v8702_v20, %v5569_v26 }
0x2301   :  { %8784 = vmatmul.mubr.msk.f32.gmra.mrb[48].mxu0 %vm244_vm1, %v11913_v2 }
0x23d0   :  { %v5753_v28 = vpop.f32.mrb[46].mxu0 }
0x23d1   :  { %v11921_v30 = vadd.f32 %v5753_v28, %v5674_v1  ;;  %v5755_v31 = vpop.f32.mrb[47].mxu0 }
0x23d2   :  { %v5756_v0 = vadd.f32 %v5755_v31, %v5678_v32 }
0x23d3   :  { %9569 = vmatprep.mubr.msk.f32.mxu0 %vm334_vm2, %v11921_v30 }
0x23d4   :  { %v5759_v34 = vpop.f32.mrb[48].mxu0 }
0x23d5   :  { %v11926_v36 = vadd.f32 %v5759_v34, %v5674_v1  ;;  %v5761_v37 = vpop.f32.mrb[49].mxu0 }
0x23d6   :  { %v5762_v61 = vadd.f32 %v5761_v37, %v5678_v32 }
0x23d7   :  { %v11930_v11 = vpack.i.bf16 %v11926_v36, %v11921_v30 }
0x23d8   :  { %v10057_v39 = vpack.c.bf16 %v5762_v61, %v5756_v0  ;;  %v11932_v40 = vpack.i.bf16 %v5762_v61, %v5756_v0 }
0x23d9   :  { %10412 = vrot.lane.b32.xlu0 %v11930_v11, %s12484_s5 }
0x23da   :  { %10058 = vmatprep.subr.bf16.mxu1 %v10057_v39 }
0x23db   :  { %10060 = vmatpush3.bf16.msra.mxu1 %v10057_v39 }
0x244b   :  { %v10413_v42 = vpop.permute.xlu0 %10412 }
0x244c   :  { %v10415_v44 = vunpack.i.h.bf16 %v10413_v42  ;;  %v10414_v45 = vunpack.i.l.bf16 %v10413_v42 }
0x244e   :  { %v10051_v43 = vpack.c.bf16 %v10415_v44, %v10414_v45 }
0x2450   :  { %10053 = vmatprep.subr.msk.bf16.mxu0 %vm10959_vm3, %v10051_v43 }
0x2451   :  { %10056 = vmatpush3.bf16.xpose.msk.msra.mxu0 %vm10959_vm3, %v10051_v43 }
0x2452   :  { %9579 = vmatprep.subr.mxu0 %v8720_v21 }
0x2458   :  { %9570 = vmatmul.mubr.msk.f32.vlgmr.msra.gmra.mrb[50].mxu0 %vm334_vm2, %v11926_v36 }
0x2459   :  { %9580 = vmatpush3.msra.mxu0 %v8720_v21 }
0x252b   :  { %v9571_v46 = vpop.f32.mrb[50].mxu0 }
0x252c   :  { %v5844_v48 = vpop.f32.mrb[51].mxu0  ;;  %v5850_v52 = vadd.f32 %v11951_v47, %v9571_v46 }
0x252d   :  { %v5845_v50 = vadd.f32 %v11945_v49, %v5844_v48 }
0x252e   :  { %v5856_v55 = vsel %vm69_vm0, %v5850_v52, -inf }
0x252f   :  { %v5853_v54 = vsel %vm69_vm0, %v5845_v50, -inf }
0x2530   :  { %5854 = vmax.xlane.f32.xlu1 %v5853_v54 }
0x2534   :  { %5857 = vmax.xlane.f32.xlu1 %v5856_v55 }
0x2545   :  { %10417 = vrot.lane.b32.xlu1 %v11930_v11, %s12473_s26  ;;  %s12491_s26 = sld [smem:[#allocation10_spill]] }
0x2549   :  { %6045 = vrot.lane.b32.xlu1 %v11921_v30, %s12485_s17 }
0x25bd   :  { %v5855_v53 = vpop.xlane.xlu1 %5854 }
0x25be   :  { %v5859_v56 = vsub.f32 %v5845_v50, %v5855_v53 }
0x25c0   :  { %v5861_v57 = vmul.f32 1.442695, %v5859_v56 }
0x25c1   :  { %v5858_v59 = vpop.xlane.xlu1 %5857 }
0x25c2   :  { %10630 = vpow2.f32 %v5861_v57  ;;  %v5860_v60 = vsub.f32 %v5850_v52, %v5858_v59 }
0x25c4   :  { %v5863_v6 = vmul.f32 1.442695, %v5860_v60 }
0x25c5   :  { %v10418_v62 = vpop.permute.xlu1 %10417 }
0x25c6   :  { %10632 = vpow2.f32 %v5863_v6  ;;  %v10420_v51 = vunpack.i.h.bf16 %v10418_v62  ;;  %v10419_v10 = vunpack.i.l.bf16 %v10418_v62 }
0x25c8   :  { %v10061_v63 = vpack.c.bf16 %v10420_v51, %v10419_v10 }
0x25c9   :  { %v6046_v5 = vpop.permute.xlu1 %6045 }
0x25ca   :  { %10063 = vmatprep.subr.msk.bf16.mxu1 %vm10959_vm3, %v10061_v63 }
0x25cc   :  { %v10631_v12 = vpop.eup %10630 }
0x25cd   :  { %v5865_v3 = vsel %vm69_vm0, %v10631_v12, 0.0 }
0x25ce   :  { %5866 = vadd.xlane.f32.xlu1 %v5865_v3 }
0x25d0   :  { %v10633_v23 = vpop.eup %10632 }
0x25d1   :  { %v5868_v4 = vsel %vm69_vm0, %v10633_v23, 0.0 }
0x25d2   :  { %5869 = vadd.xlane.f32.xlu0 %v5868_v4 }
0x25df   :  { %6047 = vrot.lane.b32.xlu1 %v11926_v36, %s12485_s17 }
0x25e3   :  { %10422 = vrot.lane.b32.xlu1 %v11930_v11, %s12486_s3 }
0x25e7   :  { %6330 = vrot.lane.b32.xlu1 %v11921_v30, %s12472_s27 }
0x25e8   :  { %6332 = vrot.lane.b32.xlu0 %v11926_v36, %s12472_s27 }
0x265b   :  { %v5867_v25 = vpop.xlane.xlu1 %5866 }
0x265c   :  { %10634 = vrcp.f32 %v5867_v25 }
0x265f   :  { %v5870_v7 = vpop.xlane.xlu0 %5869  ;;  %v6048_v8 = vpop.permute.xlu1 %6047 }
0x2660   :  { %10636 = vrcp.f32 %v5870_v7 }
0x2663   :  { %v10423_v13 = vpop.permute.xlu1 %10422  ;;  %v6333_v20 = vpop.permute.xlu0 %6332 }
0x2664   :  { %v10425_v14 = vunpack.i.h.bf16 %v10423_v13  ;;  %v10424_v33 = vunpack.i.l.bf16 %v10423_v13 }
0x2666   :  { %v10635_v9 = vpop.eup %10634  ;;  %v10071_v18 = vpack.c.bf16 %v10425_v14, %v10424_v33 }
0x2667   :  { %v5872_v35 = vmul.f32 %v10635_v9, %v10631_v12  ;;  %v6331_v19 = vpop.permute.xlu1 %6330 }
0x2669   :  { %9576 = vmatprep.mubr.msk.f32.mxu1 %vm69_vm0, %v5872_v35 }
0x266a   :  { %v10637_v15 = vpop.eup %10636 }
0x266b   :  { %v5874_v17 = vmul.f32 %v10637_v15, %v10633_v23 }
0x266d   :  { %9577 = vmatmul.mubr.msk.f32.vlgmr.msra.gmra.mrb[48].mxu1 %vm69_vm0, %v5874_v17 }
0x266e   :  { %10066 = vmatpush3.bf16.xpose.msk.msra.mxu1 %vm10959_vm3, %v10061_v63  ;;  %9588 = vmatprep.mubr.msk.f32.mxu1 %vm334_vm2, %v6046_v5 }
0x266f   :  { %10073 = vmatprep.subr.msk.bf16.mxu1 %vm10959_vm3, %v10071_v18 }
0x2675   :  { %9589 = vmatmul.mubr.msk.f32.vlgmr.msra.gmra.mrb[50].mxu1 %vm334_vm2, %v6048_v8 }
0x2676   :  { %10076 = vmatpush3.bf16.xpose.msk.msra.mxu1 %vm10959_vm3, %v10071_v18  ;;  %9607 = vmatprep.mubr.msk.f32.mxu1 %vm334_vm2, %v6331_v19 }
0x267d   :  { %9608 = vmatmul.mubr.msk.f32.vlgmr.msra.gmra.mrb[52].mxu1 %vm334_vm2, %v6333_v20 }
0x2740   :  { %v9578_v22 = vpop.f32.mrb[48].mxu1 }
0x2741   :  { %v5947_v24 = vpop.f32.mrb[49].mxu1 }
0x2742   :  { %9581 = vmatprep.mubr.msk.f32.mxu0 %vm334_vm2, %v5947_v24 }
0x2743   :  { %9582 = vmatmul.mubr.msk.f32.vlgmr.msra.gmra.mrb[52].mxu0 %vm334_vm2, %v9578_v22 }
0x2748   :  { %v9590_v26 = vpop.f32.mrb[50].mxu1 }
0x2749   :  { %v6133_v27 = vadd.f32 %v11951_v47, %v9590_v26  ;;  %v6127_v1 = vpop.f32.mrb[51].mxu1 }
0x274a   :  { %v6128_v28 = vadd.f32 %v11945_v49, %v6127_v1  ;;  %v8721_v1 = vld [vmem:[%s12403_s6 + $0x88] sm:$0xff] }
0x274b   :  { %v6139_v31 = vsel %vm69_vm0, %v6133_v27, -inf }
0x274c   :  { %6140 = vmax.xlane.f32.xlu0 %v6139_v31  ;;  %v6136_v32 = vsel %vm69_vm0, %v6128_v28, -inf }
0x274d   :  { %6137 = vmax.xlane.f32.xlu1 %v6136_v32 }
0x2750   :  { %v9609_v34 = vpop.f32.mrb[52].mxu1 }
0x2751   :  { %v6412_v37 = vpop.f32.mrb[53].mxu1  ;;  %v6418_v0 = vadd.f32 %v11951_v47, %v9609_v34 }
0x2752   :  { %v6413_v62 = vadd.f32 %v11945_v49, %v6412_v37 }
0x2753   :  { %v6424_v61 = vsel %vm69_vm0, %v6418_v0, -inf }
0x2754   :  { %v6421_v51 = vsel %vm69_vm0, %v6413_v62, -inf }
0x2762   :  { %10432 = vrot.lane.b32.xlu0 %v11930_v11, %s12476_s0  ;;  %s10748_s0 = smov [#allocation2]  }
0x2781   :  { %6425 = vmax.xlane.f32.xlu0 %v6424_v61 }
0x27d9   :  { %v6141_v39 = vpop.xlane.xlu0 %6140 }
0x27da   :  { %v6143_v42 = vsub.f32 %v6133_v27, %v6141_v39  ;;  %v6138_v44 = vpop.xlane.xlu1 %6137 }
0x27db   :  { %v6142_v45 = vsub.f32 %v6128_v28, %v6138_v44 }
0x27dc   :  { %v6146_v43 = vmul.f32 1.442695, %v6143_v42 }
0x27dd   :  { %v6144_v46 = vmul.f32 1.442695, %v6142_v45  ;;  %v10433_v48 = vpop.permute.xlu0 %10432 }
0x27de   :  { %10638 = vpow2.f32 %v6146_v43  ;;  %v10435_v50 = vunpack.i.h.bf16 %v10433_v48  ;;  %v10434_v52 = vunpack.i.l.bf16 %v10433_v48 }
0x27df   :  { %10640 = vpow2.f32 %v6144_v46 }
0x27e0   :  { %v10081_v54 = vpack.c.bf16 %v10435_v50, %v10434_v52 }
0x27e2   :  { %10083 = vmatprep.subr.msk.bf16.mxu1 %vm10959_vm3, %v10081_v54 }
0x27e3   :  { %10086 = vmatpush3.bf16.xpose.msk.msra.mxu1 %vm10959_vm3, %v10081_v54 }
0x27e8   :  { %v10639_v55 = vpop.eup %10638 }
0x27e9   :  { %v6151_v53 = vsel %vm69_vm0, %v10639_v55, 0.0  ;;  %v10641_v56 = vpop.eup %10640 }
0x27ea   :  { %6152 = vadd.xlane.f32.xlu1 %v6151_v53  ;;  %v6148_v57 = vsel %vm69_vm0, %v10641_v56, 0.0  ;;  %v8722_v53 = vld [vmem:[%s12403_s6 + $0x90] sm:$0xff] }
0x27ee   :  { %6149 = vadd.xlane.f32.xlu1 %v6148_v57 }
0x27ff   :  { %10427 = vrot.lane.b32.xlu1 %v11932_v40, %s12485_s17  ;;  %s12490_s17 = sld [smem:[#allocation9_spill]] }
0x2803   :  { %6613 = vrot.lane.b32.xlu1 %v11921_v30, %s12474_s25 }
0x2807   :  { %6615 = vrot.lane.b32.xlu1 %v11926_v36, %s12474_s25 }
0x280e   :  { %v6426_v59 = vpop.xlane.xlu0 %6425 }
0x280f   :  { %v6428_v60 = vsub.f32 %v6418_v0, %v6426_v59 }
0x2811   :  { %v6431_v6 = vmul.f32 1.442695, %v6428_v60 }
0x2813   :  { %10642 = vpow2.f32 %v6431_v6 }
0x281d   :  { %v12011_v10 = vpop.eup %10642 }
0x281e   :  { %v6436_v63 = vsel %vm69_vm0, %v12011_v10, 0.0 }
0x282b   :  { %6422 = vmax.xlane.f32.xlu1 %v6421_v51 }
0x282f   :  { %6437 = vadd.xlane.f32.xlu1 %v6436_v63 }
0x2840   :  { %10442 = vrot.lane.b32.xlu1 %v11930_v11, %s12477_s24  ;;  %s8465_s24 = sshll.u32 %s10748_s0, 4  ;;  %s8466_s24 = int_to_ptr.vmem [resolvable:$true] %s8465_s24 }
0x2841   :  { %p10711_p1 = scmp.lt.s32.totalorder %s8466_s24, %s8466_s24 }
0x2844   :  { %6896 = vrot.lane.b32.xlu1 %v11921_v30, %s12475_s29 }
0x2877   :  { %v6153_v12 = vpop.xlane.xlu1 %6152 }
0x2878   :  { %10644 = vrcp.f32 %v6153_v12 }
0x287b   :  { %v6150_v3 = vpop.xlane.xlu1 %6149 }
0x287c   :  { %10646 = vrcp.f32 %v6150_v3 }
0x287f   :  { %v10428_v23 = vpop.permute.xlu1 %10427 }
0x2880   :  { %v10430_v4 = vunpack.i.h.bf16 %v10428_v23  ;;  %v10429_v5 = vunpack.i.l.bf16 %v10428_v23 }
0x2882   :  { %v10067_v25 = vpack.c.bf16 %v10430_v4, %v10429_v5  ;;  %v10645_v8 = vpop.eup %10644 }
0x2883   :  { %v6614_v7 = vpop.permute.xlu1 %6613  ;;  %v6157_v14 = vmul.f32 %v10645_v8, %v10639_v55 }
0x2884   :  { %10068 = vmatprep.subr.bf16.mxu0 %v10067_v25  ;;  %9626 = vmatprep.mubr.msk.f32.mxu1 %vm334_vm2, %v6614_v7 }
0x2885   :  { %10070 = vmatpush3.bf16.msra.mxu0 %v10067_v25 }
0x2886   :  { %v10647_v9 = vpop.eup %10646  ;;  %9598 = vmatprep.subr.mxu0 %v8721_v1 }
0x2887   :  { %v6616_v13 = vpop.permute.xlu1 %6615  ;;  %v6155_v35 = vmul.f32 %v10647_v9, %v10641_v56 }
0x2888   :  { %9627 = vmatmul.mubr.msk.f32.vlgmr.msra.gmra.mrb[54].mxu1 %vm334_vm2, %v6616_v13 }
0x2889   :  { %9595 = vmatprep.mubr.msk.f32.mxu0 %vm69_vm0, %v6155_v35 }
0x288a   :  { %9596 = vmatmul.mubr.msk.f32.vlgmr.msra.gmra.mrb[54].mxu0 %vm69_vm0, %v6157_v14 }
0x288b   :  { %9599 = vmatpush3.msra.mxu0 %v8721_v1 }
0x28b8   :  { %v6423_v33 = vpop.xlane.xlu1 %6422 }
0x28b9   :  { %v6427_v15 = vsub.f32 %v6413_v62, %v6423_v33 }
0x28bb   :  { %v6429_v17 = vmul.f32 1.442695, %v6427_v15 }
0x28bc   :  { %v6438_v18 = vpop.xlane.xlu1 %6437 }
0x28bd   :  { %10648 = vpow2.f32 %v6429_v17 }
0x28be   :  { %10650 = vrcp.f32 %v6438_v18 }
0x28c0   :  { %v10443_v19 = vpop.permute.xlu1 %10442 }
0x28c1   :  { %v10445_v20 = vunpack.i.h.bf16 %v10443_v19  ;;  %v10444_v21 = vunpack.i.l.bf16 %v10443_v19 }
0x28c3   :  { %v10091_v22 = vpack.c.bf16 %v10445_v20, %v10444_v21 }
0x28c4   :  { %v6897_v24 = vpop.permute.xlu1 %6896 }
0x28c5   :  { %10093 = vmatprep.subr.msk.bf16.mxu1 %vm10959_vm3, %v10091_v22  ;;  %9645 = vmatprep.mubr.msk.f32.mxu1 %vm334_vm2, %v6897_v24 }
0x28c6   :  { %10096 = vmatpush3.bf16.xpose.msk.msra.mxu1 %vm10959_vm3, %v10091_v22 }
0x28c7   :  { %v10649_v26 = vpop.eup %10648 }
0x28c8   :  { %v6433_v27 = vsel %vm69_vm0, %v10649_v26, 0.0  ;;  %v10651_v50 = vpop.eup %10650 }
0x28c9   :  { %6434 = vadd.xlane.f32.xlu0 %v6433_v27  ;;  %v6442_v55 = vmul.f32 %v10651_v50, %v12011_v10 }
0x28df   :  { %10437 = vrot.lane.b32.xlu0 %v11932_v40, %s12472_s27 }
0x28e3   :  { %6898 = vrot.lane.b32.xlu0 %v11926_v36, %s12475_s29 }
0x2956   :  { %v6435_v28 = vpop.xlane.xlu0 %6434 }
0x2957   :  { %10652 = vrcp.f32 %v6435_v28 }
0x295a   :  { %v10438_v31 = vpop.permute.xlu0 %10437 }
0x295b   :  { %v10440_v32 = vunpack.i.h.bf16 %v10438_v31  ;;  %v10439_v34 = vunpack.i.l.bf16 %v10438_v31  ;;  %v9628_v37 = vpop.f32.mrb[54].mxu1 }
0x295c   :  { %v6701_v0 = vadd.f32 %v11951_v47, %v9628_v37  ;;  %v6695_v61 = vpop.f32.mrb[55].mxu1 }
0x295d   :  { %v10077_v39 = vpack.c.bf16 %v10440_v32, %v10439_v34  ;;  %v6696_v42 = vadd.f32 %v11945_v49, %v6695_v61  ;;  %v9597_v44 = vpop.f32.mrb[54].mxu0 }
0x295e   :  { %v6899_v45 = vpop.permute.xlu0 %6898  ;;  %v6238_v43 = vpop.f32.mrb[55].mxu0  ;;  %v6707_v46 = vsel %vm69_vm0, %v6701_v0, -inf }
0x295f   :  { %6708 = vmax.xlane.f32.xlu0 %v6707_v46  ;;  %9600 = vmatprep.mubr.msk.f32.mxu0 %vm334_vm2, %v6238_v43  ;;  %v6704_v48 = vsel %vm69_vm0, %v6696_v42, -inf  ;;  %v8723_v43 = vld [vmem:[%s12403_s6 + $0x98] sm:$0xff] }
0x2960   :  { %10078 = vmatprep.subr.bf16.mxu0 %v10077_v39  ;;  %9646 = vmatmul.mubr.msk.f32.vlgmr.msra.gmra.mrb[56].mxu1 %vm334_vm2, %v6899_v45 }
0x2961   :  { %v10653_v52 = vpop.eup %10652  ;;  %6705 = vmax.xlane.f32.xlu1 %v6704_v48  ;;  %9601 = vmatmul.mubr.msk.f32.vlgmr.msra.gmra.mrb[52].mxu0 %vm334_vm2, %v9597_v44 }
0x2962   :  { %10080 = vmatpush3.bf16.msra.mxu0 %v10077_v39  ;;  %v6440_v54 = vmul.f32 %v10653_v52, %v10649_v26 }
0x2963   :  { %9617 = vmatprep.subr.mxu0 %v8722_v53 }
0x2964   :  { %9614 = vmatprep.mubr.msk.f32.mxu0 %vm69_vm0, %v6440_v54 }
0x2965   :  { %9615 = vmatmul.mubr.msk.f32.vlgmr.msra.gmra.mrb[56].mxu0 %vm69_vm0, %v6442_v55 }
0x2966   :  { %9618 = vmatpush3.msra.mxu0 %v8722_v53 }
0x29ec   :  { %v6709_v56 = vpop.xlane.xlu0 %6708 }
0x29ed   :  { %v6711_v57 = vsub.f32 %v6701_v0, %v6709_v56 }
0x29ee   :  { %v6706_v59 = vpop.xlane.xlu1 %6705 }
0x29ef   :  { %v6714_v60 = vmul.f32 1.442695, %v6711_v57  ;;  %v6710_v6 = vsub.f32 %v6696_v42, %v6706_v59 }
0x29f1   :  { %10654 = vpow2.f32 %v6714_v60  ;;  %v6712_v62 = vmul.f32 1.442695, %v6710_v6 }
0x29f3   :  { %10656 = vpow2.f32 %v6712_v62 }
0x29fb   :  { %v10655_v51 = vpop.eup %10654 }
0x29fc   :  { %v6719_v10 = vsel %vm69_vm0, %v10655_v51, 0.0 }
0x29fd   :  { %v10657_v63 = vpop.eup %10656  ;;  %6720 = vadd.xlane.f32.xlu1 %v6719_v10 }
0x29fe   :  { %v6716_v12 = vsel %vm69_vm0, %v10657_v63, 0.0 }
0x29ff   :  { %6717 = vadd.xlane.f32.xlu0 %v6716_v12 }
0x2a0e   :  { %10452 = vrot.lane.b32.xlu1 %v11930_v11, %s12479_s30 }
0x2a12   :  { %7179 = vrot.lane.b32.xlu1 %v11921_v30, %s12478_s20 }
0x2a15   :  { %10447 = vrot.lane.b32.xlu0 %v11932_v40, %s12474_s25 }
0x2a19   :  { %7181 = vrot.lane.b32.xlu0 %v11926_v36, %s12478_s20 }
0x2a33   :  { %v9647_v3 = vpop.f32.mrb[56].mxu1 }
0x2a34   :  { %v6984_v23 = vadd.f32 %v11951_v47, %v9647_v3  ;;  %v6978_v4 = vpop.f32.mrb[57].mxu1 }
0x2a35   :  { %v6979_v5 = vadd.f32 %v11945_v49, %v6978_v4 }
0x2a36   :  { %v6990_v25 = vsel %vm69_vm0, %v6984_v23, -inf }
0x2a37   :  { %v6987_v7 = vsel %vm69_vm0, %v6979_v5, -inf }
0x2a38   :  { %6991 = vmax.xlane.f32.xlu0 %v6990_v25  ;;  %6988 = vmax.xlane.f32.xlu1 %v6987_v7  ;;  %v9616_v8 = vpop.f32.mrb[56].mxu0 }
0x2a39   :  { %v6521_v9 = vpop.f32.mrb[57].mxu0 }
0x2a3a   :  { %9619 = vmatprep.mubr.msk.f32.mxu0 %vm334_vm2, %v6521_v9  ;;  %v8724_v9 = vld [vmem:[%s12403_s6 + $0xa0] sm:$0xff] }
0x2a3b   :  { %9620 = vmatmul.mubr.msk.f32.vlgmr.msra.gmra.mrb[52].mxu0 %vm334_vm2, %v9616_v8 }
0x2a8a   :  { %v6721_v13 = vpop.xlane.xlu1 %6720 }
0x2a8b   :  { %10658 = vrcp.f32 %v6721_v13 }
0x2a8c   :  { %v6718_v35 = vpop.xlane.xlu0 %6717 }
0x2a8d   :  { %10660 = vrcp.f32 %v6718_v35 }
0x2a8e   :  { %v10453_v14 = vpop.permute.xlu1 %10452 }
0x2a8f   :  { %v10455_v33 = vunpack.i.h.bf16 %v10453_v14  ;;  %v10454_v15 = vunpack.i.l.bf16 %v10453_v14 }
0x2a90   :  { %v10448_v17 = vpop.permute.xlu0 %10447 }
0x2a91   :  { %v10101_v18 = vpack.c.bf16 %v10455_v33, %v10454_v15  ;;  %v10450_v19 = vunpack.i.h.bf16 %v10448_v17  ;;  %v10449_v20 = vunpack.i.l.bf16 %v10448_v17 }
0x2a92   :  { %v7180_v21 = vpop.permute.xlu1 %7179 }
0x2a93   :  { %v10087_v22 = vpack.c.bf16 %v10450_v19, %v10449_v20  ;;  %10103 = vmatprep.subr.msk.bf16.mxu1 %vm10959_vm3, %v10101_v18  ;;  %9664 = vmatprep.mubr.msk.f32.mxu1 %vm334_vm2, %v7180_v21 }
0x2a94   :  { %10106 = vmatpush3.bf16.xpose.msk.msra.mxu1 %vm10959_vm3, %v10101_v18  ;;  %v7182_v28 = vpop.permute.xlu0 %7181 }
0x2a95   :  { %10088 = vmatprep.subr.bf16.mxu0 %v10087_v22  ;;  %v10659_v24 = vpop.eup %10658 }
0x2a96   :  { %10090 = vmatpush3.bf16.msra.mxu0 %v10087_v22  ;;  %v6725_v1 = vmul.f32 %v10659_v24, %v10655_v51 }
0x2a97   :  { %v10661_v26 = vpop.eup %10660  ;;  %9636 = vmatprep.subr.mxu0 %v8723_v43 }
0x2a98   :  { %v6723_v27 = vmul.f32 %v10661_v26, %v10657_v63 }
0x2a9a   :  { %9633 = vmatprep.mubr.msk.f32.mxu0 %vm69_vm0, %v6723_v27 }
0x2a9b   :  { %9634 = vmatmul.mubr.msk.f32.vlgmr.msra.gmra.mrb[58].mxu0 %vm69_vm0, %v6725_v1  ;;  %9665 = vmatmul.mubr.msk.f32.vlgmr.msra.gmra.mrb[58].mxu1 %vm334_vm2, %v7182_v28 }
0x2a9c   :  { %9637 = vmatpush3.msra.mxu0 %v8723_v43 }
0x2ac5   :  { %v6992_v31 = vpop.xlane.xlu0 %6991  ;;  %v6989_v32 = vpop.xlane.xlu1 %6988 }
0x2ac6   :  { %v6994_v34 = vsub.f32 %v6984_v23, %v6992_v31  ;;  %v6993_v37 = vsub.f32 %v6979_v5, %v6989_v32 }
0x2ac8   :  { %v6997_v0 = vmul.f32 1.442695, %v6994_v34  ;;  %v6995_v61 = vmul.f32 1.442695, %v6993_v37 }
0x2aca   :  { %10662 = vpow2.f32 %v6997_v0 }
0x2acb   :  { %10664 = vpow2.f32 %v6995_v61 }
0x2ad4   :  { %v10663_v39 = vpop.eup %10662 }
0x2ad5   :  { %v10665_v42 = vpop.eup %10664  ;;  %v7002_v44 = vsel %vm69_vm0, %v10663_v39, 0.0 }
0x2ad6   :  { %7003 = vadd.xlane.f32.xlu1 %v7002_v44  ;;  %v6999_v45 = vsel %vm69_vm0, %v10665_v42, 0.0 }
0x2ad7   :  { %7000 = vadd.xlane.f32.xlu0 %v6999_v45 }
0x2ae7   :  { %10462 = vrot.lane.b32.xlu1 %v11930_v11, %s12481_s21 }
0x2aeb   :  { %7462 = vrot.lane.b32.xlu1 %v11921_v30, %s12487_s2 }
0x2aed   :  { %10457 = vrot.lane.b32.xlu0 %v11932_v40, %s12475_s29  ;;  %s12492_s29 = sld [smem:[#allocation12_spill]] }
0x2af1   :  { %7464 = vrot.lane.b32.xlu0 %v11926_v36, %s12487_s2 }
0x2b63   :  { %v7004_v46 = vpop.xlane.xlu1 %7003 }
0x2b64   :  { %v7001_v48 = vpop.xlane.xlu0 %7000 }
0x2b65   :  { %10666 = vrcp.f32 %v7001_v48 }
0x2b66   :  { %10668 = vrcp.f32 %v7004_v46 }
0x2b67   :  { %v10463_v50 = vpop.permute.xlu1 %10462 }
0x2b68   :  { %v10458_v52 = vpop.permute.xlu0 %10457  ;;  %v10465_v54 = vunpack.i.h.bf16 %v10463_v50  ;;  %v10464_v55 = vunpack.i.l.bf16 %v10463_v50 }
0x2b69   :  { %v10460_v53 = vunpack.i.h.bf16 %v10458_v52  ;;  %v10459_v56 = vunpack.i.l.bf16 %v10458_v52 }
0x2b6a   :  { %v10111_v57 = vpack.c.bf16 %v10465_v54, %v10464_v55 }
0x2b6b   :  { %v10097_v59 = vpack.c.bf16 %v10460_v53, %v10459_v56  ;;  %v7463_v60 = vpop.permute.xlu1 %7462 }
0x2b6c   :  { %10113 = vmatprep.subr.msk.bf16.mxu1 %vm10959_vm3, %v10111_v57  ;;  %9683 = vmatprep.mubr.msk.f32.mxu1 %vm334_vm2, %v7463_v60  ;;  %v7465_v8 = vpop.permute.xlu0 %7464 }
0x2b6d   :  { %10098 = vmatprep.subr.bf16.mxu0 %v10097_v59  ;;  %10116 = vmatpush3.bf16.xpose.msk.msra.mxu1 %vm10959_vm3, %v10111_v57 }
0x2b6e   :  { %v9635_v6 = vpop.f32.mrb[58].mxu0  ;;  %v9666_v62 = vpop.f32.mrb[58].mxu1 }
0x2b6f   :  { %v10667_v51 = vpop.eup %10666  ;;  %v6804_v10 = vpop.f32.mrb[59].mxu0  ;;  %v7267_v63 = vadd.f32 %v11951_v47, %v9666_v62 }
0x2b70   :  { %v7261_v12 = vpop.f32.mrb[59].mxu1  ;;  %v10669_v3 = vpop.eup %10668  ;;  %9638 = vmatprep.mubr.msk.f32.mxu0 %vm334_vm2, %v6804_v10  ;;  %v7006_v4 = vmul.f32 %v10667_v51, %v10665_v42  ;;  %v8725_v51 = vld [vmem:[%s12403_s6 + $0xa8] sm:$0xff] }
0x2b71   :  { %v7262_v23 = vadd.f32 %v11945_v49, %v7261_v12  ;;  %9639 = vmatmul.mubr.msk.f32.vlgmr.msra.gmra.mrb[52].mxu0 %vm334_vm2, %v9635_v6  ;;  %v7273_v5 = vsel %vm69_vm0, %v7267_v63, -inf  ;;  %v7008_v7 = vmul.f32 %v10669_v3, %v10663_v39 }
0x2b72   :  { %10100 = vmatpush3.bf16.msra.mxu0 %v10097_v59  ;;  %9652 = vmatprep.mubr.msk.f32.mxu0 %vm69_vm0, %v7006_v4 }
0x2b73   :  { %v7270_v25 = vsel %vm69_vm0, %v7262_v23, -inf  ;;  %7274 = vmax.xlane.f32.xlu0 %v7273_v5  ;;  %9655 = vmatprep.subr.mxu0 %v8724_v9 }
0x2b74   :  { %7271 = vmax.xlane.f32.xlu1 %v7270_v25  ;;  %9684 = vmatmul.mubr.msk.f32.vlgmr.msra.gmra.mrb[60].mxu1 %vm334_vm2, %v7465_v8 }
0x2b75   :  { %9653 = vmatmul.mubr.msk.f32.vlgmr.msra.gmra.mrb[60].mxu0 %vm69_vm0, %v7008_v7 }
0x2b76   :  { %9656 = vmatpush3.msra.mxu0 %v8724_v9 }
0x2c00   :  { %v7275_v13 = vpop.xlane.xlu0 %7274 }
0x2c01   :  { %v7272_v35 = vpop.xlane.xlu1 %7271  ;;  %v7277_v14 = vsub.f32 %v7267_v63, %v7275_v13 }
0x2c02   :  { %v7276_v33 = vsub.f32 %v7262_v23, %v7272_v35 }
0x2c03   :  { %v7280_v15 = vmul.f32 1.442695, %v7277_v14 }
0x2c04   :  { %v7278_v17 = vmul.f32 1.442695, %v7276_v33 }
0x2c05   :  { %10670 = vpow2.f32 %v7280_v15 }
0x2c06   :  { %10672 = vpow2.f32 %v7278_v17 }
0x2c0f   :  { %v10671_v18 = vpop.eup %10670 }
0x2c10   :  { %v10673_v19 = vpop.eup %10672  ;;  %v7285_v20 = vsel %vm69_vm0, %v10671_v18, 0.0 }
0x2c11   :  { %7286 = vadd.xlane.f32.xlu1 %v7285_v20  ;;  %v7282_v21 = vsel %vm69_vm0, %v10673_v19, 0.0 }
0x2c12   :  { %7283 = vadd.xlane.f32.xlu0 %v7282_v21 }
0x2c22   :  { %10472 = vrot.lane.b32.xlu1 %v11930_v11, %s12488_s28 }
0x2c26   :  { %7745 = vrot.lane.b32.xlu1 %v11921_v30, %s12489_s18 }
0x2c28   :  { %10467 = vrot.lane.b32.xlu0 %v11932_v40, %s12478_s20  ;;  %s12493_s20 = sld [smem:[#allocation11_spill]] }
0x2c2c   :  { %7747 = vrot.lane.b32.xlu0 %v11926_v36, %s12489_s18 }
0x2c47   :  { %v9685_v22 = vpop.f32.mrb[60].mxu1 }
0x2c48   :  { %v7550_v24 = vadd.f32 %v11951_v47, %v9685_v22  ;;  %v9654_v26 = vpop.f32.mrb[60].mxu0  ;;  %v7544_v27 = vpop.f32.mrb[61].mxu1 }
0x2c49   :  { %v7545_v1 = vadd.f32 %v11945_v49, %v7544_v27  ;;  %v7087_v28 = vpop.f32.mrb[61].mxu0 }
0x2c4a   :  { %9657 = vmatprep.mubr.msk.f32.mxu0 %vm334_vm2, %v7087_v28  ;;  %v7556_v11 = vsel %vm69_vm0, %v7550_v24, -inf }
0x2c4b   :  { %7557 = vmax.xlane.f32.xlu0 %v7556_v11  ;;  %9658 = vmatmul.mubr.msk.f32.vlgmr.msra.gmra.mrb[52].mxu0 %vm334_vm2, %v9654_v26  ;;  %v7553_v30 = vsel %vm69_vm0, %v7545_v1, -inf }
0x2c4c   :  { %7554 = vmax.xlane.f32.xlu1 %v7553_v30 }
0x2c9e   :  { %v7287_v31 = vpop.xlane.xlu1 %7286 }
0x2c9f   :  { %10674 = vrcp.f32 %v7287_v31  ;;  %v7284_v36 = vpop.xlane.xlu0 %7283 }
0x2ca0   :  { %10676 = vrcp.f32 %v7284_v36 }
0x2ca2   :  { %v10473_v32 = vpop.permute.xlu1 %10472 }
0x2ca3   :  { %v10475_v34 = vunpack.i.h.bf16 %v10473_v32  ;;  %v10474_v37 = vunpack.i.l.bf16 %v10473_v32  ;;  %v10468_v0 = vpop.permute.xlu0 %10467 }
0x2ca4   :  { %v10470_v61 = vunpack.i.h.bf16 %v10468_v0  ;;  %v10469_v39 = vunpack.i.l.bf16 %v10468_v0 }
0x2ca5   :  { %v10121_v42 = vpack.c.bf16 %v10475_v34, %v10474_v37 }
0x2ca6   :  { %v10107_v44 = vpack.c.bf16 %v10470_v61, %v10469_v39  ;;  %v7746_v45 = vpop.permute.xlu1 %7745 }
0x2ca7   :  { %10123 = vmatprep.subr.msk.bf16.mxu1 %vm10959_vm3, %v10121_v42  ;;  %9702 = vmatprep.mubr.msk.f32.mxu1 %vm334_vm2, %v7746_v45  ;;  %v7748_v52 = vpop.permute.xlu0 %7747 }
0x2ca8   :  { %10108 = vmatprep.subr.bf16.mxu0 %v10107_v44  ;;  %10126 = vmatpush3.bf16.xpose.msk.msra.mxu1 %vm10959_vm3, %v10121_v42 }
0x2ca9   :  { %v10675_v43 = vpop.eup %10674  ;;  %10110 = vmatpush3.bf16.msra.mxu0 %v10107_v44  ;;  %v8727_v44 = vld [vmem:[%s12403_s6 + $0xb8] sm:$0xff] }
0x2caa   :  { %v10677_v46 = vpop.eup %10676  ;;  %v7291_v50 = vmul.f32 %v10675_v43, %v10671_v18  ;;  %9674 = vmatprep.subr.mxu0 %v8725_v51 }
0x2cab   :  { %v7289_v48 = vmul.f32 %v10677_v46, %v10673_v19  ;;  %v8793_v46 = vld [vmem:[%s12490_s17 + $0x2] ss:$0 sm:$0xff] }
0x2cad   :  { %9671 = vmatprep.mubr.msk.f32.mxu0 %vm69_vm0, %v7289_v48 }
0x2cae   :  { %9672 = vmatmul.mubr.msk.f32.vlgmr.msra.gmra.mrb[62].mxu0 %vm69_vm0, %v7291_v50 }
0x2caf   :  { %9703 = vmatmul.mubr.msk.f32.vlgmr.msra.gmra.mrb[62].mxu1 %vm334_vm2, %v7748_v52  ;;  %9675 = vmatpush3.msra.mxu0 %v8725_v51 }
0x2cb0   :  { %8153 = vmatprep.mubr.f32.mxu1 %v10730_v29 }
0x2cd8   :  { %v7558_v54 = vpop.xlane.xlu0 %7557 }
0x2cd9   :  { %v7560_v55 = vsub.f32 %v7550_v24, %v7558_v54  ;;  %v7555_v53 = vpop.xlane.xlu1 %7554 }
0x2cda   :  { %v7559_v56 = vsub.f32 %v7545_v1, %v7555_v53 }
0x2cdb   :  { %v7563_v58 = vmul.f32 1.442695, %v7560_v55 }
0x2cdc   :  { %v7561_v57 = vmul.f32 1.442695, %v7559_v56 }
0x2cdd   :  { %10678 = vpow2.f32 %v7563_v58 }
0x2cde   :  { %10680 = vpow2.f32 %v7561_v57 }
0x2ce7   :  { %v10679_v59 = vpop.eup %10678 }
0x2ce8   :  { %v10681_v60 = vpop.eup %10680  ;;  %v7568_v6 = vsel %vm69_vm0, %v10679_v59, 0.0 }
0x2ce9   :  { %7569 = vadd.xlane.f32.xlu1 %v7568_v6  ;;  %v7565_v62 = vsel %vm69_vm0, %v10681_v60, 0.0 }
0x2cea   :  { %7566 = vadd.xlane.f32.xlu0 %v7565_v62 }
0x2d00   :  { %10477 = vrot.lane.b32.xlu0 %v11932_v40, %s12487_s2 }
0x2d76   :  { %v7570_v10 = vpop.xlane.xlu1 %7569 }
0x2d77   :  { %v7567_v63 = vpop.xlane.xlu0 %7566 }
0x2d78   :  { %10682 = vrcp.f32 %v7567_v63 }
0x2d79   :  { %10684 = vrcp.f32 %v7570_v10 }
0x2d7b   :  { %v10478_v12 = vpop.permute.xlu0 %10477 }
0x2d7c   :  { %v10480_v3 = vunpack.i.h.bf16 %v10478_v12  ;;  %v10479_v23 = vunpack.i.l.bf16 %v10478_v12  ;;  %v8732_v12 = vld [vmem:[%s12491_s26 + $0x108] sm:$0xff] }
0x2d7e   :  { %v10117_v4 = vpack.c.bf16 %v10480_v3, %v10479_v23  ;;  %v8734_v3 = vld [vmem:[%s12491_s26 + $0x118] sm:$0xff] }
0x2d7f   :  { %v10131_v23 = vpack.c.bf16 %v8734_v3, %v8732_v12  ;;  %v8776_v12 = vld [vmem:[%s12409_s12 + $0x2e0] sm:$0xff]  ;;  %v8777_v3 = vld [vmem:[%s12409_s12 + $0x2e8] sm:$0xff] }
0x2d80   :  { %10118 = vmatprep.subr.bf16.mxu0 %v10117_v4 }
0x2d81   :  { %v9673_v5 = vpop.f32.mrb[62].mxu0  ;;  %10132 = vmatprep.subr.bf16.mxu1 %v10131_v23 }
0x2d82   :  { %v10683_v25 = vpop.eup %10682  ;;  %v7370_v7 = vpop.f32.mrb[63].mxu0 }
0x2d83   :  { %v9704_v8 = vpop.f32.mrb[62].mxu1  ;;  %v10685_v9 = vpop.eup %10684  ;;  %9676 = vmatprep.mubr.msk.f32.mxu0 %vm334_vm2, %v7370_v7  ;;  %v7572_v35 = vmul.f32 %v10683_v25, %v10681_v60  ;;  %v8736_v7 = vld [vmem:[%s12491_s26 + $0x128] sm:$0xff] }
0x2d84   :  { %v7827_v13 = vpop.f32.mrb[63].mxu1  ;;  %9677 = vmatmul.mubr.msk.f32.vlgmr.msra.gmra.mrb[52].mxu0 %vm334_vm2, %v9673_v5  ;;  %v7574_v33 = vmul.f32 %v10685_v9, %v10679_v59  ;;  %v7833_v15 = vadd.f32 %v11951_v47, %v9704_v8  ;;  %v8733_v5 = vld [vmem:[%s12491_s26 + $0x110] sm:$0xff]  ;;  %v8738_v8 = vld [vmem:[%s12491_s26 + $0x138] sm:$0xff] }
0x2d85   :  { %v7828_v14 = vadd.f32 %v11945_v49, %v7827_v13  ;;  %10120 = vmatpush3.bf16.msra.mxu0 %v10117_v4  ;;  %9690 = vmatprep.mubr.msk.f32.mxu0 %vm69_vm0, %v7572_v35  ;;  %v8726_v49 = vld [vmem:[%s12403_s6 + $0xb0] sm:$0xff]  ;;  %v8731_v4 = vld [vmem:[%s12491_s26 + $0x100] sm:$0xff]  ;;  %v10135_v9 = vpack.c.bf16 %v8738_v8, %v8736_v7 }
0x2d86   :  { %v7839_v18 = vsel %vm69_vm0, %v7833_v15, -inf  ;;  %9693 = vmatprep.subr.mxu0 %v8726_v49  ;;  %v10133_v25 = vpack.c.bf16 %v8733_v5, %v8731_v4  ;;  %v8735_v13 = vld [vmem:[%s12491_s26 + $0x120] sm:$0xff]  ;;  %v8737_v35 = vld [vmem:[%s12491_s26 + $0x130] sm:$0xff]  ;;  %v10171_v4 = vpack.c.bf16 %v8777_v3, %v8776_v12 }
0x2d87   :  { %v7836_v17 = vsel %vm69_vm0, %v7828_v14, -inf }
0x2d88   :  { %7837 = vmax.xlane.f32.xlu1 %v7836_v17  ;;  %9691 = vmatmul.mubr.msk.f32.vlgmr.msra.gmra.mrb[64].mxu0 %vm69_vm0, %v7574_v33  ;;  %v8740_v33 = vld [vmem:[%s12491_s26 + $0x148] sm:$0xff] }
0x2d89   :  { %9694 = vmatpush3.msra.mxu0 %v8726_v49  ;;  %10134 = vmatpush1.bf16.msra.mxu1 %v10133_v25  ;;  %v8741_v49 = vld [vmem:[%s12491_s26 + $0x150] sm:$0xff] }
0x2d8a   :  { %10136 = vmatprep.subr.bf16.mxu1 %v10135_v9 }
0x2d8c   :  { %7840 = vmax.xlane.f32.xlu1 %v7839_v18  ;;  %v8739_v18 = vld [vmem:[%s12491_s26 + $0x140] sm:$0xff] }
0x2e15   :  { %v7838_v19 = vpop.xlane.xlu1 %7837 }
0x2e16   :  { %v7842_v20 = vsub.f32 %v7828_v14, %v7838_v19  ;;  %v10137_v14 = vpack.c.bf16 %v8737_v35, %v8735_v13  ;;  %v10141_v19 = vpack.c.bf16 %v8741_v49, %v8739_v18 }
0x2e18   :  { %v7844_v24 = vmul.f32 1.442695, %v7842_v20  ;;  %10138 = vmatpush1.bf16.msra.mxu1 %v10137_v14  ;;  %v8744_v20 = vld [vmem:[%s12491_s26 + $0x168] sm:$0xff]  ;;  %v8850_v14 = vld [vmem:[%s12405_s8 + $0x2] ss:$0 sm:$0xff] }
0x2e19   :  { %v7841_v21 = vpop.xlane.xlu1 %7840 }
0x2e1a   :  { %v7843_v22 = vsub.f32 %v7833_v15, %v7841_v21  ;;  %v8742_v15 = vld [vmem:[%s12491_s26 + $0x158] sm:$0xff] }
0x2e1b   :  { %v10139_v17 = vpack.c.bf16 %v8742_v15, %v8740_v33  ;;  %v8746_v21 = vld [vmem:[%s12491_s26 + $0x178] sm:$0xff]  ;;  %v8851_v15 = vld [vmem:[%s12406_s9 + $0x2] ss:$0 sm:$0xff] }
0x2e1c   :  { %v7846_v47 = vmul.f32 1.442695, %v7843_v22  ;;  %v8743_v22 = vld [vmem:[%s12491_s26 + $0x160] sm:$0xff] }
0x2e1d   :  { %10140 = vmatprep.subr.bf16.mxu1 %v10139_v17 }
0x2e1e   :  { %10686 = vpow2.f32 %v7846_v47  ;;  %10142 = vmatpush1.bf16.msra.mxu1 %v10141_v19  ;;  %v8745_v47 = vld [vmem:[%s12491_s26 + $0x170] sm:$0xff] }
0x2e1f   :  { %10688 = vpow2.f32 %v7844_v24  ;;  %v10143_v24 = vpack.c.bf16 %v8746_v21, %v8744_v20 }
0x2e21   :  { %10144 = vmatprep.subr.bf16.mxu1 %v10143_v24 }
0x2e28   :  { %v10687_v26 = vpop.eup %10686 }
0x2e29   :  { %v7851_v27 = vsel %vm69_vm0, %v10687_v26, 0.0  ;;  %v10689_v1 = vpop.eup %10688 }
0x2e2a   :  { %7852 = vadd.xlane.f32.xlu1 %v7851_v27  ;;  %v7848_v28 = vsel %vm69_vm0, %v10689_v1, 0.0  ;;  %v8764_v27 = vld [vmem:[%s12409_s12 + $0x280] sm:$0xff] }
0x2e2e   :  { %7849 = vadd.xlane.f32.xlu1 %v7848_v28  ;;  %v8748_v28 = vld [vmem:[%s12409_s12 + $0x200] sm:$0xff] }
0x2e3f   :  { %10482 = vrot.lane.b32.xlu1 %v11932_v40, %s12489_s18 }
0x2e5b   :  { %v9692_v11 = vpop.f32.mrb[64].mxu0 }
0x2e5c   :  { %v7653_v30 = vpop.f32.mrb[65].mxu0 }
0x2e5d   :  { %9695 = vmatprep.mubr.msk.f32.mxu0 %vm334_vm2, %v7653_v30  ;;  %v8749_v30 = vld [vmem:[%s12409_s12 + $0x208] sm:$0xff] }
0x2e5e   :  { %9696 = vmatmul.mubr.msk.f32.vlgmr.msra.gmra.mrb[52].mxu0 %vm334_vm2, %v9692_v11 }
0x2eb7   :  { %v7853_v31 = vpop.xlane.xlu1 %7852 }
0x2eb8   :  { %10690 = vrcp.f32 %v7853_v31  ;;  %v8766_v31 = vld [vmem:[%s12409_s12 + $0x290] sm:$0xff] }
0x2ebb   :  { %v7850_v36 = vpop.xlane.xlu1 %7849 }
0x2ebc   :  { %10692 = vrcp.f32 %v7850_v36  ;;  %v8767_v36 = vld [vmem:[%s12409_s12 + $0x298] sm:$0xff] }
0x2ebf   :  { %v10483_v32 = vpop.permute.xlu1 %10482 }
0x2ec0   :  { %v10485_v34 = vunpack.i.h.bf16 %v10483_v32  ;;  %v10484_v37 = vunpack.i.l.bf16 %v10483_v32  ;;  %v10149_v32 = vpack.c.bf16 %v8749_v30, %v8748_v28 }
0x2ec2   :  { %v10127_v0 = vpack.c.bf16 %v10485_v34, %v10484_v37  ;;  %v10691_v61 = vpop.eup %10690  ;;  %v10151_v34 = vpack.c.bf16 %v8767_v36, %v8766_v31  ;;  %v8750_v37 = vld [vmem:[%s12409_s12 + $0x210] sm:$0xff] }
0x2ec3   :  { %v7857_v40 = vmul.f32 %v10691_v61, %v10687_v26  ;;  %v10145_v26 = vpack.c.bf16 %v8745_v47, %v8743_v22  ;;  %v8768_v61 = vld [vmem:[%s12409_s12 + $0x2a0] sm:$0xff]  ;;  %v8761_v22 = vld [vmem:[%s12409_s12 + $0x268] sm:$0xff]  ;;  %v8779_v47 = vld [vmem:[%s12409_s12 + $0x2f8] sm:$0xff] }
0x2ec4   :  { %10128 = vmatprep.subr.bf16.mxu0 %v10127_v0 }
0x2ec5   :  { %10130 = vmatpush3.bf16.msra.mxu0 %v10127_v0  ;;  %10146 = vmatpush1.bf16.msra.mxu1 %v10145_v26  ;;  %v8751_v0 = vld [vmem:[%s12409_s12 + $0x218] sm:$0xff] }
0x2ec6   :  { %v10693_v39 = vpop.eup %10692  ;;  %9712 = vmatprep.subr.mxu0 %v8727_v44 }
0x2ec7   :  { %v7855_v42 = vmul.f32 %v10693_v39, %v10689_v1  ;;  %v8765_v1 = vld [vmem:[%s12409_s12 + $0x288] sm:$0xff] }
0x2ec8   :  { %v10147_v11 = vpack.c.bf16 %v8765_v1, %v8764_v27  ;;  %v8769_v39 = vld [vmem:[%s12409_s12 + $0x2a8] sm:$0xff]  ;;  %v8762_v27 = vld [vmem:[%s12409_s12 + $0x270] sm:$0xff]  ;;  %v8763_v1 = vld [vmem:[%s12409_s12 + $0x278] sm:$0xff] }
0x2ec9   :  { %9709 = vmatprep.mubr.msk.f32.mxu0 %vm69_vm0, %v7855_v42  ;;  %v10153_v42 = vpack.c.bf16 %v8751_v0, %v8750_v37  ;;  %v10177_v28 = vpack.c.bf16 %v8763_v1, %v8762_v27  ;;  %v8371_v27 = vld [vmem:[%s12492_s29 + $0x10] sm:$0xff]  ;;  %v8372_v1 = vld [vmem:[%s12492_s29 + $0x18] sm:$0xff] }
0x2eca   :  { %9710 = vmatmul.mubr.msk.f32.vlgmr.msra.gmra.mrb[66].mxu0 %vm69_vm0, %v7857_v40  ;;  %v10155_v40 = vpack.c.bf16 %v8769_v39, %v8768_v61 }
0x2ecb   :  { %9713 = vmatpush3.msra.mxu0 %v8727_v44  ;;  %v8752_v44 = vld [vmem:[%s12409_s12 + $0x220] sm:$0xff] }
0x2ecc   :  { %10148 = vmatprep.subr.bf16.mxu0 %v10147_v11  ;;  %v8747_v11 = vld [vmem:[%s12408_s11 + $0x4] sm:$0x3]  ;;  %s10706_s11 = scalar_lea.vmem %s8466_s24, 32 }
0x2ecd   :  { %v8076_v30 = vrot.slane %v8747_v11, %v10927_v38  ;;  %v8080_v31 = vrot.slane %v8747_v11, %v10933_v41  ;;  %v8854_v38 = vld [vmem:[%s12410_s13 + $0x2] ss:$0 sm:$0xff]  ;;  %p10707_p0 = scmp.ne.s32.totalorder %s8466_s24, %s10706_s11  ;;  %p10712_p2 = scmp.lt.s32.totalorder %s10706_s11, %s10706_s11 }
0x2ece   :  { %v8373_v11 = vld [vmem:[%s12492_s29 + $0x20] sm:$0xff] }
0x2ecf   :  { %p10713_p3 = por %p10712_p2, %p10711_p1 }
0x2ed1   :  { %p10714_p4 = pnand %p10713_p3, %p10707_p0 }
0x2f9d   :  { %v9711_v45 = vpop.f32.mrb[66].mxu0 }
0x2f9e   :  { %v7936_v43 = vpop.f32.mrb[67].mxu0 }
0x2f9f   :  { %9714 = vmatprep.mubr.msk.f32.mxu0 %vm334_vm2, %v7936_v43  ;;  %v8770_v43 = vld [vmem:[%s12409_s12 + $0x2b0] sm:$0xff] }
0x2fa0   :  { %9715 = vmatmul.mubr.msk.f32.vlgmr.msra.gmra.mrb[52].mxu0 %vm334_vm2, %v9711_v45  ;;  %v8753_v45 = vld [vmem:[%s12409_s12 + $0x228] sm:$0xff] }
0x2fa1   :  { %10150 = vmatpush3.bf16.msra.mxu0 %v10149_v32 }
0x2fa2   :  { %10152 = vmatprep.subr.bf16.mxu0 %v10151_v34 }
0x2fa5   :  { %10154 = vmatpush3.bf16.msra.mxu0 %v10153_v42 }
0x2fa6   :  { %10156 = vmatprep.subr.bf16.mxu0 %v10155_v40 }
0x3073   :  { %v9716_v48 = vpop.f32.mrb[52].mxu0 }
0x3074   :  { %v10198_v50 = vadd.f32 %v9716_v48, %v8793_v46  ;;  %v8017_v52 = vpop.f32.mrb[53].mxu0  ;;  %v10157_v48 = vpack.c.bf16 %v8753_v45, %v8752_v44 }
0x3075   :  { %v10199_v54 = vadd.f32 %v8793_v46, %v8017_v52  ;;  %v8771_v46 = vld [vmem:[%s12409_s12 + $0x2b8] sm:$0xff]  ;;  %v8754_v52 = vld [vmem:[%s12409_s12 + $0x230] sm:$0xff] }
0x3076   :  { %v8029_v55 = vadd.f32 %v10198_v50, %v11913_v2  ;;  %v10159_v50 = vpack.c.bf16 %v8771_v46, %v8770_v43  ;;  %10158 = vmatpush3.bf16.msra.mxu0 %v10157_v48 }
0x3077   :  { %v8028_v53 = vadd.f32 %v10199_v54, %v11908_v16  ;;  %v8755_v54 = vld [vmem:[%s12409_s12 + $0x238] sm:$0xff] }
0x3078   :  { %v8033_v56 = vsel %vm244_vm1, %v8029_v55, 0.0  ;;  %10160 = vmatprep.subr.bf16.mxu0 %v10159_v50 }
0x3079   :  { %8034 = vadd.xlane.f32.xlu1 %v8033_v56  ;;  %v8030_v58 = vsel %vm244_vm1, %v8028_v53, 0.0  ;;  %v10161_v56 = vpack.c.bf16 %v8755_v54, %v8754_v52 }
0x307a   :  { %8031 = vadd.xlane.f32.xlu0 %v8030_v58 }
0x307b   :  { %10162 = vmatpush3.bf16.msra.mxu0 %v10161_v56 }
0x3106   :  { %v8035_v57 = vpop.xlane.xlu1 %8034 }
0x3107   :  { %v8037_v59 = vmul.f32 0.015625, %v8035_v57  ;;  %v8032_v60 = vpop.xlane.xlu0 %8031  ;;  %v8756_v57 = vld [vmem:[%s12409_s12 + $0x240] sm:$0xff] }
0x3108   :  { %v8036_v6 = vmul.f32 0.015625, %v8032_v60  ;;  %v8774_v60 = vld [vmem:[%s12409_s12 + $0x2d0] sm:$0xff] }
0x3109   :  { %v12166_v62 = vsub.f32 %v8029_v55, %v8037_v59  ;;  %v8772_v55 = vld [vmem:[%s12409_s12 + $0x2c0] sm:$0xff]  ;;  %v8757_v59 = vld [vmem:[%s12409_s12 + $0x248] sm:$0xff] }
0x310a   :  { %v12168_v51 = vsub.f32 %v8028_v53, %v8036_v6  ;;  %v8773_v53 = vld [vmem:[%s12409_s12 + $0x2c8] sm:$0xff]  ;;  %v8775_v6 = vld [vmem:[%s12409_s12 + $0x2d8] sm:$0xff] }
0x310b   :  { %v8041_v16 = vmul.f32 %v12166_v62, %v12166_v62  ;;  %v10163_v58 = vpack.c.bf16 %v8773_v53, %v8772_v55 }
0x310c   :  { %v8040_v10 = vmul.f32 %v12168_v51, %v12168_v51 }
0x310d   :  { %v8045_v63 = vsel %vm244_vm1, %v8041_v16, 0.0  ;;  %10164 = vmatprep.subr.bf16.mxu0 %v10163_v58  ;;  %v8758_v16 = vld [vmem:[%s12409_s12 + $0x250] sm:$0xff] }
0x310e   :  { %v8042_v2 = vsel %vm244_vm1, %v8040_v10, 0.0  ;;  %v10165_v10 = vpack.c.bf16 %v8757_v59, %v8756_v57 }
0x310f   :  { %8043 = vadd.xlane.f32.xlu0 %v8042_v2  ;;  %v10167_v2 = vpack.c.bf16 %v8775_v6, %v8774_v60 }
0x3110   :  { %10166 = vmatpush3.bf16.msra.mxu0 %v10165_v10 }
0x3111   :  { %10168 = vmatprep.subr.bf16.mxu0 %v10167_v2 }
0x3113   :  { %8046 = vadd.xlane.f32.xlu0 %v8045_v63  ;;  %v8759_v63 = vld [vmem:[%s12409_s12 + $0x258] sm:$0xff] }
0x3114   :  { %v10169_v23 = vpack.c.bf16 %v8759_v63, %v8758_v16 }
0x3116   :  { %10170 = vmatpush3.bf16.msra.mxu0 %v10169_v23 }
0x3117   :  { %10172 = vmatprep.subr.bf16.mxu0 %v10171_v4 }
0x319c   :  { %v8044_v5 = vpop.xlane.xlu0 %8043 }
0x319d   :  { %v8048_v25 = vmul.f32 0.015625, %v8044_v5  ;;  %v10746_v5 = vmov 0.0|0.0  }
0x319e   :  { %10179 = vmatprep.subr.bf16.mxu1 %v10746_v5 }
0x319f   :  { %v8050_v7 = vadd.f32 1e-05, %v8048_v25 }
0x31a0   :  { %v8047_v8 = vpop.xlane.xlu0 %8046 }
0x31a1   :  { %10694 = vrsqrt.f32 %v8050_v7  ;;  %v8049_v9 = vmul.f32 0.015625, %v8047_v8 }
0x31a3   :  { %v8051_v13 = vadd.f32 1e-05, %v8049_v9 }
0x31a5   :  { %10696 = vrsqrt.f32 %v8051_v13 }
0x31ab   :  { %v10695_v35 = vpop.eup %10694 }
0x31ac   :  { %v8054_v33 = vmul.f32 %v10695_v35, %v12168_v51  ;;  %v8760_v51 = vld [vmem:[%s12409_s12 + $0x260] sm:$0xff] }
0x31ad   :  { %v10173_v24 = vpack.c.bf16 %v8761_v22, %v8760_v51  ;;  %v8369_v22 = vld [vmem:[%s12492_s29] sm:$0xff] }
0x31ae   :  { %v8062_v17 = vmul.f32 %v8850_v14, %v8054_v33 }
0x31af   :  { %v10697_v18 = vpop.eup %10696  ;;  %10174 = vmatpush3.bf16.msra.mxu0 %v10173_v24  ;;  %v8370_v24 = vld [vmem:[%s12492_s29 + $0x8] sm:$0xff] }
0x31b0   :  { %v8070_v49 = vadd.f32 %v8851_v15, %v8062_v17  ;;  %v8055_v19 = vmul.f32 %v10697_v18, %v12166_v62  ;;  %v8778_v62 = vld [vmem:[%s12409_s12 + $0x2f0] sm:$0xff] }
0x31b1   :  { %v10175_v26 = vpack.c.bf16 %v8779_v47, %v8778_v62  ;;  %v8295_v47 = vld [vmem:[%s12493_s20] sm:$0x3] }
0x31b2   :  { %8852 = vmatmul.mubr.msk.f32.vlgmr.msra.gmra.mrb[64].mxu1 %vm244_vm1, %v8070_v49  ;;  %v8063_v20 = vmul.f32 %v8850_v14, %v8055_v19  ;;  %v8856_v19 = vld [vmem:[%s12412_s15 + $0x2] ss:$0 sm:$0xff] }
0x31b3   :  { %8159 = vmatprep.mubr.f32.mxu1 %v10730_v29  ;;  %10176 = vmatprep.subr.bf16.mxu0 %v10175_v26  ;;  %v10183_v26 = vpack.c.bf16 %v8370_v24, %v8369_v22 }
0x31b4   :  { %v8071_v21 = vadd.f32 %v8851_v15, %v8063_v20  ;;  %10178 = vmatpush3.bf16.msra.mxu0 %v10177_v28  ;;  %v8855_v15 = vld [vmem:[%s12411_s14 + $0x2] ss:$0 sm:$0xff]  ;;  %v10186_v28 = vpack.c.bf16 %v8372_v1, %v8371_v27 }
0x31b6   :  { %8853 = vmatmul.mubr.msk.f32.gmra.mrb[66].mxu1 %vm244_vm1, %v8071_v21 }
0x31b7   :  { %9721 = vmatprep.mubr.msk.f32.mxu1 %vm10747_vm4, %v10730_v29 }
0x3285   :  { %v8155_v36 = vpop.f32.mrb[64].mxu1 }
0x3286   :  { %v8156_v32 = vadd.f32 %v8155_v36, %v8076_v30  ;;  %v8157_v34 = vpop.f32.mrb[65].mxu1  ;;  %v8375_v36 = vld [vmem:[%s12492_s29 + $0x30] sm:$0xff] }
0x3287   :  { %v8158_v37 = vadd.f32 %v8157_v34, %v8080_v31 }
0x3288   :  { %v8166_v39 = vmax.f32 %v8156_v32, 0.0 }
0x3289   :  { %v8167_v0 = vmax.f32 %v8158_v37, 0.0  ;;  %v8161_v61 = vpop.f32.mrb[66].mxu1 }
0x328a   :  { %v8162_v42 = vadd.f32 %v8161_v61, %v8076_v30  ;;  %v8163_v40 = vpop.f32.mrb[67].mxu1  ;;  %v8374_v30 = vld [vmem:[%s12492_s29 + $0x28] sm:$0xff] }
0x328b   :  { %v8164_v44 = vadd.f32 %v8163_v40, %v8080_v31  ;;  %8240 = vmatprep.mubr.f32.mxu0 %v8167_v0  ;;  %v10189_v31 = vpack.c.bf16 %v8374_v30, %v8373_v11  ;;  %v8858_v0 = vld [vmem:[%s12494_s7] ss:$0 sm:$0xff] }
0x328c   :  { %8241 = vmatmul.mubr.f32.vlgmr.msra.gmra.mrb[68].mxu0 %v8166_v39  ;;  %v8168_v43 = vmax.f32 %v8162_v42, 0.0 }
0x328d   :  { %v8169_v45 = vmax.f32 %v8164_v44, 0.0 }
0x328f   :  { %8245 = vmatprep.mubr.f32.mxu0 %v8169_v45 }
0x3290   :  { %8246 = vmatmul.mubr.f32.gmra.mrb[70].mxu0 %v8168_v43 }
0x335f   :  { %v9236_v46 = vpop.f32.mrb[68].mxu0 }
0x3360   :  { %v9237_v41 = vpop.f32.mrb[69].mxu0 }
0x3361   :  { %v9238_v48 = vadd.f32 %v9237_v41, %v9236_v46 }
0x3363   :  { %v8243_v50 = vadd.f32 %v9238_v48, %v8854_v38  ;;  %v9239_v52 = vpop.f32.mrb[70].mxu0 }
0x3364   :  { %v9240_v54 = vpop.f32.mrb[71].mxu0 }
0x3365   :  { %v9241_v55 = vadd.f32 %v9240_v54, %v9239_v52  ;;  %v8251_v53 = vadd.f32 %v8243_v50, %v8070_v49 }
0x3367   :  { %v8248_v56 = vadd.f32 %v9241_v55, %v8854_v38  ;;  %v8253_v58 = vsel %vm244_vm1, %v8251_v53, 0.0 }
0x3368   :  { %8254 = vadd.xlane.f32.xlu0 %v8253_v58 }
0x3369   :  { %v8252_v57 = vadd.f32 %v8248_v56, %v8071_v21 }
0x336b   :  { %v8256_v59 = vsel %vm244_vm1, %v8252_v57, 0.0 }
0x336c   :  { %8257 = vadd.xlane.f32.xlu0 %v8256_v59 }
0x33f5   :  { %v8255_v60 = vpop.xlane.xlu0 %8254 }
0x33f6   :  { %v8259_v6 = vmul.f32 0.015625, %v8255_v60 }
0x33f8   :  { %v8261_v10 = vsub.f32 %v8251_v53, %v8259_v6 }
0x33f9   :  { %v8258_v2 = vpop.xlane.xlu0 %8257 }
0x33fa   :  { %v8260_v16 = vmul.f32 0.015625, %v8258_v2  ;;  %v8263_v63 = vmul.f32 %v8261_v10, %v8261_v10 }
0x33fc   :  { %v8262_v12 = vsub.f32 %v8252_v57, %v8260_v16  ;;  %v8265_v3 = vsel %vm244_vm1, %v8263_v63, 0.0 }
0x33fd   :  { %8266 = vadd.xlane.f32.xlu0 %v8265_v3 }
0x33fe   :  { %v8264_v23 = vmul.f32 %v8262_v12, %v8262_v12 }
0x3400   :  { %v8268_v4 = vsel %vm244_vm1, %v8264_v23, 0.0 }
0x3401   :  { %8269 = vadd.xlane.f32.xlu1 %v8268_v4 }
0x348a   :  { %v8267_v25 = vpop.xlane.xlu0 %8266 }
0x348b   :  { %v8271_v7 = vmul.f32 0.015625, %v8267_v25 }
0x348d   :  { %v8273_v8 = vadd.f32 1e-05, %v8271_v7 }
0x348e   :  { %v8270_v9 = vpop.xlane.xlu1 %8269 }
0x348f   :  { %10698 = vrsqrt.f32 %v8273_v8  ;;  %v8272_v13 = vmul.f32 0.015625, %v8270_v9 }
0x3491   :  { %v8274_v35 = vadd.f32 1e-05, %v8272_v13 }
0x3493   :  { %10700 = vrsqrt.f32 %v8274_v35 }
0x3499   :  { %v10699_v14 = vpop.eup %10698 }
0x349a   :  { %v8277_v33 = vmul.f32 %v10699_v14, %v8261_v10 }
0x349c   :  { %v8285_v49 = vmul.f32 %v8855_v15, %v8277_v33 }
0x349d   :  { %v10701_v17 = vpop.eup %10700 }
0x349e   :  { %v8278_v18 = vmul.f32 %v10701_v17, %v8262_v12  ;;  %v8293_v21 = vadd.f32 %v8856_v19, %v8285_v49 }
0x34a0   :  { %v8286_v20 = vmul.f32 %v8855_v15, %v8278_v18 }
0x34a2   :  { %v8294_v51 = vadd.f32 %v8856_v19, %v8286_v20 }
0x34a4   :  { %v10180_v62 = vpack.c.bf16 %v8294_v51, %v8293_v21 }
0x34a6   :  { %10181 = vmatpush3.bf16.msra.mxu1 %v10180_v62 }
0x34a7   :  { %10182 = vmatprep.subr.bf16.mxu1 %v10746_v5 }
0x34a9   :  { %9722 = vmatmul.mubr.msk.f32.vlgmr.msra.gmra.mrb[68].mxu1 %vm69_vm0, %v8295_v47 }
0x34aa   :  { %10184 = vmatpush3.bf16.msra.mxu1 %v10183_v26  ;;  %9740 = vmatprep.mubr.msk.f32.mxu1 %vm10747_vm4, %v10730_v29  ;;  %v8376_v29 = vld [vmem:[%s12492_s29 + $0x38] sm:$0xff] }
0x34ab   :  { %10185 = vmatprep.subr.bf16.mxu1 %v10746_v5  ;;  %v10192_v32 = vpack.c.bf16 %v8376_v29, %v8375_v36 }
0x34ae   :  { %10187 = vmatpush3.bf16.msra.mxu1 %v10186_v28 }
0x34af   :  { %10188 = vmatprep.subr.bf16.mxu1 %v10746_v5 }
0x34b2   :  { %10190 = vmatpush3.bf16.msra.mxu1 %v10189_v31 }
0x34b3   :  { %10191 = vmatprep.subr.bf16.mxu1 %v10746_v5 }
0x34b6   :  { %10193 = vmatpush3.bf16.msra.mxu1 %v10192_v32 }
0x357c   :  { %v8365_v34 = vpop.f32.mrb[68].mxu1 }
0x357d   :  { %v9723_v37 = vpop.f32.mrb[69].mxu1  ;;  %9741 = vmatmul.mubr.msk.f32.vlgmr.msra.gmra.mrb[70].mxu1 %vm244_vm1, %v8365_v34 }
0x3650   :  { %v8453_v61 = vpop.f32.mrb[70].mxu1 }
0x3651   :  { %v8454_v39 = vadd.f32 %v8858_v0, %v8453_v61  ;;  %v9742_v42 = vpop.f32.mrb[71].mxu1 }
0x3653   :  { %8458 = vst.msk [vmem:[#allocation2] sm:$0x3] %vm8457_vm5, %v8454_v39 }
0x3654   :  { %10717 = shalt.err (!%p10714_p4)
}
0x3655   :  { %s12495_s27 = sld [smem:[#allocation14_spill]] }
0x365b   :  { %s10718_s1 = scalar_lea.hbm %s12495_s27, 32 }
0x365c   :  { %p10719_p5 = scmp.ne.s32.totalorder %s12495_s27, %s10718_s1  ;;  %p10722_p6 = scmp.lt.u32.totalorder %s10718_s1, %s12495_s27 }
0x365e   :  { %p10724_p7 = pnand %p10722_p6, %p10719_p5 }
0x3660   :  { %10727 = shalt.err (!%p10724_p7)
}
0x3661   :  { %8468 = dma.vmem_to_hbm [thread:$0]  %s8466_s24, 32, %s12495_s27, [#allocation3]  }
0x3662   :  { %10728 = dma.done.wait [#allocation3], 32  }
0x3663   :  { %10729 = vsyncadd [#allocation3], 4294967264 }
0x3664   :  { %8472 = vsyncpa [#allocation3], 1 }

</bundles_post_ra>
